<compile_context>
chip_gen: v7x
topology: tpu7x:2x2x1
jax: 0.10.0
libtpu: 0.0.40
codegen_flags: <defaults>
</compile_context>

<pallas_src>
import math
import functools

import jax
import jax.numpy as jnp
from jax import lax
from jax.experimental import pallas as pl
from jax.experimental.pallas import tpu as pltpu


# ----------------------------------------------------------------------------
# small helpers
# ----------------------------------------------------------------------------
def _round_up(n, m):
    return ((n + m - 1) // m) * m


def _pad_axis(x, axis, target):
    pad = target - x.shape[axis]
    if pad <= 0:
        return x
    widths = [(0, 0)] * x.ndim
    widths[axis] = (0, pad)
    return jnp.pad(x, widths)


# ----------------------------------------------------------------------------
# Kernel 1: conv-as-matmul (im2col) fused with folded BatchNorm shift + Hardtanh
#   BN scale is folded into the weight columns host-side; kernel: clip(dot + shift).
# ----------------------------------------------------------------------------
def _conv_mm_bn_htanh_kernel(p_ref, w_ref, shift_ref, o_ref):
    y = jnp.dot(p_ref[...], w_ref[...], preferred_element_type=jnp.float32)
    o_ref[...] = jnp.clip(y + shift_ref[...], 0.0, 20.0)


def conv_mm_bn_htanh(p, w, shift, tile_rows=256):
    """p: (N, K) f32 patches; w: (K, Cout) f32 (BN scale folded); shift: (Cout,)."""
    N, K = p.shape
    Cout = w.shape[1]
    Kp = _round_up(K, 128)
    Cp = _round_up(Cout, 128)
    tile = min(tile_rows, _round_up(N, 8))
    Np = _round_up(N, tile)

    p = _pad_axis(_pad_axis(p, 1, Kp), 0, Np).astype(jnp.bfloat16)
    w = _pad_axis(_pad_axis(w, 0, Kp), 1, Cp).astype(jnp.bfloat16)
    shift = _pad_axis(shift, 0, Cp)[None, :].astype(jnp.float32)

    out = pl.pallas_call(
        _conv_mm_bn_htanh_kernel,
        out_shape=jax.ShapeDtypeStruct((Np, Cp), jnp.float32),
        grid=(Np // tile,),
        in_specs=[
            pl.BlockSpec((tile, Kp), lambda i: (i, 0)),
            pl.BlockSpec((Kp, Cp), lambda i: (0, 0)),
            pl.BlockSpec((1, Cp), lambda i: (0, 0)),
        ],
        out_specs=pl.BlockSpec((tile, Cp), lambda i: (i, 0)),
        compiler_params=pltpu.CompilerParams(
            dimension_semantics=("parallel",),
            vmem_limit_bytes=32 * 1024 * 1024),
    )(p, w, shift)
    return out[:N, :Cout]


# ----------------------------------------------------------------------------
# Kernel 2a: generic row-tiled matmul + bias (used for the hoisted GRU input
#            projection: G = X @ [W_ih_fwd | W_ih_bwd] + bias, BN already folded)
# ----------------------------------------------------------------------------
def _mm_bias_kernel(x_ref, w_ref, b_ref, o_ref):
    o_ref[...] = (jnp.dot(x_ref[...], w_ref[...],
                          preferred_element_type=jnp.float32) + b_ref[...])


def matmul_bias(x, w, b, tile_rows=256):
    """x: (N, K); w: (K, M); b: (M,).  K and M must be multiples of 128."""
    N, K = x.shape
    M = w.shape[1]
    tile = min(tile_rows, _round_up(N, 8))
    Np = _round_up(N, tile)
    xp = _pad_axis(x, 0, Np)
    out = pl.pallas_call(
        _mm_bias_kernel,
        out_shape=jax.ShapeDtypeStruct((Np, M), jnp.float32),
        grid=(Np // tile,),
        in_specs=[
            pl.BlockSpec((tile, K), lambda i: (i, 0)),
            pl.BlockSpec((K, M), lambda i: (0, 0)),
            pl.BlockSpec((1, M), lambda i: (0, 0)),
        ],
        out_specs=pl.BlockSpec((tile, M), lambda i: (i, 0)),
        compiler_params=pltpu.CompilerParams(
            dimension_semantics=("parallel",),
            vmem_limit_bytes=32 * 1024 * 1024),
    )(xp, w, b[None, :])
    return out[:N]


# ----------------------------------------------------------------------------
# Kernel 2b: bidirectional GRU recurrence (bias=False), PyTorch gate equations:
#   r = sigmoid(Wir x + Whr h); z = sigmoid(Wiz x + Whz h)
#   n = tanh(Win x + r * (Whn h)); h' = (1-z)*n + z*h
# Input projections (Wi* x, + folded BN bias) are precomputed in `g` for both
# directions.  Forward (t = i) and backward (t = T-1-i) are interleaved in one
# loop; backward results are summed via a single bulk add at the end.
# ----------------------------------------------------------------------------
def _bigru_recurrent_kernel(g_ref, whh_ref, o_ref, hf_ref, hb_ref, ob_ref):
    T = g_ref.shape[0]
    Hp = hf_ref.shape[1]

    hf_ref[...] = jnp.zeros_like(hf_ref)
    hb_ref[...] = jnp.zeros_like(hb_ref)

    def gru_cell(a, rh, h):
        r = jax.nn.sigmoid(a[:, :Hp] + rh[:, :Hp])
        z = jax.nn.sigmoid(a[:, Hp:2 * Hp] + rh[:, Hp:2 * Hp])
        n = jnp.tanh(a[:, 2 * Hp:] + r * rh[:, 2 * Hp:])
        return (1.0 - z) * n + z * h

    def step(i, carry):
        tb = T - 1 - i
        gf = g_ref[i]              # (B2, 6Hp) : forward gates in [:, :3Hp]
        gb = g_ref[tb]             # backward gates in [:, 3Hp:]
        hf = hf_ref[...]
        hb = hb_ref[...]
        rh_f = jnp.dot(hf, whh_ref[0], preferred_element_type=jnp.float32)
        rh_b = jnp.dot(hb, whh_ref[1], preferred_element_type=jnp.float32)
        hf_new = gru_cell(gf[:, :3 * Hp], rh_f, hf)
        hb_new = gru_cell(gb[:, 3 * Hp:], rh_b, hb)
        hf_ref[...] = hf_new
        hb_ref[...] = hb_new
        o_ref[i] = hf_new          # forward direction written directly
        ob_ref[tb] = hb_new        # backward direction accumulated in scratch
        return carry

    lax.fori_loop(0, T, step, 0)
    # bidirectional sum (BatchRNN: view(T,B,2,-1).sum(2)) as one bulk add/store
    o_ref[...] = o_ref[...] + ob_ref[...]


def bigru_recurrent(g, whh):
    T, B2, sixHp = g.shape
    Hp = whh.shape[1]
    return pl.pallas_call(
        _bigru_recurrent_kernel,
        out_shape=jax.ShapeDtypeStruct((T, B2, Hp), jnp.float32),
        grid=(1,),
        in_specs=[
            pl.BlockSpec((T, B2, sixHp), lambda i: (0, 0, 0)),
            pl.BlockSpec((2, Hp, 3 * Hp), lambda i: (0, 0, 0)),
        ],
        out_specs=pl.BlockSpec((T, B2, Hp), lambda i: (0, 0, 0)),
        scratch_shapes=[
            pltpu.VMEM((B2, Hp), jnp.float32),      # forward hidden state
            pltpu.VMEM((B2, Hp), jnp.float32),      # backward hidden state
            pltpu.VMEM((T, B2, Hp), jnp.float32),   # backward outputs
        ],
        compiler_params=pltpu.CompilerParams(
            dimension_semantics=("arbitrary",),
            vmem_limit_bytes=48 * 1024 * 1024),
    )(g, whh)


# ----------------------------------------------------------------------------
# Kernel 3: SequenceWise(BatchNorm1d + Linear(no bias)) + softmax over classes
#   BN folded into the (padded) weight + bias; padded class lanes masked to -inf.
# ----------------------------------------------------------------------------
def _fc_softmax_kernel(x_ref, w_ref, b_ref, o_ref, *, num_classes):
    logits = (jnp.dot(x_ref[...], w_ref[...], preferred_element_type=jnp.float32)
              + b_ref[...])
    col = lax.broadcasted_iota(jnp.int32, logits.shape, 1)
    logits = jnp.where(col < num_classes, logits, -jnp.inf)
    m = jnp.max(logits, axis=-1, keepdims=True)
    e = jnp.exp(logits - m)
    s = jnp.sum(e, axis=-1, keepdims=True)
    o_ref[...] = e * pl.reciprocal(s, approx=True)


def fc_softmax(x, w, b, num_classes, tile_rows=256):
    """x: (N, Hp); w: (Hp, Cpad); b: (Cpad,).  Hp, Cpad multiples of 128."""
    N, Hp = x.shape
    Cpad = w.shape[1]
    tile = min(tile_rows, _round_up(N, 8))
    Np = _round_up(N, tile)
    xp = _pad_axis(x, 0, Np)
    out = pl.pallas_call(
        functools.partial(_fc_softmax_kernel, num_classes=num_classes),
        out_shape=jax.ShapeDtypeStruct((Np, Cpad), jnp.float32),
        grid=(Np // tile,),
        in_specs=[
            pl.BlockSpec((tile, Hp), lambda i: (i, 0)),
            pl.BlockSpec((Hp, Cpad), lambda i: (0, 0)),
            pl.BlockSpec((1, Cpad), lambda i: (0, 0)),
        ],
        out_specs=pl.BlockSpec((tile, Cpad), lambda i: (i, 0)),
        compiler_params=pltpu.CompilerParams(
            dimension_semantics=("parallel",),
            vmem_limit_bytes=32 * 1024 * 1024),
    )(xp, w, b[None, :])
    return out[:N, :num_classes]


# ----------------------------------------------------------------------------
# Plain-JAX glue (im2col, BN folding, weight prep)
# ----------------------------------------------------------------------------
def im2col_nchw(x, kh, kw, sh, sw, ph, pw):
    """x: (B, C, H, W) -> patches (B*oh*ow, C*kh*kw) matching PyTorch weight flatten."""
    x = jnp.pad(x, ((0, 0), (0, 0), (ph, ph), (pw, pw)))
    B, C, H, W = x.shape
    oh = (H - kh) // sh + 1
    ow = (W - kw) // sw + 1
    hi = (jnp.arange(oh) * sh)[:, None] + jnp.arange(kh)[None, :]      # (oh, kh)
    wi = (jnp.arange(ow) * sw)[:, None] + jnp.arange(kw)[None, :]      # (ow, kw)
    p = x[:, :, hi[:, :, None, None], wi[None, None, :, :]]            # (B,C,oh,kh,ow,kw)
    p = p.transpose(0, 2, 4, 1, 3, 5).reshape(B * oh * ow, C * kh * kw)
    return p, oh, ow


def bn_fold(gamma, beta, mean, var, eps=1e-5, bias=None):
    """Eval-mode BatchNorm (+ optional preceding conv bias) folded to scale/shift."""
    inv = gamma / jnp.sqrt(var + eps)
    b = bias if bias is not None else jnp.zeros_like(mean)
    return inv, (b - mean) * inv + beta


def prep_bigru_weights(wih, whh, bn_scale, bn_shift, Ip, Hp):
    """Fold SequenceWise BN into W_ih, concatenate gates, pad to (Ip, 6Hp)/(2, Hp, 3Hp).

    x_bn @ W = x @ (scale[:, None] * W) + (shift @ W)  -> weight + constant bias.
    Gate order [r, z, n] matches PyTorch GRU; direction 0 = forward, 1 = backward.
    Zero padding keeps padded hidden units identically zero through the recurrence.
    """
    w_dirs, b_dirs, whh_dirs = [], [], []
    for d in range(2):
        wg, bg, hg = [], [], []
        for g in range(3):
            w = wih[d, g]                                   # (I, H)
            bias_g = bn_shift @ w                           # (H,)
            w = bn_scale[:, None] * w
            wg.append(_pad_axis(_pad_axis(w, 0, Ip), 1, Hp))
            bg.append(_pad_axis(bias_g, 0, Hp))
            hg.append(_pad_axis(_pad_axis(whh[d, g], 0, Hp), 1, Hp))
        w_dirs.append(jnp.concatenate(wg, axis=1))          # (Ip, 3Hp)
        b_dirs.append(jnp.concatenate(bg, axis=0))          # (3Hp,)
        whh_dirs.append(jnp.concatenate(hg, axis=1))        # (Hp, 3Hp)
    wih_cat = jnp.concatenate(w_dirs, axis=1)               # (Ip, 6Hp)
    bias_cat = jnp.concatenate(b_dirs, axis=0)              # (6Hp,)
    whh_cat = jnp.stack(whh_dirs, axis=0)                   # (2, Hp, 3Hp)
    return wih_cat, bias_cat, whh_cat


def deepspeech_forward(x, params, num_rnn_layers):
    B = x.shape[0]
    xc = x[:, None, :, :].transpose(0, 1, 3, 2)             # (B, 1, F, T) == NCHW

    # --- conv block 1: Conv2d(1,32,(41,11),stride(2,2),pad(0,10)) + BN + Hardtanh ---
    p1, oh1, ow1 = im2col_nchw(xc, 41, 11, 2, 2, 0, 10)
    s1, sh1 = bn_fold(params['bn1_gamma'], params['bn1_beta'],
                      params['bn1_mean'], params['bn1_var'], bias=params['conv1_b'])
    w1 = params['conv1_w'].reshape(32, -1).T * s1[None, :]
    y1 = conv_mm_bn_htanh(p1, w1, sh1)
    y1 = y1.reshape(B, oh1, ow1, 32).transpose(0, 3, 1, 2)   # (B, 32, oh1, ow1)

    # --- conv block 2: Conv2d(32,32,(21,11),stride(2,1)) + BN + Hardtanh ---
    p2, oh2, ow2 = im2col_nchw(y1, 21, 11, 2, 1, 0, 0)
    s2, sh2 = bn_fold(params['bn2_gamma'], params['bn2_beta'],
                      params['bn2_mean'], params['bn2_var'], bias=params['conv2_b'])
    w2 = params['conv2_w'].reshape(32, -1).T * s2[None, :]
    y2 = conv_mm_bn_htanh(p2, w2, sh2)
    y2 = y2.reshape(B, oh2, ow2, 32).transpose(0, 3, 1, 2)   # (B, 32, oh2, ow2)

    # --- (B, C, D, T) -> (T, B, C*D)  (matches view + transposes in PyTorch) ---
    Bc, C, D, T = y2.shape
    h = y2.reshape(Bc, C * D, T).transpose(2, 0, 1)          # (T, B, C*D)

    # pad batch to sublane multiple (8) and features to lane multiple (128)
    B2 = _round_up(B, 8)
    rnn_in = C * D
    Ip0 = _round_up(rnn_in, 128)
    h = _pad_axis(_pad_axis(h, 1, B2), 2, Ip0)               # (T, B2, Ip0)

    hidden = params['fc_w'].shape[1]
    Hp = _round_up(hidden, 128)

    # --- bidirectional GRU stack (layer 0 without BN, rest with SequenceWise BN) ---
    for l in range(num_rnn_layers):
        if l == 0:
            I_real, Ip = rnn_in, Ip0
            scale = jnp.ones((I_real,), jnp.float32)
            shift = jnp.zeros((I_real,), jnp.float32)
        else:
            I_real, Ip = hidden, Hp
            scale, shift = bn_fold(params[f'rnn{l}_bn_gamma'], params[f'rnn{l}_bn_beta'],
                                   params[f'rnn{l}_bn_mean'], params[f'rnn{l}_bn_var'])
        wih_cat, bias_cat, whh_cat = prep_bigru_weights(
            params[f'rnn{l}_wih'], params[f'rnn{l}_whh'], scale, shift, Ip, Hp)
        Tn = h.shape[0]
        # hoisted input projection: all timesteps, all 3 gates, both directions
        g = matmul_bias(h.reshape(Tn * B2, Ip), wih_cat, bias_cat)
        g = g.reshape(Tn, B2, 6 * Hp)
        h = bigru_recurrent(g, whh_cat)                      # (T, B2, Hp)

    # TODO(synk): Lookahead convolution path is only used when bidirectional=False;
    # the default (bidirectional=True) config implemented here never executes it.

    # --- fc: SequenceWise(BatchNorm1d + Linear(no bias)), then softmax (eval mode) ---
    sfc, shfc = bn_fold(params['fc_bn_gamma'], params['fc_bn_beta'],
                        params['fc_bn_mean'], params['fc_bn_var'])
    num_classes = params['fc_w'].shape[0]
    Cpad = _round_up(num_classes, 128)
    wfc = params['fc_w'].T                                   # (hidden, C)
    bfc = shfc @ wfc                                         # (C,)
    wfc = _pad_axis(_pad_axis(sfc[:, None] * wfc, 0, Hp), 1, Cpad)
    bfc = _pad_axis(bfc, 0, Cpad)

    Tn = h.shape[0]
    probs = fc_softmax(h.reshape(Tn * B2, Hp), wfc, bfc, num_classes)
    probs = probs.reshape(Tn, B2, num_classes)[:, :B, :]
    return probs.transpose(1, 0, 2)                          # (B, T, num_classes)


# ----------------------------------------------------------------------------
# Deterministic parameter init (shapes follow DeepSpeech.__init__)
# ----------------------------------------------------------------------------
def init_params(key, window_size, hidden, num_rnn_layers, num_classes):
    ks = iter(jax.random.split(key, 64))

    def unif(shape, stdv):
        return jax.random.uniform(next(ks), shape, jnp.float32, -stdv, stdv)

    def bn(prefix, n, p):
        p[f'{prefix}_gamma'] = 1.0 + 0.1 * jax.random.normal(next(ks), (n,), jnp.float32)
        p[f'{prefix}_beta'] = 0.1 * jax.random.normal(next(ks), (n,), jnp.float32)
        p[f'{prefix}_mean'] = 0.1 * jax.random.normal(next(ks), (n,), jnp.float32)
        p[f'{prefix}_var'] = 1.0 + 0.1 * jax.random.uniform(next(ks), (n,), jnp.float32)

    p = {}
    fan1 = 1 * 41 * 11
    p['conv1_w'] = unif((32, 1, 41, 11), 1.0 / math.sqrt(fan1))
    p['conv1_b'] = unif((32,), 1.0 / math.sqrt(fan1))
    bn('bn1', 32, p)
    fan2 = 32 * 21 * 11
    p['conv2_w'] = unif((32, 32, 21, 11), 1.0 / math.sqrt(fan2))
    p['conv2_b'] = unif((32,), 1.0 / math.sqrt(fan2))
    bn('bn2', 32, p)

    d = window_size // 2 + 1
    d = (d - 41) // 2 + 1
    d = (d - 21) // 2 + 1
    rnn_in = d * 32

    for l in range(num_rnn_layers):
        I = rnn_in if l == 0 else hidden
        stdv = 1.0 / math.sqrt(hidden)
        # (directions=2, gates=3 [r,z,n], in, hidden)
        p[f'rnn{l}_wih'] = unif((2, 3, I, hidden), stdv)
        p[f'rnn{l}_whh'] = unif((2, 3, hidden, hidden), stdv)
        if l > 0:
            bn(f'rnn{l}_bn', I, p)

    bn('fc_bn', hidden, p)
    p['fc_w'] = unif((num_classes, hidden), 1.0 / math.sqrt(hidden))  # torch Linear (out,in)
    return p


# ----------------------------------------------------------------------------
if __name__ == "__main__":
    # Small config: window_size=160 -> freq=81 -> rnn_input_size = 1*32 = 32
    window_size = 160
    hidden = 32
    num_rnn_layers = 2
    num_classes = 29
    B, T_in = 2, 30
    freq = window_size // 2 + 1  # 81

    key = jax.random.PRNGKey(0)
    k_in, k_p = jax.random.split(key)
    x = jax.random.normal(k_in, (B, T_in, freq), jnp.float32)
    params = init_params(k_p, window_size, hidden, num_rnn_layers, num_classes)

    fwd = jax.jit(functools.partial(deepspeech_forward, num_rnn_layers=num_rnn_layers))
    out = fwd(x, params)
    out = jax.block_until_ready(out)

    # Expected time dim after the two convs: T1 = (30+20-11)//2+1 = 20, T2 = 20-10 = 10
    assert out.shape == (B, 10, num_classes), out.shape
    assert bool(jnp.all(jnp.isfinite(out)))
    row_sums = jnp.sum(out, axis=-1)
    assert bool(jnp.all(jnp.abs(row_sums - 1.0) < 5e-3)), "softmax rows must sum to ~1"
    print("KERNEL_OK")
</pallas_src>

<mosaic_0001>
module attributes {stable_mosaic.version = 11 : i64} {
  func.func @_conv_mm_bn_htanh_kernel(%arg0: i32, %arg1: memref<256x512xbf16, #tpu.memory_space<vmem>>, %arg2: memref<512x128xbf16, #tpu.memory_space<vmem>>, %arg3: memref<1x128xf32, #tpu.memory_space<vmem>>, %arg4: memref<256x128xf32, #tpu.memory_space<vmem>>) attributes {dimension_semantics = [#tpu.dimension_semantics<parallel>], iteration_bounds = array<i64: 4>, scalar_prefetch = 0 : i64, scratch_operands = 0 : i64, tpu.core_type = #tpu.core_type<tc>, window_params = [{transform_indices = @transform_0, window_bounds = array<i64: 256, 512>}, {pipeline_mode = #tpu.pipeline_mode<synchronous>, transform_indices = @transform_1, window_bounds = array<i64: 512, 128>}, {pipeline_mode = #tpu.pipeline_mode<synchronous>, transform_indices = @transform_2, window_bounds = array<i64: 1, 128>}, {transform_indices = @transform_3, window_bounds = array<i64: 256, 128>}]} {
    %c0 = arith.constant 0 : index
    %c0_0 = arith.constant 0 : index
    %0 = vector.load %arg1[%c0, %c0_0] : memref<256x512xbf16, #tpu.memory_space<vmem>>, vector<256x512xbf16>
    %c0_1 = arith.constant 0 : index
    %c0_2 = arith.constant 0 : index
    %1 = vector.load %arg2[%c0_1, %c0_2] : memref<512x128xbf16, #tpu.memory_space<vmem>>, vector<512x128xbf16>
    %cst = arith.constant dense<0.000000e+00> : vector<256x128xf32>
    %2 = tpu.matmul %0, %1, %cst {dimension_numbers = #tpu.dot_dimension_numbers<[1], [0], [0], [1], [0, 0, 1, 1], [], []>} : vector<256x512xbf16>, vector<512x128xbf16>, vector<256x128xf32> -> vector<256x128xf32>
    %c0_3 = arith.constant 0 : index
    %c0_4 = arith.constant 0 : index
    %3 = vector.load %arg3[%c0_3, %c0_4] : memref<1x128xf32, #tpu.memory_space<vmem>>, vector<1x128xf32>
    %4 = vector.broadcast %3 : vector<1x128xf32> to vector<256x128xf32>
    %5 = arith.addf %2, %4 : vector<256x128xf32>
    %cst_5 = arith.constant 0.000000e+00 : f32
    %cst_6 = arith.constant 2.000000e+01 : f32
    %6 = vector.broadcast %cst_5 : f32 to vector<256x128xf32>
    %7 = arith.maximumf %6, %5 : vector<256x128xf32>
    %8 = vector.broadcast %cst_6 : f32 to vector<256x128xf32>
    %9 = arith.minimumf %8, %7 : vector<256x128xf32>
    %c0_7 = arith.constant 0 : index
    %c0_8 = arith.constant 0 : index
    %10 = vector.load %arg4[%c0_7, %c0_8] : memref<256x128xf32, #tpu.memory_space<vmem>>, vector<256x128xf32>
    tpu.vector_store %arg4[%c0_7, %c0_8], %9 {strides = array<i32>} : memref<256x128xf32, #tpu.memory_space<vmem>>, vector<256x128xf32>,
    return
  }
  func.func @transform_0(%arg0: i32) -> (i32, i32) {
    %c0_i32 = arith.constant 0 : i32
    %c0_i32_0 = arith.constant 0 : i32
    return %arg0, %c0_i32 : i32, i32
  }
  func.func @transform_1(%arg0: i32) -> (i32, i32) {
    %c0_i32 = arith.constant 0 : i32
    %c0_i32_0 = arith.constant 0 : i32
    %c0_i32_1 = arith.constant 0 : i32
    return %c0_i32, %c0_i32_0 : i32, i32
  }
  func.func @transform_2(%arg0: i32) -> (i32, i32) {
    %c0_i32 = arith.constant 0 : i32
    %c0_i32_0 = arith.constant 0 : i32
    %c0_i32_1 = arith.constant 0 : i32
    return %c0_i32, %c0_i32_0 : i32, i32
  }
  func.func @transform_3(%arg0: i32) -> (i32, i32) {
    %c0_i32 = arith.constant 0 : i32
    %c0_i32_0 = arith.constant 0 : i32
    return %arg0, %c0_i32 : i32, i32
  }
}

module attributes {stable_mosaic.version = 11 : i64} {
  func.func @_conv_mm_bn_htanh_kernel(%arg0: i32, %arg1: memref<24x7424xbf16, #tpu.memory_space<vmem>>, %arg2: memref<7424x128xbf16, #tpu.memory_space<vmem>>, %arg3: memref<1x128xf32, #tpu.memory_space<vmem>>, %arg4: memref<24x128xf32, #tpu.memory_space<vmem>>) attributes {dimension_semantics = [#tpu.dimension_semantics<parallel>], iteration_bounds = array<i64: 1>, scalar_prefetch = 0 : i64, scratch_operands = 0 : i64, tpu.core_type = #tpu.core_type<tc>, window_params = [{transform_indices = @transform_0, window_bounds = array<i64: 24, 7424>}, {pipeline_mode = #tpu.pipeline_mode<synchronous>, transform_indices = @transform_1, window_bounds = array<i64: 7424, 128>}, {pipeline_mode = #tpu.pipeline_mode<synchronous>, transform_indices = @transform_2, window_bounds = array<i64: 1, 128>}, {transform_indices = @transform_3, window_bounds = array<i64: 24, 128>}]} {
    %c0 = arith.constant 0 : index
    %c0_0 = arith.constant 0 : index
    %0 = vector.load %arg1[%c0, %c0_0] : memref<24x7424xbf16, #tpu.memory_space<vmem>>, vector<24x7424xbf16>
    %c0_1 = arith.constant 0 : index
    %c0_2 = arith.constant 0 : index
    %1 = vector.load %arg2[%c0_1, %c0_2] : memref<7424x128xbf16, #tpu.memory_space<vmem>>, vector<7424x128xbf16>
    %cst = arith.constant dense<0.000000e+00> : vector<24x128xf32>
    %2 = tpu.matmul %0, %1, %cst {dimension_numbers = #tpu.dot_dimension_numbers<[1], [0], [0], [1], [0, 0, 1, 1], [], []>} : vector<24x7424xbf16>, vector<7424x128xbf16>, vector<24x128xf32> -> vector<24x128xf32>
    %c0_3 = arith.constant 0 : index
    %c0_4 = arith.constant 0 : index
    %3 = vector.load %arg3[%c0_3, %c0_4] : memref<1x128xf32, #tpu.memory_space<vmem>>, vector<1x128xf32>
    %4 = vector.broadcast %3 : vector<1x128xf32> to vector<24x128xf32>
    %5 = arith.addf %2, %4 : vector<24x128xf32>
    %cst_5 = arith.constant 0.000000e+00 : f32
    %cst_6 = arith.constant 2.000000e+01 : f32
    %6 = vector.broadcast %cst_5 : f32 to vector<24x128xf32>
    %7 = arith.maximumf %6, %5 : vector<24x128xf32>
    %8 = vector.broadcast %cst_6 : f32 to vector<24x128xf32>
    %9 = arith.minimumf %8, %7 : vector<24x128xf32>
    %c0_7 = arith.constant 0 : index
    %c0_8 = arith.constant 0 : index
    %10 = vector.load %arg4[%c0_7, %c0_8] : memref<24x128xf32, #tpu.memory_space<vmem>>, vector<24x128xf32>
    tpu.vector_store %arg4[%c0_7, %c0_8], %9 {strides = array<i32>} : memref<24x128xf32, #tpu.memory_space<vmem>>, vector<24x128xf32>,
    return
  }
  func.func @transform_0(%arg0: i32) -> (i32, i32) {
    %c0_i32 = arith.constant 0 : i32
    %c0_i32_0 = arith.constant 0 : i32
    return %arg0, %c0_i32 : i32, i32
  }
  func.func @transform_1(%arg0: i32) -> (i32, i32) {
    %c0_i32 = arith.constant 0 : i32
    %c0_i32_0 = arith.constant 0 : i32
    %c0_i32_1 = arith.constant 0 : i32
    return %c0_i32, %c0_i32_0 : i32, i32
  }
  func.func @transform_2(%arg0: i32) -> (i32, i32) {
    %c0_i32 = arith.constant 0 : i32
    %c0_i32_0 = arith.constant 0 : i32
    %c0_i32_1 = arith.constant 0 : i32
    return %c0_i32, %c0_i32_0 : i32, i32
  }
  func.func @transform_3(%arg0: i32) -> (i32, i32) {
    %c0_i32 = arith.constant 0 : i32
    %c0_i32_0 = arith.constant 0 : i32
    return %arg0, %c0_i32 : i32, i32
  }
}

module attributes {stable_mosaic.version = 11 : i64} {
  func.func @_mm_bias_kernel(%arg0: i32, %arg1: memref<80x128xf32, #tpu.memory_space<vmem>>, %arg2: memref<128x768xf32, #tpu.memory_space<vmem>>, %arg3: memref<1x768xf32, #tpu.memory_space<vmem>>, %arg4: memref<80x768xf32, #tpu.memory_space<vmem>>) attributes {dimension_semantics = [#tpu.dimension_semantics<parallel>], iteration_bounds = array<i64: 1>, scalar_prefetch = 0 : i64, scratch_operands = 0 : i64, tpu.core_type = #tpu.core_type<tc>, window_params = [{transform_indices = @transform_0, window_bounds = array<i64: 80, 128>}, {pipeline_mode = #tpu.pipeline_mode<synchronous>, transform_indices = @transform_1, window_bounds = array<i64: 128, 768>}, {pipeline_mode = #tpu.pipeline_mode<synchronous>, transform_indices = @transform_2, window_bounds = array<i64: 1, 768>}, {transform_indices = @transform_3, window_bounds = array<i64: 80, 768>}]} {
    %c0 = arith.constant 0 : index
    %c0_0 = arith.constant 0 : index
    %0 = vector.load %arg1[%c0, %c0_0] : memref<80x128xf32, #tpu.memory_space<vmem>>, vector<80x128xf32>
    %c0_1 = arith.constant 0 : index
    %c0_2 = arith.constant 0 : index
    %1 = vector.load %arg2[%c0_1, %c0_2] : memref<128x768xf32, #tpu.memory_space<vmem>>, vector<128x768xf32>
    %cst = arith.constant dense<0.000000e+00> : vector<80x768xf32>
    %2 = tpu.matmul %0, %1, %cst {dimension_numbers = #tpu.dot_dimension_numbers<[1], [0], [0], [1], [0, 0, 1, 1], [], []>} : vector<80x128xf32>, vector<128x768xf32>, vector<80x768xf32> -> vector<80x768xf32>
    %c0_3 = arith.constant 0 : index
    %c0_4 = arith.constant 0 : index
    %3 = vector.load %arg3[%c0_3, %c0_4] : memref<1x768xf32, #tpu.memory_space<vmem>>, vector<1x768xf32>
    %4 = vector.broadcast %3 : vector<1x768xf32> to vector<80x768xf32>
    %5 = arith.addf %2, %4 : vector<80x768xf32>
    %c0_5 = arith.constant 0 : index
    %c0_6 = arith.constant 0 : index
    %6 = vector.load %arg4[%c0_5, %c0_6] : memref<80x768xf32, #tpu.memory_space<vmem>>, vector<80x768xf32>
    tpu.vector_store %arg4[%c0_5, %c0_6], %5 {strides = array<i32>} : memref<80x768xf32, #tpu.memory_space<vmem>>, vector<80x768xf32>,
    return
  }
  func.func @transform_0(%arg0: i32) -> (i32, i32) {
    %c0_i32 = arith.constant 0 : i32
    %c0_i32_0 = arith.constant 0 : i32
    return %arg0, %c0_i32 : i32, i32
  }
  func.func @transform_1(%arg0: i32) -> (i32, i32) {
    %c0_i32 = arith.constant 0 : i32
    %c0_i32_0 = arith.constant 0 : i32
    %c0_i32_1 = arith.constant 0 : i32
    return %c0_i32, %c0_i32_0 : i32, i32
  }
  func.func @transform_2(%arg0: i32) -> (i32, i32) {
    %c0_i32 = arith.constant 0 : i32
    %c0_i32_0 = arith.constant 0 : i32
    %c0_i32_1 = arith.constant 0 : i32
    return %c0_i32, %c0_i32_0 : i32, i32
  }
  func.func @transform_3(%arg0: i32) -> (i32, i32) {
    %c0_i32 = arith.constant 0 : i32
    %c0_i32_0 = arith.constant 0 : i32
    return %arg0, %c0_i32 : i32, i32
  }
}

module attributes {stable_mosaic.version = 11 : i64} {
  func.func @_bigru_recurrent_kernel(%arg0: i32, %arg1: memref<10x8x768xf32, #tpu.memory_space<vmem>>, %arg2: memref<2x128x384xf32, #tpu.memory_space<vmem>>, %arg3: memref<10x8x128xf32, #tpu.memory_space<vmem>>, %arg4: memref<8x128xf32, #tpu.memory_space<vmem>>, %arg5: memref<8x128xf32, #tpu.memory_space<vmem>>, %arg6: memref<10x8x128xf32, #tpu.memory_space<vmem>>) attributes {dimension_semantics = [#tpu.dimension_semantics<arbitrary>], iteration_bounds = array<i64: 1>, scalar_prefetch = 0 : i64, scratch_operands = 3 : i64, tpu.core_type = #tpu.core_type<tc>, window_params = [{pipeline_mode = #tpu.pipeline_mode<synchronous>, transform_indices = @transform_0, window_bounds = array<i64: 10, 8, 768>}, {pipeline_mode = #tpu.pipeline_mode<synchronous>, transform_indices = @transform_1, window_bounds = array<i64: 2, 128, 384>}, {pipeline_mode = #tpu.pipeline_mode<synchronous>, transform_indices = @transform_2, window_bounds = array<i64: 10, 8, 128>}]} {
    %cst = arith.constant 0.000000e+00 : f32
    %0 = vector.broadcast %cst : f32 to vector<8x128xf32>
    %c0 = arith.constant 0 : index
    %c0_0 = arith.constant 0 : index
    %1 = vector.load %arg4[%c0, %c0_0] : memref<8x128xf32, #tpu.memory_space<vmem>>, vector<8x128xf32>
    tpu.vector_store %arg4[%c0, %c0_0], %0 {strides = array<i32>} : memref<8x128xf32, #tpu.memory_space<vmem>>, vector<8x128xf32>,
    %cst_1 = arith.constant 0.000000e+00 : f32
    %2 = vector.broadcast %cst_1 : f32 to vector<8x128xf32>
    %c0_2 = arith.constant 0 : index
    %c0_3 = arith.constant 0 : index
    %3 = vector.load %arg5[%c0_2, %c0_3] : memref<8x128xf32, #tpu.memory_space<vmem>>, vector<8x128xf32>
    tpu.vector_store %arg5[%c0_2, %c0_3], %2 {strides = array<i32>} : memref<8x128xf32, #tpu.memory_space<vmem>>, vector<8x128xf32>,
    %c0_i32 = arith.constant 0 : i32
    %c10_i32 = arith.constant 10 : i32
    %4 = arith.addi %c0_i32, %c10_i32 : i32
    %c1_i32 = arith.constant 1 : i32
    scf.for %arg7 = %c0_i32 to %4 step %c1_i32  : i32 {
      %c9_i32 = arith.constant 9 : i32
      %9 = arith.subi %c9_i32, %arg7 : i32
      %10 = arith.index_cast %arg7 : i32 to index
      %c0_14 = arith.constant 0 : index
      %c0_15 = arith.constant 0 : index
      %11 = vector.load %arg1[%10, %c0_14, %c0_15] : memref<10x8x768xf32, #tpu.memory_space<vmem>>, vector<1x8x768xf32>
      %12 = vector.shape_cast %11 : vector<1x8x768xf32> to vector<8x768xf32>
      %13 = arith.index_cast %9 : i32 to index
      %c0_16 = arith.constant 0 : index
      %c0_17 = arith.constant 0 : index
      %14 = vector.load %arg1[%13, %c0_16, %c0_17] : memref<10x8x768xf32, #tpu.memory_space<vmem>>, vector<1x8x768xf32>
      %15 = vector.shape_cast %14 : vector<1x8x768xf32> to vector<8x768xf32>
      %c0_18 = arith.constant 0 : index
      %c0_19 = arith.constant 0 : index
      %16 = vector.load %arg4[%c0_18, %c0_19] : memref<8x128xf32, #tpu.memory_space<vmem>>, vector<8x128xf32>
      %c0_20 = arith.constant 0 : index
      %c0_21 = arith.constant 0 : index
      %17 = vector.load %arg5[%c0_20, %c0_21] : memref<8x128xf32, #tpu.memory_space<vmem>>, vector<8x128xf32>
      %c0_22 = arith.constant 0 : index
      %c0_23 = arith.constant 0 : index
      %c0_24 = arith.constant 0 : index
      %18 = vector.load %arg2[%c0_22, %c0_23, %c0_24] : memref<2x128x384xf32, #tpu.memory_space<vmem>>, vector<1x128x384xf32>
      %19 = vector.shape_cast %18 : vector<1x128x384xf32> to vector<128x384xf32>
      %cst_25 = arith.constant dense<0.000000e+00> : vector<8x384xf32>
      %20 = tpu.matmul %16, %19, %cst_25 {dimension_numbers = #tpu.dot_dimension_numbers<[1], [0], [0], [1], [0, 0, 1, 1], [], []>} : vector<8x128xf32>, vector<128x384xf32>, vector<8x384xf32> -> vector<8x384xf32>
      %c1 = arith.constant 1 : index
      %c0_26 = arith.constant 0 : index
      %c0_27 = arith.constant 0 : index
      %21 = vector.load %arg2[%c1, %c0_26, %c0_27] : memref<2x128x384xf32, #tpu.memory_space<vmem>>, vector<1x128x384xf32>
      %22 = vector.shape_cast %21 : vector<1x128x384xf32> to vector<128x384xf32>
      %cst_28 = arith.constant dense<0.000000e+00> : vector<8x384xf32>
      %23 = tpu.matmul %17, %22, %cst_28 {dimension_numbers = #tpu.dot_dimension_numbers<[1], [0], [0], [1], [0, 0, 1, 1], [], []>} : vector<8x128xf32>, vector<128x384xf32>, vector<8x384xf32> -> vector<8x384xf32>
      %24 = vector.extract_strided_slice %12 {offsets = [0, 0], sizes = [8, 384], strides = [1, 1]} : vector<8x768xf32> to vector<8x384xf32>
      %25 = vector.extract_strided_slice %24 {offsets = [0, 0], sizes = [8, 128], strides = [1, 1]} : vector<8x384xf32> to vector<8x128xf32>
      %26 = vector.extract_strided_slice %20 {offsets = [0, 0], sizes = [8, 128], strides = [1, 1]} : vector<8x384xf32> to vector<8x128xf32>
      %27 = arith.addf %25, %26 : vector<8x128xf32>
      %28 = arith.negf %27 : vector<8x128xf32>
      %29 = math.exp %28 : vector<8x128xf32>
      %cst_29 = arith.constant 1.000000e+00 : f32
      %30 = vector.broadcast %cst_29 : f32 to vector<8x128xf32>
      %31 = arith.addf %30, %29 : vector<8x128xf32>
      %32 = arith.divf %30, %31 : vector<8x128xf32>
      %33 = vector.extract_strided_slice %24 {offsets = [0, 128], sizes = [8, 128], strides = [1, 1]} : vector<8x384xf32> to vector<8x128xf32>
      %34 = vector.extract_strided_slice %20 {offsets = [0, 128], sizes = [8, 128], strides = [1, 1]} : vector<8x384xf32> to vector<8x128xf32>
      %35 = arith.addf %33, %34 : vector<8x128xf32>
      %36 = arith.negf %35 : vector<8x128xf32>
      %37 = math.exp %36 : vector<8x128xf32>
      %cst_30 = arith.constant 1.000000e+00 : f32
      %38 = vector.broadcast %cst_30 : f32 to vector<8x128xf32>
      %39 = arith.addf %38, %37 : vector<8x128xf32>
      %40 = arith.divf %38, %39 : vector<8x128xf32>
      %41 = vector.extract_strided_slice %24 {offsets = [0, 256], sizes = [8, 128], strides = [1, 1]} : vector<8x384xf32> to vector<8x128xf32>
      %42 = vector.extract_strided_slice %20 {offsets = [0, 256], sizes = [8, 128], strides = [1, 1]} : vector<8x384xf32> to vector<8x128xf32>
      %43 = arith.mulf %32, %42 : vector<8x128xf32>
      %44 = arith.addf %41, %43 : vector<8x128xf32>
      %45 = math.tanh %44 : vector<8x128xf32>
      %cst_31 = arith.constant 1.000000e+00 : f32
      %46 = vector.broadcast %cst_31 : f32 to vector<8x128xf32>
      %47 = arith.subf %46, %40 : vector<8x128xf32>
      %48 = arith.mulf %47, %45 : vector<8x128xf32>
      %49 = arith.mulf %40, %16 : vector<8x128xf32>
      %50 = arith.addf %48, %49 : vector<8x128xf32>
      %51 = vector.extract_strided_slice %15 {offsets = [0, 384], sizes = [8, 384], strides = [1, 1]} : vector<8x768xf32> to vector<8x384xf32>
      %52 = vector.extract_strided_slice %51 {offsets = [0, 0], sizes = [8, 128], strides = [1, 1]} : vector<8x384xf32> to vector<8x128xf32>
      %53 = vector.extract_strided_slice %23 {offsets = [0, 0], sizes = [8, 128], strides = [1, 1]} : vector<8x384xf32> to vector<8x128xf32>
      %54 = arith.addf %52, %53 : vector<8x128xf32>
      %55 = arith.negf %54 : vector<8x128xf32>
      %56 = math.exp %55 : vector<8x128xf32>
      %cst_32 = arith.constant 1.000000e+00 : f32
      %57 = vector.broadcast %cst_32 : f32 to vector<8x128xf32>
      %58 = arith.addf %57, %56 : vector<8x128xf32>
      %59 = arith.divf %57, %58 : vector<8x128xf32>
      %60 = vector.extract_strided_slice %51 {offsets = [0, 128], sizes = [8, 128], strides = [1, 1]} : vector<8x384xf32> to vector<8x128xf32>
      %61 = vector.extract_strided_slice %23 {offsets = [0, 128], sizes = [8, 128], strides = [1, 1]} : vector<8x384xf32> to vector<8x128xf32>
      %62 = arith.addf %60, %61 : vector<8x128xf32>
      %63 = arith.negf %62 : vector<8x128xf32>
      %64 = math.exp %63 : vector<8x128xf32>
      %cst_33 = arith.constant 1.000000e+00 : f32
      %65 = vector.broadcast %cst_33 : f32 to vector<8x128xf32>
      %66 = arith.addf %65, %64 : vector<8x128xf32>
      %67 = arith.divf %65, %66 : vector<8x128xf32>
      %68 = vector.extract_strided_slice %51 {offsets = [0, 256], sizes = [8, 128], strides = [1, 1]} : vector<8x384xf32> to vector<8x128xf32>
      %69 = vector.extract_strided_slice %23 {offsets = [0, 256], sizes = [8, 128], strides = [1, 1]} : vector<8x384xf32> to vector<8x128xf32>
      %70 = arith.mulf %59, %69 : vector<8x128xf32>
      %71 = arith.addf %68, %70 : vector<8x128xf32>
      %72 = math.tanh %71 : vector<8x128xf32>
      %cst_34 = arith.constant 1.000000e+00 : f32
      %73 = vector.broadcast %cst_34 : f32 to vector<8x128xf32>
      %74 = arith.subf %73, %67 : vector<8x128xf32>
      %75 = arith.mulf %74, %72 : vector<8x128xf32>
      %76 = arith.mulf %67, %17 : vector<8x128xf32>
      %77 = arith.addf %75, %76 : vector<8x128xf32>
      %c0_35 = arith.constant 0 : index
      %c0_36 = arith.constant 0 : index
      %78 = vector.load %arg4[%c0_35, %c0_36] : memref<8x128xf32, #tpu.memory_space<vmem>>, vector<8x128xf32>
      tpu.vector_store %arg4[%c0_35, %c0_36], %50 {strides = array<i32>} : memref<8x128xf32, #tpu.memory_space<vmem>>, vector<8x128xf32>,
      %c0_37 = arith.constant 0 : index
      %c0_38 = arith.constant 0 : index
      %79 = vector.load %arg5[%c0_37, %c0_38] : memref<8x128xf32, #tpu.memory_space<vmem>>, vector<8x128xf32>
      tpu.vector_store %arg5[%c0_37, %c0_38], %77 {strides = array<i32>} : memref<8x128xf32, #tpu.memory_space<vmem>>, vector<8x128xf32>,
      %80 = arith.index_cast %arg7 : i32 to index
      %c0_39 = arith.constant 0 : index
      %c0_40 = arith.constant 0 : index
      %81 = vector.load %arg3[%80, %c0_39, %c0_40] : memref<10x8x128xf32, #tpu.memory_space<vmem>>, vector<1x8x128xf32>
      %82 = vector.shape_cast %81 : vector<1x8x128xf32> to vector<8x128xf32>
      %83 = vector.shape_cast %50 : vector<8x128xf32> to vector<1x8x128xf32>
      tpu.vector_store %arg3[%80, %c0_39, %c0_40], %83 {strides = array<i32>} : memref<10x8x128xf32, #tpu.memory_space<vmem>>, vector<1x8x128xf32>,
      %84 = arith.index_cast %9 : i32 to index
      %c0_41 = arith.constant 0 : index
      %c0_42 = arith.constant 0 : index
      %85 = vector.load %arg6[%84, %c0_41, %c0_42] : memref<10x8x128xf32, #tpu.memory_space<vmem>>, vector<1x8x128xf32>
      %86 = vector.shape_cast %85 : vector<1x8x128xf32> to vector<8x128xf32>
      %87 = vector.shape_cast %77 : vector<8x128xf32> to vector<1x8x128xf32>
      tpu.vector_store %arg6[%84, %c0_41, %c0_42], %87 {strides = array<i32>} : memref<10x8x128xf32, #tpu.memory_space<vmem>>, vector<1x8x128xf32>,
    }
    %c10_i32_4 = arith.constant 10 : i32
    %c0_5 = arith.constant 0 : index
    %c0_6 = arith.constant 0 : index
    %c0_7 = arith.constant 0 : index
    %5 = vector.load %arg3[%c0_5, %c0_6, %c0_7] : memref<10x8x128xf32, #tpu.memory_space<vmem>>, vector<10x8x128xf32>
    %c0_8 = arith.constant 0 : index
    %c0_9 = arith.constant 0 : index
    %c0_10 = arith.constant 0 : index
    %6 = vector.load %arg6[%c0_8, %c0_9, %c0_10] : memref<10x8x128xf32, #tpu.memory_space<vmem>>, vector<10x8x128xf32>
    %7 = arith.addf %5, %6 : vector<10x8x128xf32>
    %c0_11 = arith.constant 0 : index
    %c0_12 = arith.constant 0 : index
    %c0_13 = arith.constant 0 : index
    %8 = vector.load %arg3[%c0_11, %c0_12, %c0_13] : memref<10x8x128xf32, #tpu.memory_space<vmem>>, vector<10x8x128xf32>
    tpu.vector_store %arg3[%c0_11, %c0_12, %c0_13], %7 {strides = array<i32>} : memref<10x8x128xf32, #tpu.memory_space<vmem>>, vector<10x8x128xf32>,
    return
  }
  func.func @transform_0(%arg0: i32) -> (i32, i32, i32) {
    %c0_i32 = arith.constant 0 : i32
    %c0_i32_0 = arith.constant 0 : i32
    %c0_i32_1 = arith.constant 0 : i32
    %c0_i32_2 = arith.constant 0 : i32
    return %c0_i32, %c0_i32_0, %c0_i32_1 : i32, i32, i32
  }
  func.func @transform_1(%arg0: i32) -> (i32, i32, i32) {
    %c0_i32 = arith.constant 0 : i32
    %c0_i32_0 = arith.constant 0 : i32
    %c0_i32_1 = arith.constant 0 : i32
    %c0_i32_2 = arith.constant 0 : i32
    return %c0_i32, %c0_i32_0, %c0_i32_1 : i32, i32, i32
  }
  func.func @transform_2(%arg0: i32) -> (i32, i32, i32) {
    %c0_i32 = arith.constant 0 : i32
    %c0_i32_0 = arith.constant 0 : i32
    %c0_i32_1 = arith.constant 0 : i32
    %c0_i32_2 = arith.constant 0 : i32
    return %c0_i32, %c0_i32_0, %c0_i32_1 : i32, i32, i32
  }
}

module attributes {stable_mosaic.version = 11 : i64} {
  func.func @_fc_softmax_kernel(%arg0: i32, %arg1: memref<80x128xf32, #tpu.memory_space<vmem>>, %arg2: memref<128x128xf32, #tpu.memory_space<vmem>>, %arg3: memref<1x128xf32, #tpu.memory_space<vmem>>, %arg4: memref<80x128xf32, #tpu.memory_space<vmem>>) attributes {dimension_semantics = [#tpu.dimension_semantics<parallel>], iteration_bounds = array<i64: 1>, scalar_prefetch = 0 : i64, scratch_operands = 0 : i64, tpu.core_type = #tpu.core_type<tc>, window_params = [{transform_indices = @transform_0, window_bounds = array<i64: 80, 128>}, {pipeline_mode = #tpu.pipeline_mode<synchronous>, transform_indices = @transform_1, window_bounds = array<i64: 128, 128>}, {pipeline_mode = #tpu.pipeline_mode<synchronous>, transform_indices = @transform_2, window_bounds = array<i64: 1, 128>}, {transform_indices = @transform_3, window_bounds = array<i64: 80, 128>}]} {
    %c0 = arith.constant 0 : index
    %c0_0 = arith.constant 0 : index
    %0 = vector.load %arg1[%c0, %c0_0] : memref<80x128xf32, #tpu.memory_space<vmem>>, vector<80x128xf32>
    %c0_1 = arith.constant 0 : index
    %c0_2 = arith.constant 0 : index
    %1 = vector.load %arg2[%c0_1, %c0_2] : memref<128x128xf32, #tpu.memory_space<vmem>>, vector<128x128xf32>
    %cst = arith.constant dense<0.000000e+00> : vector<80x128xf32>
    %2 = tpu.matmul %0, %1, %cst {dimension_numbers = #tpu.dot_dimension_numbers<[1], [0], [0], [1], [0, 0, 1, 1], [], []>} : vector<80x128xf32>, vector<128x128xf32>, vector<80x128xf32> -> vector<80x128xf32>
    %c0_3 = arith.constant 0 : index
    %c0_4 = arith.constant 0 : index
    %3 = vector.load %arg3[%c0_3, %c0_4] : memref<1x128xf32, #tpu.memory_space<vmem>>, vector<1x128xf32>
    %4 = vector.broadcast %3 : vector<1x128xf32> to vector<80x128xf32>
    %5 = arith.addf %2, %4 : vector<80x128xf32>
    %6 = tpu.iota {dimensions = array<i32: 1>} : vector<80x128xi32>
    %c29_i32 = arith.constant 29 : i32
    %7 = vector.broadcast %c29_i32 : i32 to vector<80x128xi32>
    %8 = arith.cmpi slt, %6, %7 : vector<80x128xi32>
    %cst_5 = arith.constant 0xFF800000 : f32
    %9 = vector.broadcast %cst_5 : f32 to vector<80x128xf32>
    %10 = arith.select %8, %5, %9 : vector<80x128xi1>, vector<80x128xf32>
    %cst_6 = arith.constant dense<0xFF800000> : vector<80xf32>
    %11 = vector.multi_reduction <maximumf>, %10, %cst_6 [1] : vector<80x128xf32> to vector<80xf32>
    %12 = vector.shape_cast %11 : vector<80xf32> to vector<80x1xf32>
    %13 = vector.broadcast %12 : vector<80x1xf32> to vector<80x128xf32>
    %14 = arith.subf %10, %13 : vector<80x128xf32>
    %15 = math.exp %14 : vector<80x128xf32>
    %cst_7 = arith.constant dense<0.000000e+00> : vector<80xf32>
    %16 = vector.multi_reduction <add>, %15, %cst_7 [1] : vector<80x128xf32> to vector<80xf32>
    %17 = vector.shape_cast %16 : vector<80xf32> to vector<80x1xf32>
    %18 = tpu.reciprocal %17 {approx = true} : vector<80x1xf32> -> vector<80x1xf32>
    %19 = vector.broadcast %18 : vector<80x1xf32> to vector<80x128xf32>
    %20 = arith.mulf %15, %19 : vector<80x128xf32>
    %c0_8 = arith.constant 0 : index
    %c0_9 = arith.constant 0 : index
    %21 = vector.load %arg4[%c0_8, %c0_9] : memref<80x128xf32, #tpu.memory_space<vmem>>, vector<80x128xf32>
    tpu.vector_store %arg4[%c0_8, %c0_9], %20 {strides = array<i32>} : memref<80x128xf32, #tpu.memory_space<vmem>>, vector<80x128xf32>,
    return
  }
  func.func @transform_0(%arg0: i32) -> (i32, i32) {
    %c0_i32 = arith.constant 0 : i32
    %c0_i32_0 = arith.constant 0 : i32
    return %arg0, %c0_i32 : i32, i32
  }
  func.func @transform_1(%arg0: i32) -> (i32, i32) {
    %c0_i32 = arith.constant 0 : i32
    %c0_i32_0 = arith.constant 0 : i32
    %c0_i32_1 = arith.constant 0 : i32
    return %c0_i32, %c0_i32_0 : i32, i32
  }
  func.func @transform_2(%arg0: i32) -> (i32, i32) {
    %c0_i32 = arith.constant 0 : i32
    %c0_i32_0 = arith.constant 0 : i32
    %c0_i32_1 = arith.constant 0 : i32
    return %c0_i32, %c0_i32_0 : i32, i32
  }
  func.func @transform_3(%arg0: i32) -> (i32, i32) {
    %c0_i32 = arith.constant 0 : i32
    %c0_i32_0 = arith.constant 0 : i32
    return %arg0, %c0_i32 : i32, i32
  }
}

</mosaic_0001>

<bundles_post_ra>
// kernel: deepspeech_forward.7
= control target key start
LH: loop header
LB: loop body
LE: loop exit
PB: predicated region body
PF: predicated region fallthrough
CT: control target
= control target key end

     0   :  { %s1797_s12 = smov 0   ;;  %s2053_s0 = inlined_call_operand.vmem [shape: bf16[1024,512], index: 0, kind: input, shape index: {}]   ;;  %s2054_s1 = inlined_call_operand.vmem [shape: bf16[512,128], index: 1, kind: input, shape index: {}]   ;;  %s2055_s2 = inlined_call_operand.vmem [shape: f32[1,128], index: 2, kind: input, shape index: {}]   ;;  %s2056_s3 = inlined_call_operand.vmem [shape: f32[1024,128], index: 3, kind: output, shape index: {}]  }
   0x1 LB: > { %s1299_s13 = sadd.s32 4294967295, %s1775_s12   ;;  %p1303_p0 = scmp.ge.s32.totalorder %s1775_s12, 1  ;;  %s1775_s12 = sphi %s1797_s12, %s13_s12  }
   0x2   : > { %p139_p1 = scmp.lt.s32.totalorder %s1775_s12, 5 }
   0x4   : > { %p140_p2 = pnand %p1303_p0, %p139_p1 }
   0x5   : > { %v1641_v0 = vld [vmem:[%s2054_s1 + $0x40] sm:$0xff] (!%p140_p2)   ;;  %v1645_v4 = vld [vmem:[%s2054_s1 + $0x48] sm:$0xff] (!%p140_p2)   ;;  %v1649_v8 = vld [vmem:[%s2054_s1 + $0x50] sm:$0xff] (!%p140_p2)   ;;  %s1304_s21 = sshll.u32 (!%p140_p2), %s1299_s13, 5 }
   0x6   : > { %143 = sbr.rel (%p140_p2) target bundleno = 385 (0x181), region = 32  ;;  %v1642_v1 = vld [vmem:[%s2054_s1 + $0xc0] sm:$0xff] (!%p140_p2)   ;;  %1409 = vmatprep.subr.bf16.mxu0 (!%p140_p2), %v1641_v0  ;;  %v1646_v5 = vld [vmem:[%s2054_s1 + $0xc8] sm:$0xff] (!%p140_p2)   ;;  %v1650_v9 = vld [vmem:[%s2054_s1 + $0xd0] sm:$0xff] (!%p140_p2)   ;;  %p165_p3 = scmp.lt.s32.totalorder (!%p140_p2), %s1304_s21, 127 }
   0x7   : > { %v1643_v2 = vld [vmem:[%s2054_s1] sm:$0xff] (!%p140_p2)   ;;  %1521 = vmatprep.subr.bf16.mxu1 (!%p140_p2), %v1642_v1  ;;  %v1647_v6 = vld [vmem:[%s2054_s1 + $0x8] sm:$0xff] (!%p140_p2)   ;;  %v1651_v10 = vld [vmem:[%s2054_s1 + $0x10] sm:$0xff] (!%p140_p2)  }
   0x8   : > { %v1644_v3 = vld [vmem:[%s2054_s1 + $0x80] sm:$0xff] (!%p140_p2)   ;;  %1410 = vmatpush3.bf16.msra.mxu0 (!%p140_p2), %v1643_v2  ;;  %v1648_v7 = vld [vmem:[%s2054_s1 + $0x88] sm:$0xff] (!%p140_p2)   ;;  %v1652_v11 = vld [vmem:[%s2054_s1 + $0x90] sm:$0xff] (!%p140_p2)  }
   0x9   : > { %1522 = vmatpush3.bf16.msra.mxu1 (!%p140_p2), %v1644_v3  ;;  %1411 = vmatprep.subr.bf16.mxu0 (!%p140_p2), %v1645_v4  ;;  %v1653_v12 = vld [vmem:[%s2054_s1 + $0x58] sm:$0xff] (!%p140_p2)   ;;  %v1657_v16 = vld [vmem:[%s2054_s1 + $0x60] sm:$0xff] (!%p140_p2)   ;;  %v1661_v20 = vld [vmem:[%s2054_s1 + $0x68] sm:$0xff] (!%p140_p2)  }
   0xa   : > { %1523 = vmatprep.subr.bf16.mxu1 (!%p140_p2), %v1646_v5  ;;  %v1654_v13 = vld [vmem:[%s2054_s1 + $0xd8] sm:$0xff] (!%p140_p2)   ;;  %v1658_v17 = vld [vmem:[%s2054_s1 + $0xe0] sm:$0xff] (!%p140_p2)   ;;  %v1662_v21 = vld [vmem:[%s2054_s1 + $0xe8] sm:$0xff] (!%p140_p2)  }
   0xb   : > { %v1655_v14 = vld [vmem:[%s2054_s1 + $0x18] sm:$0xff] (!%p140_p2)   ;;  %v1659_v18 = vld [vmem:[%s2054_s1 + $0x20] sm:$0xff] (!%p140_p2)   ;;  %v1663_v22 = vld [vmem:[%s2054_s1 + $0x28] sm:$0xff] (!%p140_p2)  }
   0xc   : > { %1412 = vmatpush3.bf16.msra.mxu0 (!%p140_p2), %v1647_v6  ;;  %v1656_v15 = vld [vmem:[%s2054_s1 + $0x98] sm:$0xff] (!%p140_p2)   ;;  %v1660_v19 = vld [vmem:[%s2054_s1 + $0xa0] sm:$0xff] (!%p140_p2)   ;;  %v1664_v23 = vld [vmem:[%s2054_s1 + $0xa8] sm:$0xff] (!%p140_p2)  }
   0xd   : > { %1524 = vmatpush3.bf16.msra.mxu1 %v1648_v7  ;;  %1413 = vmatprep.subr.bf16.mxu0 %v1649_v8  ;;  %s2058_s21 = smov (!%p165_p3, %s1304_s21), 127  ;;  %v1665_v24 = vld [vmem:[%s2054_s1 + $0x70] sm:$0xff]   ;;  %v1669_v28 = vld [vmem:[%s2054_s1 + $0x78] sm:$0xff]  }
   0xe   : > { %1525 = vmatprep.subr.bf16.mxu1 %v1650_v9  ;;  %v1666_v25 = vld [vmem:[%s2054_s1 + $0xf0] sm:$0xff]   ;;  %s1408_s18 = sshll.u32 %s2058_s21, 4  ;;  %v1670_v29 = vld [vmem:[%s2054_s1 + $0xf8] sm:$0xff]   ;;  %s1308_s7 = sshll.u32 %s2058_s21, 3 }
   0xf   : > { %v1667_v26 = vld [vmem:[%s2054_s1 + $0x30] sm:$0xff]   ;;  %s1903_s28 = scalar_lea.vmem %s2053_s0, %s1408_s18  ;;  %v1671_v30 = vld [vmem:[%s2054_s1 + $0x38] sm:$0xff]   ;;  %s1986_s10 = scalar_lea.vmem %s2056_s3, %s1308_s7 }
  0x10   : > { %1414 = vmatpush3.bf16.msra.mxu0 %v1651_v10  ;;  %v1668_v27 = vld [vmem:[%s2054_s1 + $0xb0] sm:$0xff]   ;;  %v1672_v31 = vld [vmem:[%s2054_s1 + $0xb8] sm:$0xff]  }
  0x11   : > { %1526 = vmatpush3.bf16.msra.mxu1 %v1652_v11  ;;  %1415 = vmatprep.subr.bf16.mxu0 %v1653_v12  ;;  %v1673_v32 = vld [vmem:[%s1903_s28] ss:$16 sps:$4 sm:$0xff]   ;;  %v1675_v33 = vld [vmem:[%s1903_s28 + $0x4] ss:$16 sps:$4 sm:$0xff]   ;;  %v1676_v34 = vld [vmem:[%s1903_s28 + $0x8] ss:$16 sps:$4 sm:$0xff]  }
  0x12   : > { %1527 = vmatprep.subr.bf16.mxu1 %v1654_v13  ;;  %v1678_v35 = vld [vmem:[%s1903_s28 + $0xc] ss:$16 sps:$4 sm:$0xff]   ;;  %857 = vmatprep.mubr.bf16.mxu0 %v1675_v33  ;;  %v1679_v36 = vld [vmem:[%s1903_s28 + $0x24] ss:$16 sps:$4 sm:$0xff]   ;;  %v1683_v38 = vld [vmem:[%s1903_s28 + $0x20] ss:$16 sps:$4 sm:$0xff]  }
  0x13   : > { %1018 = vmatprep.mubr.bf16.mxu1 %v1678_v35  ;;  %v1681_v37 = vld [vmem:[%s1903_s28 + $0x2c] ss:$16 sps:$4 sm:$0xff]   ;;  %v1684_v39 = vld [vmem:[%s1903_s28 + $0x28] ss:$16 sps:$4 sm:$0xff]   ;;  %v1685_v40 = vld [vmem:[%s1903_s28 + $0x44] ss:$16 sps:$4 sm:$0xff]  }
  0x14   : > { %1416 = vmatpush3.bf16.msra.mxu0 %v1655_v14  ;;  %v1687_v41 = vld [vmem:[%s1903_s28 + $0x4c] ss:$16 sps:$4 sm:$0xff]   ;;  %v1689_v42 = vld [vmem:[%s1903_s28 + $0x40] ss:$16 sps:$4 sm:$0xff]   ;;  %v1690_v43 = vld [vmem:[%s1903_s28 + $0x48] ss:$16 sps:$4 sm:$0xff]  }
  0x15   : > { %1528 = vmatpush3.bf16.msra.mxu1 %v1656_v15  ;;  %1417 = vmatprep.subr.bf16.mxu0 %v1657_v16  ;;  %v1691_v44 = vld [vmem:[%s1903_s28 + $0x64] ss:$16 sps:$4 sm:$0xff]   ;;  %v1693_v45 = vld [vmem:[%s1903_s28 + $0x6c] ss:$16 sps:$4 sm:$0xff]   ;;  %v1695_v46 = vld [vmem:[%s1903_s28 + $0x60] ss:$16 sps:$4 sm:$0xff]  }
  0x16   : > { %1529 = vmatprep.subr.bf16.mxu1 %v1658_v17  ;;  %v1696_v47 = vld [vmem:[%s1903_s28 + $0x68] ss:$16 sps:$4 sm:$0xff]   ;;  %v1697_v48 = vld [vmem:[%s1903_s28 + $0x84] ss:$16 sps:$4 sm:$0xff]   ;;  %v1699_v49 = vld [vmem:[%s1903_s28 + $0x8c] ss:$16 sps:$4 sm:$0xff]  }
  0x17   : > { %v1701_v50 = vld [vmem:[%s1903_s28 + $0x80] ss:$16 sps:$4 sm:$0xff]   ;;  %v1702_v51 = vld [vmem:[%s1903_s28 + $0x88] ss:$16 sps:$4 sm:$0xff]   ;;  %v1703_v52 = vld [vmem:[%s1903_s28 + $0xa4] ss:$16 sps:$4 sm:$0xff]  }
  0x18   : > { %1418 = vmatpush3.bf16.msra.mxu0 %v1659_v18  ;;  %v1705_v53 = vld [vmem:[%s1903_s28 + $0xac] ss:$16 sps:$4 sm:$0xff]   ;;  %v1707_v54 = vld [vmem:[%s1903_s28 + $0xa0] ss:$16 sps:$4 sm:$0xff]   ;;  %v1708_v55 = vld [vmem:[%s1903_s28 + $0xa8] ss:$16 sps:$4 sm:$0xff]  }
  0x19   : > { %1530 = vmatpush3.bf16.msra.mxu1 %v1660_v19  ;;  %1419 = vmatprep.subr.bf16.mxu0 %v1661_v20  ;;  %v1709_v56 = vld [vmem:[%s1903_s28 + $0xc4] ss:$16 sps:$4 sm:$0xff]   ;;  %v1711_v57 = vld [vmem:[%s1903_s28 + $0xcc] ss:$16 sps:$4 sm:$0xff]   ;;  %v1713_v58 = vld [vmem:[%s1903_s28 + $0xc0] ss:$16 sps:$4 sm:$0xff]  }
  0x1a   : > { %1531 = vmatprep.subr.bf16.mxu1 %v1662_v21  ;;  %v1714_v59 = vld [vmem:[%s1903_s28 + $0xc8] ss:$16 sps:$4 sm:$0xff]   ;;  %v1715_v60 = vld [vmem:[%s1903_s28 + $0xe4] ss:$16 sps:$4 sm:$0xff]   ;;  %v1717_v61 = vld [vmem:[%s1903_s28 + $0xec] ss:$16 sps:$4 sm:$0xff]  }
  0x1b   : > { %v1719_v62 = vld [vmem:[%s1903_s28 + $0xe0] ss:$16 sps:$4 sm:$0xff]   ;;  %v1720_v63 = vld [vmem:[%s1903_s28 + $0xe8] ss:$16 sps:$4 sm:$0xff]   ;;  %v1721_v0 = vld [vmem:[%s1903_s28 + $0x104] ss:$16 sps:$4 sm:$0xff]  }
  0x1c   : > { %1420 = vmatpush3.bf16.msra.mxu0 %v1663_v22  ;;  %v1723_v1 = vld [vmem:[%s1903_s28 + $0x10c] ss:$16 sps:$4 sm:$0xff]   ;;  %v1725_v2 = vld [vmem:[%s1903_s28 + $0x100] ss:$16 sps:$4 sm:$0xff]   ;;  %v1726_v3 = vld [vmem:[%s1903_s28 + $0x108] ss:$16 sps:$4 sm:$0xff]  }
  0x1d   : > { %1532 = vmatpush3.bf16.msra.mxu1 %v1664_v23  ;;  %1421 = vmatprep.subr.bf16.mxu0 %v1665_v24  ;;  %v1727_v4 = vld [vmem:[%s1903_s28 + $0x124] ss:$16 sps:$4 sm:$0xff]   ;;  %v1729_v5 = vld [vmem:[%s1903_s28 + $0x12c] ss:$16 sps:$4 sm:$0xff]   ;;  %v1731_v6 = vld [vmem:[%s1903_s28 + $0x120] ss:$16 sps:$4 sm:$0xff]  }
  0x1e   : > { %1533 = vmatprep.subr.bf16.mxu1 %v1666_v25  ;;  %v1732_v7 = vld [vmem:[%s1903_s28 + $0x128] ss:$16 sps:$4 sm:$0xff]   ;;  %v1733_v8 = vld [vmem:[%s1903_s28 + $0x144] ss:$16 sps:$4 sm:$0xff]   ;;  %v1735_v9 = vld [vmem:[%s1903_s28 + $0x14c] ss:$16 sps:$4 sm:$0xff]  }
  0x1f   : > { %v1737_v10 = vld [vmem:[%s1903_s28 + $0x140] ss:$16 sps:$4 sm:$0xff]   ;;  %v1738_v11 = vld [vmem:[%s1903_s28 + $0x148] ss:$16 sps:$4 sm:$0xff]   ;;  %v1739_v12 = vld [vmem:[%s1903_s28 + $0x164] ss:$16 sps:$4 sm:$0xff]  }
  0x20   : > { %1422 = vmatpush3.bf16.msra.mxu0 %v1667_v26  ;;  %v1741_v13 = vld [vmem:[%s1903_s28 + $0x16c] ss:$16 sps:$4 sm:$0xff]   ;;  %v1743_v14 = vld [vmem:[%s1903_s28 + $0x160] ss:$16 sps:$4 sm:$0xff]   ;;  %v1744_v15 = vld [vmem:[%s1903_s28 + $0x168] ss:$16 sps:$4 sm:$0xff]  }
  0x21   : > { %1534 = vmatpush3.bf16.msra.mxu1 %v1668_v27  ;;  %1423 = vmatprep.subr.bf16.mxu0 %v1669_v28  ;;  %v1745_v16 = vld [vmem:[%s1903_s28 + $0x184] ss:$16 sps:$4 sm:$0xff]   ;;  %v1747_v17 = vld [vmem:[%s1903_s28 + $0x18c] ss:$16 sps:$4 sm:$0xff]   ;;  %v1749_v18 = vld [vmem:[%s1903_s28 + $0x180] ss:$16 sps:$4 sm:$0xff]  }
  0x22   : > { %1535 = vmatprep.subr.bf16.mxu1 %v1670_v29  ;;  %v1750_v19 = vld [vmem:[%s1903_s28 + $0x188] ss:$16 sps:$4 sm:$0xff]   ;;  %v1751_v20 = vld [vmem:[%s1903_s28 + $0x1a4] ss:$16 sps:$4 sm:$0xff]   ;;  %v1753_v21 = vld [vmem:[%s1903_s28 + $0x1ac] ss:$16 sps:$4 sm:$0xff]  }
  0x23   : > { %v1755_v22 = vld [vmem:[%s1903_s28 + $0x1a0] ss:$16 sps:$4 sm:$0xff]   ;;  %v1756_v23 = vld [vmem:[%s1903_s28 + $0x1a8] ss:$16 sps:$4 sm:$0xff]   ;;  %v1757_v24 = vld [vmem:[%s1903_s28 + $0x1c4] ss:$16 sps:$4 sm:$0xff]  }
  0x24   : > { %1424 = vmatpush3.bf16.msra.mxu0 %v1671_v30  ;;  %v1759_v25 = vld [vmem:[%s1903_s28 + $0x1cc] ss:$16 sps:$4 sm:$0xff]   ;;  %v1761_v26 = vld [vmem:[%s1903_s28 + $0x1c0] ss:$16 sps:$4 sm:$0xff]   ;;  %v1762_v27 = vld [vmem:[%s1903_s28 + $0x1c8] ss:$16 sps:$4 sm:$0xff]  }
  0x25   : > { %1536 = vmatpush3.bf16.msra.mxu1 %v1672_v31  ;;  %v1763_v28 = vld [vmem:[%s1903_s28 + $0x1e4] ss:$16 sps:$4 sm:$0xff]   ;;  %v1765_v29 = vld [vmem:[%s1903_s28 + $0x1ec] ss:$16 sps:$4 sm:$0xff]   ;;  %v1767_v30 = vld [vmem:[%s1903_s28 + $0x1e0] ss:$16 sps:$4 sm:$0xff]  }
  0x26   : > { %v1768_v31 = vld [vmem:[%s1903_s28 + $0x1e8] ss:$16 sps:$4 sm:$0xff]  }
  0x27   : > { %858 = vmatmul.mubr.bf16.vlgmr.msra.gmra.mrb[0].mxu0 %v1673_v32 }
  0x28   : > { %1019 = vmatmul.mubr.bf16.vlgmr.msra.gmra.mrb[0].mxu1 %v1676_v34  ;;  %865 = vmatprep.mubr.bf16.mxu0 %v1679_v36  ;;  %v1978_v34 = vld [vmem:[%s2055_s2] ss:$0 sm:$0xff] }
  0x29   : > { %1026 = vmatprep.mubr.bf16.mxu1 %v1681_v37 }
  0x2f   : > { %866 = vmatmul.mubr.bf16.gmra.mrb[4].mxu0 %v1683_v38 }
  0x30   : > { %1027 = vmatmul.mubr.bf16.gmra.mrb[4].mxu1 %v1684_v39  ;;  %873 = vmatprep.mubr.bf16.mxu0 %v1685_v40 }
  0x31   : > { %1034 = vmatprep.mubr.bf16.mxu1 %v1687_v41 }
  0x37   : > { %874 = vmatmul.mubr.bf16.gmra.mrb[8].mxu0 %v1689_v42 }
  0x38   : > { %1035 = vmatmul.mubr.bf16.gmra.mrb[8].mxu1 %v1690_v43  ;;  %881 = vmatprep.mubr.bf16.mxu0 %v1691_v44 }
  0x39   : > { %1042 = vmatprep.mubr.bf16.mxu1 %v1693_v45 }
  0x3f   : > { %882 = vmatmul.mubr.bf16.gmra.mrb[12].mxu0 %v1695_v46 }
  0x40   : > { %1043 = vmatmul.mubr.bf16.gmra.mrb[12].mxu1 %v1696_v47  ;;  %889 = vmatprep.mubr.bf16.mxu0 %v1697_v48 }
  0x41   : > { %1050 = vmatprep.mubr.bf16.mxu1 %v1699_v49 }
  0x47   : > { %890 = vmatmul.mubr.bf16.gmra.mrb[16].mxu0 %v1701_v50 }
  0x48   : > { %1051 = vmatmul.mubr.bf16.gmra.mrb[16].mxu1 %v1702_v51  ;;  %897 = vmatprep.mubr.bf16.mxu0 %v1703_v52 }
  0x49   : > { %1058 = vmatprep.mubr.bf16.mxu1 %v1705_v53 }
  0x4f   : > { %898 = vmatmul.mubr.bf16.gmra.mrb[20].mxu0 %v1707_v54 }
  0x50   : > { %1059 = vmatmul.mubr.bf16.gmra.mrb[20].mxu1 %v1708_v55  ;;  %905 = vmatprep.mubr.bf16.mxu0 %v1709_v56 }
  0x51   : > { %1066 = vmatprep.mubr.bf16.mxu1 %v1711_v57 }
  0x57   : > { %906 = vmatmul.mubr.bf16.gmra.mrb[24].mxu0 %v1713_v58 }
  0x58   : > { %1067 = vmatmul.mubr.bf16.gmra.mrb[24].mxu1 %v1714_v59  ;;  %913 = vmatprep.mubr.bf16.mxu0 %v1715_v60 }
  0x59   : > { %1074 = vmatprep.mubr.bf16.mxu1 %v1717_v61 }
  0x5f   : > { %914 = vmatmul.mubr.bf16.gmra.mrb[28].mxu0 %v1719_v62 }
  0x60   : > { %1075 = vmatmul.mubr.bf16.gmra.mrb[28].mxu1 %v1720_v63  ;;  %921 = vmatprep.mubr.bf16.mxu0 %v1721_v0 }
  0x61   : > { %1082 = vmatprep.mubr.bf16.mxu1 %v1723_v1 }
  0x67   : > { %922 = vmatmul.mubr.bf16.gmra.mrb[32].mxu0 %v1725_v2 }
  0x68   : > { %1083 = vmatmul.mubr.bf16.gmra.mrb[32].mxu1 %v1726_v3  ;;  %929 = vmatprep.mubr.bf16.mxu0 %v1727_v4 }
  0x69   : > { %1090 = vmatprep.mubr.bf16.mxu1 %v1729_v5 }
  0x6f   : > { %930 = vmatmul.mubr.bf16.gmra.mrb[36].mxu0 %v1731_v6 }
  0x70   : > { %1091 = vmatmul.mubr.bf16.gmra.mrb[36].mxu1 %v1732_v7  ;;  %937 = vmatprep.mubr.bf16.mxu0 %v1733_v8 }
  0x71   : > { %1098 = vmatprep.mubr.bf16.mxu1 %v1735_v9 }
  0x77   : > { %938 = vmatmul.mubr.bf16.gmra.mrb[40].mxu0 %v1737_v10 }
  0x78   : > { %1099 = vmatmul.mubr.bf16.gmra.mrb[40].mxu1 %v1738_v11  ;;  %945 = vmatprep.mubr.bf16.mxu0 %v1739_v12 }
  0x79   : > { %1106 = vmatprep.mubr.bf16.mxu1 %v1741_v13 }
  0x7f   : > { %946 = vmatmul.mubr.bf16.gmra.mrb[44].mxu0 %v1743_v14 }
  0x80   : > { %1107 = vmatmul.mubr.bf16.gmra.mrb[44].mxu1 %v1744_v15  ;;  %953 = vmatprep.mubr.bf16.mxu0 %v1745_v16 }
  0x81   : > { %1114 = vmatprep.mubr.bf16.mxu1 %v1747_v17 }
  0x87   : > { %954 = vmatmul.mubr.bf16.gmra.mrb[48].mxu0 %v1749_v18 }
  0x88   : > { %1115 = vmatmul.mubr.bf16.gmra.mrb[48].mxu1 %v1750_v19  ;;  %961 = vmatprep.mubr.bf16.mxu0 %v1751_v20 }
  0x89   : > { %1122 = vmatprep.mubr.bf16.mxu1 %v1753_v21 }
  0x8f   : > { %962 = vmatmul.mubr.bf16.gmra.mrb[52].mxu0 %v1755_v22 }
  0x90   : > { %1123 = vmatmul.mubr.bf16.gmra.mrb[52].mxu1 %v1756_v23  ;;  %969 = vmatprep.mubr.bf16.mxu0 %v1757_v24 }
  0x91   : > { %1130 = vmatprep.mubr.bf16.mxu1 %v1759_v25 }
  0x97   : > { %970 = vmatmul.mubr.bf16.gmra.mrb[56].mxu0 %v1761_v26 }
  0x98   : > { %1131 = vmatmul.mubr.bf16.gmra.mrb[56].mxu1 %v1762_v27  ;;  %977 = vmatprep.mubr.bf16.mxu0 %v1763_v28 }
  0x99   : > { %1138 = vmatprep.mubr.bf16.mxu1 %v1765_v29 }
  0x9f   : > { %978 = vmatmul.mubr.bf16.gmra.mrb[60].mxu0 %v1767_v30 }
  0xa0   : > { %1139 = vmatmul.mubr.bf16.gmra.mrb[60].mxu1 %v1768_v31 }
  0xfa   : > { %v1425_v32 = vpop.f32.mrb[0].mxu0 }
  0xfb   : > { %v1537_v33 = vpop.f32.mrb[0].mxu1  ;;  %v1426_v35 = vpop.f32.mrb[1].mxu0 }
  0xfc   : > { %v1427_v36 = vadd.f32 %v1426_v35, %v1425_v32  ;;  %v1538_v37 = vpop.f32.mrb[1].mxu1  ;;  %v1428_v38 = vpop.f32.mrb[2].mxu0 }
  0xfd   : > { %v1539_v39 = vadd.f32 %v1538_v37, %v1537_v33  ;;  %v1540_v40 = vpop.f32.mrb[2].mxu1  ;;  %v1429_v41 = vpop.f32.mrb[3].mxu0 }
  0xfe   : > { %v860_v42 = vadd.f32 %v1427_v36, %v1978_v34  ;;  %v1430_v43 = vadd.f32 %v1429_v41, %v1428_v38  ;;  %v1541_v44 = vpop.f32.mrb[3].mxu1 }
  0xff   : > { %v1542_v45 = vadd.f32 %v1541_v44, %v1540_v40 }
 0x100   : > { %v1021_v46 = vadd.f32 %v1539_v39, %v860_v42  ;;  %v863_v47 = vadd.f32 %v1430_v43, %v1978_v34 }
 0x102   : > { %v1147_v48 = vmax.f32 %v1021_v46, 0.0  ;;  %v1024_v49 = vadd.f32 %v1542_v45, %v863_v47  ;;  %v1431_v50 = vpop.f32.mrb[4].mxu0 }
 0x103   : > { %v1543_v51 = vpop.f32.mrb[4].mxu1  ;;  %v1432_v52 = vpop.f32.mrb[5].mxu0 }
 0x104   : > { %v1179_v53 = vmin.f32 %v1147_v48, 20.0  ;;  %v1148_v54 = vmax.f32 %v1024_v49, 0.0  ;;  %v1433_v55 = vadd.f32 %v1432_v52, %v1431_v50  ;;  %v1544_v56 = vpop.f32.mrb[5].mxu1  ;;  %v1434_v57 = vpop.f32.mrb[6].mxu0 }
 0x105   : > { %v1545_v58 = vadd.f32 %v1544_v56, %v1543_v51  ;;  %v1546_v59 = vpop.f32.mrb[6].mxu1  ;;  %v1435_v60 = vpop.f32.mrb[7].mxu0 }
 0x106   : > { %1211 = vst [vmem:[%s1986_s10] sm:$0xff] %v1179_v53  ;;  %v1180_v61 = vmin.f32 %v1148_v54, 20.0  ;;  %v868_v62 = vadd.f32 %v1433_v55, %v1978_v34  ;;  %v1436_v63 = vadd.f32 %v1435_v60, %v1434_v57  ;;  %v1547_v0 = vpop.f32.mrb[7].mxu1 }
 0x107   : > { %v1548_v1 = vadd.f32 %v1547_v0, %v1546_v59 }
 0x108   : > { %1212 = vst [vmem:[%s1986_s10 + $0x8] sm:$0xff] %v1180_v61  ;;  %v1029_v2 = vadd.f32 %v1545_v58, %v868_v62  ;;  %v871_v3 = vadd.f32 %v1436_v63, %v1978_v34 }
 0x10a   : > { %v1149_v4 = vmax.f32 %v1029_v2, 0.0  ;;  %v1032_v5 = vadd.f32 %v1548_v1, %v871_v3  ;;  %v1437_v6 = vpop.f32.mrb[8].mxu0 }
 0x10b   : > { %v1549_v7 = vpop.f32.mrb[8].mxu1  ;;  %v1438_v8 = vpop.f32.mrb[9].mxu0 }
 0x10c   : > { %v1181_v9 = vmin.f32 %v1149_v4, 20.0  ;;  %v1150_v10 = vmax.f32 %v1032_v5, 0.0  ;;  %v1439_v11 = vadd.f32 %v1438_v8, %v1437_v6  ;;  %v1550_v12 = vpop.f32.mrb[9].mxu1  ;;  %v1440_v13 = vpop.f32.mrb[10].mxu0 }
 0x10d   : > { %v1551_v14 = vadd.f32 %v1550_v12, %v1549_v7  ;;  %v1552_v15 = vpop.f32.mrb[10].mxu1  ;;  %v1441_v16 = vpop.f32.mrb[11].mxu0 }
 0x10e   : > { %1213 = vst [vmem:[%s1986_s10 + $0x10] sm:$0xff] %v1181_v9  ;;  %v1182_v17 = vmin.f32 %v1150_v10, 20.0  ;;  %v876_v18 = vadd.f32 %v1439_v11, %v1978_v34  ;;  %v1442_v19 = vadd.f32 %v1441_v16, %v1440_v13  ;;  %v1553_v20 = vpop.f32.mrb[11].mxu1 }
 0x10f   : > { %v1554_v21 = vadd.f32 %v1553_v20, %v1552_v15 }
 0x110   : > { %1214 = vst [vmem:[%s1986_s10 + $0x18] sm:$0xff] %v1182_v17  ;;  %v1037_v22 = vadd.f32 %v1551_v14, %v876_v18  ;;  %v879_v23 = vadd.f32 %v1442_v19, %v1978_v34 }
 0x112   : > { %v1151_v24 = vmax.f32 %v1037_v22, 0.0  ;;  %v1040_v25 = vadd.f32 %v1554_v21, %v879_v23  ;;  %v1443_v26 = vpop.f32.mrb[12].mxu0 }
 0x113   : > { %v1555_v27 = vpop.f32.mrb[12].mxu1  ;;  %v1444_v28 = vpop.f32.mrb[13].mxu0 }
 0x114   : > { %v1183_v29 = vmin.f32 %v1151_v24, 20.0  ;;  %v1152_v30 = vmax.f32 %v1040_v25, 0.0  ;;  %v1445_v31 = vadd.f32 %v1444_v28, %v1443_v26  ;;  %v1556_v32 = vpop.f32.mrb[13].mxu1  ;;  %v1446_v33 = vpop.f32.mrb[14].mxu0 }
 0x115   : > { %v1557_v35 = vadd.f32 %v1556_v32, %v1555_v27  ;;  %v1558_v36 = vpop.f32.mrb[14].mxu1  ;;  %v1447_v37 = vpop.f32.mrb[15].mxu0 }
 0x116   : > { %1215 = vst [vmem:[%s1986_s10 + $0x20] sm:$0xff] %v1183_v29  ;;  %v1184_v38 = vmin.f32 %v1152_v30, 20.0  ;;  %v884_v39 = vadd.f32 %v1445_v31, %v1978_v34  ;;  %v1448_v40 = vadd.f32 %v1447_v37, %v1446_v33  ;;  %v1559_v41 = vpop.f32.mrb[15].mxu1 }
 0x117   : > { %v1560_v42 = vadd.f32 %v1559_v41, %v1558_v36 }
 0x118   : > { %1216 = vst [vmem:[%s1986_s10 + $0x28] sm:$0xff] %v1184_v38  ;;  %v1045_v43 = vadd.f32 %v1557_v35, %v884_v39  ;;  %v887_v44 = vadd.f32 %v1448_v40, %v1978_v34 }
 0x11a   : > { %v1153_v45 = vmax.f32 %v1045_v43, 0.0  ;;  %v1048_v46 = vadd.f32 %v1560_v42, %v887_v44  ;;  %v1449_v47 = vpop.f32.mrb[16].mxu0 }
 0x11b   : > { %v1561_v48 = vpop.f32.mrb[16].mxu1  ;;  %v1450_v49 = vpop.f32.mrb[17].mxu0 }
 0x11c   : > { %v1185_v50 = vmin.f32 %v1153_v45, 20.0  ;;  %v1154_v51 = vmax.f32 %v1048_v46, 0.0  ;;  %v1451_v52 = vadd.f32 %v1450_v49, %v1449_v47  ;;  %v1562_v53 = vpop.f32.mrb[17].mxu1  ;;  %v1452_v54 = vpop.f32.mrb[18].mxu0 }
 0x11d   : > { %v1563_v55 = vadd.f32 %v1562_v53, %v1561_v48  ;;  %v1564_v56 = vpop.f32.mrb[18].mxu1  ;;  %v1453_v57 = vpop.f32.mrb[19].mxu0 }
 0x11e   : > { %1217 = vst [vmem:[%s1986_s10 + $0x30] sm:$0xff] %v1185_v50  ;;  %v1186_v58 = vmin.f32 %v1154_v51, 20.0  ;;  %v892_v59 = vadd.f32 %v1451_v52, %v1978_v34  ;;  %v1454_v60 = vadd.f32 %v1453_v57, %v1452_v54  ;;  %v1565_v61 = vpop.f32.mrb[19].mxu1 }
 0x11f   : > { %v1566_v62 = vadd.f32 %v1565_v61, %v1564_v56 }
 0x120   : > { %1218 = vst [vmem:[%s1986_s10 + $0x38] sm:$0xff] %v1186_v58  ;;  %v1053_v63 = vadd.f32 %v1563_v55, %v892_v59  ;;  %v895_v0 = vadd.f32 %v1454_v60, %v1978_v34 }
 0x122   : > { %v1155_v1 = vmax.f32 %v1053_v63, 0.0  ;;  %v1056_v2 = vadd.f32 %v1566_v62, %v895_v0  ;;  %v1455_v3 = vpop.f32.mrb[20].mxu0 }
 0x123   : > { %v1567_v4 = vpop.f32.mrb[20].mxu1  ;;  %v1456_v5 = vpop.f32.mrb[21].mxu0 }
 0x124   : > { %v1187_v6 = vmin.f32 %v1155_v1, 20.0  ;;  %v1156_v7 = vmax.f32 %v1056_v2, 0.0  ;;  %v1457_v8 = vadd.f32 %v1456_v5, %v1455_v3  ;;  %v1568_v9 = vpop.f32.mrb[21].mxu1  ;;  %v1458_v10 = vpop.f32.mrb[22].mxu0 }
 0x125   : > { %v1569_v11 = vadd.f32 %v1568_v9, %v1567_v4  ;;  %v1570_v12 = vpop.f32.mrb[22].mxu1  ;;  %v1459_v13 = vpop.f32.mrb[23].mxu0 }
 0x126   : > { %1219 = vst [vmem:[%s1986_s10 + $0x40] sm:$0xff] %v1187_v6  ;;  %v1188_v14 = vmin.f32 %v1156_v7, 20.0  ;;  %v900_v15 = vadd.f32 %v1457_v8, %v1978_v34  ;;  %v1460_v16 = vadd.f32 %v1459_v13, %v1458_v10  ;;  %v1571_v17 = vpop.f32.mrb[23].mxu1 }
 0x127   : > { %v1572_v18 = vadd.f32 %v1571_v17, %v1570_v12 }
 0x128   : > { %1220 = vst [vmem:[%s1986_s10 + $0x48] sm:$0xff] %v1188_v14  ;;  %v1061_v19 = vadd.f32 %v1569_v11, %v900_v15  ;;  %v903_v20 = vadd.f32 %v1460_v16, %v1978_v34 }
 0x12a   : > { %v1157_v21 = vmax.f32 %v1061_v19, 0.0  ;;  %v1064_v22 = vadd.f32 %v1572_v18, %v903_v20  ;;  %v1461_v23 = vpop.f32.mrb[24].mxu0 }
 0x12b   : > { %v1573_v24 = vpop.f32.mrb[24].mxu1  ;;  %v1462_v25 = vpop.f32.mrb[25].mxu0 }
 0x12c   : > { %v1189_v26 = vmin.f32 %v1157_v21, 20.0  ;;  %v1158_v27 = vmax.f32 %v1064_v22, 0.0  ;;  %v1463_v28 = vadd.f32 %v1462_v25, %v1461_v23  ;;  %v1574_v29 = vpop.f32.mrb[25].mxu1  ;;  %v1464_v30 = vpop.f32.mrb[26].mxu0 }
 0x12d   : > { %v1575_v31 = vadd.f32 %v1574_v29, %v1573_v24  ;;  %v1576_v32 = vpop.f32.mrb[26].mxu1  ;;  %v1465_v33 = vpop.f32.mrb[27].mxu0 }
 0x12e   : > { %1221 = vst [vmem:[%s1986_s10 + $0x50] sm:$0xff] %v1189_v26  ;;  %v1190_v35 = vmin.f32 %v1158_v27, 20.0  ;;  %v908_v36 = vadd.f32 %v1463_v28, %v1978_v34  ;;  %v1466_v37 = vadd.f32 %v1465_v33, %v1464_v30  ;;  %v1577_v38 = vpop.f32.mrb[27].mxu1 }
 0x12f   : > { %v1578_v39 = vadd.f32 %v1577_v38, %v1576_v32 }
 0x130   : > { %1222 = vst [vmem:[%s1986_s10 + $0x58] sm:$0xff] %v1190_v35  ;;  %v1069_v40 = vadd.f32 %v1575_v31, %v908_v36  ;;  %v911_v41 = vadd.f32 %v1466_v37, %v1978_v34 }
 0x132   : > { %v1159_v42 = vmax.f32 %v1069_v40, 0.0  ;;  %v1072_v43 = vadd.f32 %v1578_v39, %v911_v41  ;;  %v1467_v44 = vpop.f32.mrb[28].mxu0 }
 0x133   : > { %v1579_v45 = vpop.f32.mrb[28].mxu1  ;;  %v1468_v46 = vpop.f32.mrb[29].mxu0 }
 0x134   : > { %v1191_v47 = vmin.f32 %v1159_v42, 20.0  ;;  %v1160_v48 = vmax.f32 %v1072_v43, 0.0  ;;  %v1469_v49 = vadd.f32 %v1468_v46, %v1467_v44  ;;  %v1580_v50 = vpop.f32.mrb[29].mxu1  ;;  %v1470_v51 = vpop.f32.mrb[30].mxu0 }
 0x135   : > { %v1581_v52 = vadd.f32 %v1580_v50, %v1579_v45  ;;  %v1582_v53 = vpop.f32.mrb[30].mxu1  ;;  %v1471_v54 = vpop.f32.mrb[31].mxu0 }
 0x136   : > { %1223 = vst [vmem:[%s1986_s10 + $0x60] sm:$0xff] %v1191_v47  ;;  %v1192_v55 = vmin.f32 %v1160_v48, 20.0  ;;  %v916_v56 = vadd.f32 %v1469_v49, %v1978_v34  ;;  %v1472_v57 = vadd.f32 %v1471_v54, %v1470_v51  ;;  %v1583_v58 = vpop.f32.mrb[31].mxu1 }
 0x137   : > { %v1584_v59 = vadd.f32 %v1583_v58, %v1582_v53 }
 0x138   : > { %1224 = vst [vmem:[%s1986_s10 + $0x68] sm:$0xff] %v1192_v55  ;;  %v1077_v60 = vadd.f32 %v1581_v52, %v916_v56  ;;  %v919_v61 = vadd.f32 %v1472_v57, %v1978_v34 }
 0x13a   : > { %v1161_v62 = vmax.f32 %v1077_v60, 0.0  ;;  %v1080_v63 = vadd.f32 %v1584_v59, %v919_v61  ;;  %v1473_v0 = vpop.f32.mrb[32].mxu0 }
 0x13b   : > { %v1585_v1 = vpop.f32.mrb[32].mxu1  ;;  %v1474_v2 = vpop.f32.mrb[33].mxu0 }
 0x13c   : > { %v1193_v3 = vmin.f32 %v1161_v62, 20.0  ;;  %v1162_v4 = vmax.f32 %v1080_v63, 0.0  ;;  %v1475_v5 = vadd.f32 %v1474_v2, %v1473_v0  ;;  %v1586_v6 = vpop.f32.mrb[33].mxu1  ;;  %v1476_v7 = vpop.f32.mrb[34].mxu0 }
 0x13d   : > { %v1587_v8 = vadd.f32 %v1586_v6, %v1585_v1  ;;  %v1588_v9 = vpop.f32.mrb[34].mxu1  ;;  %v1477_v10 = vpop.f32.mrb[35].mxu0 }
 0x13e   : > { %1225 = vst [vmem:[%s1986_s10 + $0x70] sm:$0xff] %v1193_v3  ;;  %v1194_v11 = vmin.f32 %v1162_v4, 20.0  ;;  %v924_v12 = vadd.f32 %v1475_v5, %v1978_v34  ;;  %v1478_v13 = vadd.f32 %v1477_v10, %v1476_v7  ;;  %v1589_v14 = vpop.f32.mrb[35].mxu1 }
 0x13f   : > { %v1590_v15 = vadd.f32 %v1589_v14, %v1588_v9 }
 0x140   : > { %1226 = vst [vmem:[%s1986_s10 + $0x78] sm:$0xff] %v1194_v11  ;;  %v1085_v16 = vadd.f32 %v1587_v8, %v924_v12  ;;  %v927_v17 = vadd.f32 %v1478_v13, %v1978_v34 }
 0x142   : > { %v1163_v18 = vmax.f32 %v1085_v16, 0.0  ;;  %v1088_v19 = vadd.f32 %v1590_v15, %v927_v17  ;;  %v1479_v20 = vpop.f32.mrb[36].mxu0 }
 0x143   : > { %v1591_v21 = vpop.f32.mrb[36].mxu1  ;;  %v1480_v22 = vpop.f32.mrb[37].mxu0 }
 0x144   : > { %v1195_v23 = vmin.f32 %v1163_v18, 20.0  ;;  %v1164_v24 = vmax.f32 %v1088_v19, 0.0  ;;  %v1481_v25 = vadd.f32 %v1480_v22, %v1479_v20  ;;  %v1592_v26 = vpop.f32.mrb[37].mxu1  ;;  %v1482_v27 = vpop.f32.mrb[38].mxu0 }
 0x145   : > { %v1593_v28 = vadd.f32 %v1592_v26, %v1591_v21  ;;  %v1594_v29 = vpop.f32.mrb[38].mxu1  ;;  %v1483_v30 = vpop.f32.mrb[39].mxu0 }
 0x146   : > { %1227 = vst [vmem:[%s1986_s10 + $0x80] sm:$0xff] %v1195_v23  ;;  %v1196_v31 = vmin.f32 %v1164_v24, 20.0  ;;  %v932_v32 = vadd.f32 %v1481_v25, %v1978_v34  ;;  %v1484_v33 = vadd.f32 %v1483_v30, %v1482_v27  ;;  %v1595_v35 = vpop.f32.mrb[39].mxu1 }
 0x147   : > { %v1596_v36 = vadd.f32 %v1595_v35, %v1594_v29 }
 0x148   : > { %1228 = vst [vmem:[%s1986_s10 + $0x88] sm:$0xff] %v1196_v31  ;;  %v1093_v37 = vadd.f32 %v1593_v28, %v932_v32  ;;  %v935_v38 = vadd.f32 %v1484_v33, %v1978_v34 }
 0x14a   : > { %v1165_v39 = vmax.f32 %v1093_v37, 0.0  ;;  %v1096_v40 = vadd.f32 %v1596_v36, %v935_v38  ;;  %v1485_v41 = vpop.f32.mrb[40].mxu0 }
 0x14b   : > { %v1597_v42 = vpop.f32.mrb[40].mxu1  ;;  %v1486_v43 = vpop.f32.mrb[41].mxu0 }
 0x14c   : > { %v1197_v44 = vmin.f32 %v1165_v39, 20.0  ;;  %v1166_v45 = vmax.f32 %v1096_v40, 0.0  ;;  %v1487_v46 = vadd.f32 %v1486_v43, %v1485_v41  ;;  %v1598_v47 = vpop.f32.mrb[41].mxu1  ;;  %v1488_v48 = vpop.f32.mrb[42].mxu0 }
 0x14d   : > { %v1599_v49 = vadd.f32 %v1598_v47, %v1597_v42  ;;  %v1600_v50 = vpop.f32.mrb[42].mxu1  ;;  %v1489_v51 = vpop.f32.mrb[43].mxu0 }
 0x14e   : > { %1229 = vst [vmem:[%s1986_s10 + $0x90] sm:$0xff] %v1197_v44  ;;  %v1198_v52 = vmin.f32 %v1166_v45, 20.0  ;;  %v940_v53 = vadd.f32 %v1487_v46, %v1978_v34  ;;  %v1490_v54 = vadd.f32 %v1489_v51, %v1488_v48  ;;  %v1601_v55 = vpop.f32.mrb[43].mxu1 }
 0x14f   : > { %v1602_v56 = vadd.f32 %v1601_v55, %v1600_v50 }
 0x150   : > { %1230 = vst [vmem:[%s1986_s10 + $0x98] sm:$0xff] %v1198_v52  ;;  %v1101_v57 = vadd.f32 %v1599_v49, %v940_v53  ;;  %v943_v58 = vadd.f32 %v1490_v54, %v1978_v34 }
 0x152   : > { %v1167_v59 = vmax.f32 %v1101_v57, 0.0  ;;  %v1104_v60 = vadd.f32 %v1602_v56, %v943_v58  ;;  %v1491_v61 = vpop.f32.mrb[44].mxu0 }
 0x153   : > { %v1603_v62 = vpop.f32.mrb[44].mxu1  ;;  %v1492_v63 = vpop.f32.mrb[45].mxu0 }
 0x154   : > { %v1199_v0 = vmin.f32 %v1167_v59, 20.0  ;;  %v1168_v1 = vmax.f32 %v1104_v60, 0.0  ;;  %v1493_v2 = vadd.f32 %v1492_v63, %v1491_v61  ;;  %v1604_v3 = vpop.f32.mrb[45].mxu1  ;;  %v1494_v4 = vpop.f32.mrb[46].mxu0 }
 0x155   : > { %v1605_v5 = vadd.f32 %v1604_v3, %v1603_v62  ;;  %v1606_v6 = vpop.f32.mrb[46].mxu1  ;;  %v1495_v7 = vpop.f32.mrb[47].mxu0 }
 0x156   : > { %1231 = vst [vmem:[%s1986_s10 + $0xa0] sm:$0xff] %v1199_v0  ;;  %v1200_v8 = vmin.f32 %v1168_v1, 20.0  ;;  %v948_v9 = vadd.f32 %v1493_v2, %v1978_v34  ;;  %v1496_v10 = vadd.f32 %v1495_v7, %v1494_v4  ;;  %v1607_v11 = vpop.f32.mrb[47].mxu1 }
 0x157   : > { %v1608_v12 = vadd.f32 %v1607_v11, %v1606_v6 }
 0x158   : > { %1232 = vst [vmem:[%s1986_s10 + $0xa8] sm:$0xff] %v1200_v8  ;;  %v1109_v13 = vadd.f32 %v1605_v5, %v948_v9  ;;  %v951_v14 = vadd.f32 %v1496_v10, %v1978_v34 }
 0x15a   : > { %v1169_v15 = vmax.f32 %v1109_v13, 0.0  ;;  %v1112_v16 = vadd.f32 %v1608_v12, %v951_v14  ;;  %v1497_v17 = vpop.f32.mrb[48].mxu0 }
 0x15b   : > { %v1609_v18 = vpop.f32.mrb[48].mxu1  ;;  %v1498_v19 = vpop.f32.mrb[49].mxu0 }
 0x15c   : > { %v1201_v20 = vmin.f32 %v1169_v15, 20.0  ;;  %v1170_v21 = vmax.f32 %v1112_v16, 0.0  ;;  %v1499_v22 = vadd.f32 %v1498_v19, %v1497_v17  ;;  %v1610_v23 = vpop.f32.mrb[49].mxu1  ;;  %v1500_v24 = vpop.f32.mrb[50].mxu0 }
 0x15d   : > { %v1611_v25 = vadd.f32 %v1610_v23, %v1609_v18  ;;  %v1612_v26 = vpop.f32.mrb[50].mxu1  ;;  %v1501_v27 = vpop.f32.mrb[51].mxu0 }
 0x15e   : > { %1233 = vst [vmem:[%s1986_s10 + $0xb0] sm:$0xff] %v1201_v20  ;;  %v1202_v28 = vmin.f32 %v1170_v21, 20.0  ;;  %v956_v29 = vadd.f32 %v1499_v22, %v1978_v34  ;;  %v1502_v30 = vadd.f32 %v1501_v27, %v1500_v24  ;;  %v1613_v31 = vpop.f32.mrb[51].mxu1 }
 0x15f   : > { %v1614_v32 = vadd.f32 %v1613_v31, %v1612_v26 }
 0x160   : > { %1234 = vst [vmem:[%s1986_s10 + $0xb8] sm:$0xff] %v1202_v28  ;;  %v1117_v33 = vadd.f32 %v1611_v25, %v956_v29  ;;  %v959_v35 = vadd.f32 %v1502_v30, %v1978_v34 }
 0x162   : > { %v1171_v36 = vmax.f32 %v1117_v33, 0.0  ;;  %v1120_v37 = vadd.f32 %v1614_v32, %v959_v35  ;;  %v1503_v38 = vpop.f32.mrb[52].mxu0 }
 0x163   : > { %v1615_v39 = vpop.f32.mrb[52].mxu1  ;;  %v1504_v40 = vpop.f32.mrb[53].mxu0 }
 0x164   : > { %v1203_v41 = vmin.f32 %v1171_v36, 20.0  ;;  %v1172_v42 = vmax.f32 %v1120_v37, 0.0  ;;  %v1505_v43 = vadd.f32 %v1504_v40, %v1503_v38  ;;  %v1616_v44 = vpop.f32.mrb[53].mxu1  ;;  %v1506_v45 = vpop.f32.mrb[54].mxu0 }
 0x165   : > { %v1617_v46 = vadd.f32 %v1616_v44, %v1615_v39  ;;  %v1618_v47 = vpop.f32.mrb[54].mxu1  ;;  %v1507_v48 = vpop.f32.mrb[55].mxu0 }
 0x166   : > { %1235 = vst [vmem:[%s1986_s10 + $0xc0] sm:$0xff] %v1203_v41  ;;  %v1204_v49 = vmin.f32 %v1172_v42, 20.0  ;;  %v964_v50 = vadd.f32 %v1505_v43, %v1978_v34  ;;  %v1508_v51 = vadd.f32 %v1507_v48, %v1506_v45  ;;  %v1619_v52 = vpop.f32.mrb[55].mxu1 }
 0x167   : > { %v1620_v53 = vadd.f32 %v1619_v52, %v1618_v47 }
 0x168   : > { %1236 = vst [vmem:[%s1986_s10 + $0xc8] sm:$0xff] %v1204_v49  ;;  %v1125_v54 = vadd.f32 %v1617_v46, %v964_v50  ;;  %v967_v55 = vadd.f32 %v1508_v51, %v1978_v34 }
 0x16a   : > { %v1173_v56 = vmax.f32 %v1125_v54, 0.0  ;;  %v1128_v57 = vadd.f32 %v1620_v53, %v967_v55  ;;  %v1509_v58 = vpop.f32.mrb[56].mxu0 }
 0x16b   : > { %v1621_v59 = vpop.f32.mrb[56].mxu1  ;;  %v1510_v60 = vpop.f32.mrb[57].mxu0 }
 0x16c   : > { %v1205_v61 = vmin.f32 %v1173_v56, 20.0  ;;  %v1174_v62 = vmax.f32 %v1128_v57, 0.0  ;;  %v1511_v63 = vadd.f32 %v1510_v60, %v1509_v58  ;;  %v1622_v0 = vpop.f32.mrb[57].mxu1  ;;  %v1512_v1 = vpop.f32.mrb[58].mxu0 }
 0x16d   : > { %v1623_v2 = vadd.f32 %v1622_v0, %v1621_v59  ;;  %v1624_v3 = vpop.f32.mrb[58].mxu1  ;;  %v1513_v4 = vpop.f32.mrb[59].mxu0 }
 0x16e   : > { %1237 = vst [vmem:[%s1986_s10 + $0xd0] sm:$0xff] %v1205_v61  ;;  %v1206_v5 = vmin.f32 %v1174_v62, 20.0  ;;  %v972_v6 = vadd.f32 %v1511_v63, %v1978_v34  ;;  %v1514_v7 = vadd.f32 %v1513_v4, %v1512_v1  ;;  %v1625_v8 = vpop.f32.mrb[59].mxu1 }
 0x16f   : > { %v1626_v9 = vadd.f32 %v1625_v8, %v1624_v3 }
 0x170   : > { %1238 = vst [vmem:[%s1986_s10 + $0xd8] sm:$0xff] %v1206_v5  ;;  %v1133_v10 = vadd.f32 %v1623_v2, %v972_v6  ;;  %v975_v11 = vadd.f32 %v1514_v7, %v1978_v34 }
 0x172   : > { %v1175_v12 = vmax.f32 %v1133_v10, 0.0  ;;  %v1136_v13 = vadd.f32 %v1626_v9, %v975_v11  ;;  %v1515_v14 = vpop.f32.mrb[60].mxu0 }
 0x173   : > { %v1627_v15 = vpop.f32.mrb[60].mxu1  ;;  %v1516_v16 = vpop.f32.mrb[61].mxu0 }
 0x174   : > { %v1207_v17 = vmin.f32 %v1175_v12, 20.0  ;;  %v1176_v18 = vmax.f32 %v1136_v13, 0.0  ;;  %v1517_v19 = vadd.f32 %v1516_v16, %v1515_v14  ;;  %v1628_v20 = vpop.f32.mrb[61].mxu1  ;;  %v1518_v21 = vpop.f32.mrb[62].mxu0 }
 0x175   : > { %v1629_v22 = vadd.f32 %v1628_v20, %v1627_v15  ;;  %v1630_v23 = vpop.f32.mrb[62].mxu1  ;;  %v1519_v24 = vpop.f32.mrb[63].mxu0 }
 0x176   : > { %1239 = vst [vmem:[%s1986_s10 + $0xe0] sm:$0xff] %v1207_v17  ;;  %v1208_v25 = vmin.f32 %v1176_v18, 20.0  ;;  %v980_v26 = vadd.f32 %v1517_v19, %v1978_v34  ;;  %v1520_v27 = vadd.f32 %v1519_v24, %v1518_v21  ;;  %v1631_v28 = vpop.f32.mrb[63].mxu1 }
 0x177   : > { %v1632_v29 = vadd.f32 %v1631_v28, %v1630_v23 }
 0x178   : > { %1240 = vst [vmem:[%s1986_s10 + $0xe8] sm:$0xff] %v1208_v25  ;;  %v1141_v30 = vadd.f32 %v1629_v22, %v980_v26  ;;  %v983_v31 = vadd.f32 %v1520_v27, %v1978_v34 }
 0x17a   : > { %v1177_v32 = vmax.f32 %v1141_v30, 0.0  ;;  %v1144_v33 = vadd.f32 %v1632_v29, %v983_v31 }
 0x17c   : > { %v1209_v35 = vmin.f32 %v1177_v32, 20.0  ;;  %v1178_v36 = vmax.f32 %v1144_v33, 0.0 }
 0x17e   : > { %1241 = vst [vmem:[%s1986_s10 + $0xf0] sm:$0xff] %v1209_v35  ;;  %v1210_v37 = vmin.f32 %v1178_v36, 20.0 }
 0x180   : > { %1242 = vst [vmem:[%s1986_s10 + $0xf8] sm:$0xff] %v1210_v37 }
 0x181 PF: > { %s13_s12 = sadd.s32 1, %s1775_s12  }
 0x182   : > { %p10_p4 = scmp.ge.s32.totalorder %s13_s12, 6  }
 0x184   :  { %12 = sbr.rel (!%p10_p4) target bundleno = 1 (0x1), region = 62 }

// kernel: deepspeech_forward.8
= control target key start
LH: loop header
LB: loop body
LE: loop exit
PB: predicated region body
PF: predicated region fallthrough
CT: control target
= control target key end

     0   :  { %s9488_s1 = inlined_call_operand.vmem [shape: bf16[7424,128], index: 1, kind: input, shape index: {}]   ;;  %s9489_s0 = inlined_call_operand.vmem [shape: bf16[24,7424], index: 0, kind: input, shape index: {}]   ;;  %s9490_s2 = inlined_call_operand.vmem [shape: f32[1,128], index: 2, kind: input, shape index: {}]   ;;  %s9491_s3 = inlined_call_operand.vmem [shape: f32[24,128], index: 3, kind: output, shape index: {}]  }
   0x1   :  { %v7128_v0 = vld [vmem:[%s9488_s1 + $0x40] sm:$0xff]   ;;  %v7132_v4 = vld [vmem:[%s9488_s1 + $0x48] sm:$0xff]   ;;  %v7136_v8 = vld [vmem:[%s9488_s1 + $0x50] sm:$0xff]  }
   0x2   :  { %v7129_v1 = vld [vmem:[%s9488_s1 + $0xc0] sm:$0xff]   ;;  %6300 = vmatprep.subr.bf16.mxu0 %v7128_v0  ;;  %v7133_v5 = vld [vmem:[%s9488_s1 + $0xc8] sm:$0xff]   ;;  %v7137_v9 = vld [vmem:[%s9488_s1 + $0xd0] sm:$0xff]  }
   0x3   :  { %v7130_v2 = vld [vmem:[%s9488_s1] sm:$0xff]   ;;  %6328 = vmatprep.subr.bf16.mxu1 %v7129_v1  ;;  %v7134_v6 = vld [vmem:[%s9488_s1 + $0x8] sm:$0xff]   ;;  %v7138_v10 = vld [vmem:[%s9488_s1 + $0x10] sm:$0xff]  }
   0x4   :  { %v7131_v3 = vld [vmem:[%s9488_s1 + $0x80] sm:$0xff]   ;;  %6301 = vmatpush3.bf16.msra.mxu0 %v7130_v2  ;;  %v7135_v7 = vld [vmem:[%s9488_s1 + $0x88] sm:$0xff]   ;;  %v7139_v11 = vld [vmem:[%s9488_s1 + $0x90] sm:$0xff]  }
   0x5   :  { %6329 = vmatpush3.bf16.msra.mxu1 %v7131_v3  ;;  %6302 = vmatprep.subr.bf16.mxu0 %v7132_v4  ;;  %v7140_v12 = vld [vmem:[%s9488_s1 + $0x58] sm:$0xff]   ;;  %v7144_v16 = vld [vmem:[%s9488_s1 + $0x60] sm:$0xff]   ;;  %v7148_v20 = vld [vmem:[%s9488_s1 + $0x68] sm:$0xff]  }
   0x6   :  { %6330 = vmatprep.subr.bf16.mxu1 %v7133_v5  ;;  %v7141_v13 = vld [vmem:[%s9488_s1 + $0xd8] sm:$0xff]   ;;  %v7145_v17 = vld [vmem:[%s9488_s1 + $0xe0] sm:$0xff]   ;;  %v7149_v21 = vld [vmem:[%s9488_s1 + $0xe8] sm:$0xff]  }
   0x7   :  { %v7142_v14 = vld [vmem:[%s9488_s1 + $0x18] sm:$0xff]   ;;  %v7146_v18 = vld [vmem:[%s9488_s1 + $0x20] sm:$0xff]   ;;  %v7150_v22 = vld [vmem:[%s9488_s1 + $0x28] sm:$0xff]  }
   0x8   :  { %6303 = vmatpush3.bf16.msra.mxu0 %v7134_v6  ;;  %v7143_v15 = vld [vmem:[%s9488_s1 + $0x98] sm:$0xff]   ;;  %v7147_v19 = vld [vmem:[%s9488_s1 + $0xa0] sm:$0xff]   ;;  %v7151_v23 = vld [vmem:[%s9488_s1 + $0xa8] sm:$0xff]  }
   0x9   :  { %6331 = vmatpush3.bf16.msra.mxu1 %v7135_v7  ;;  %6304 = vmatprep.subr.bf16.mxu0 %v7136_v8  ;;  %v7152_v24 = vld [vmem:[%s9488_s1 + $0x70] sm:$0xff]   ;;  %v7156_v28 = vld [vmem:[%s9488_s1 + $0x78] sm:$0xff]   ;;  %v7160_v32 = vld [vmem:[%s9489_s0] ss:$232 sps:$4 sm:$0xff]  }
   0xa   :  { %6332 = vmatprep.subr.bf16.mxu1 %v7137_v9  ;;  %v7153_v25 = vld [vmem:[%s9488_s1 + $0xf0] sm:$0xff]   ;;  %v7157_v29 = vld [vmem:[%s9488_s1 + $0xf8] sm:$0xff]   ;;  %v7162_v33 = vld [vmem:[%s9489_s0 + $0x4] ss:$232 sps:$4 sm:$0xff]  }
   0xb   :  { %v7154_v26 = vld [vmem:[%s9488_s1 + $0x30] sm:$0xff]   ;;  %v7158_v30 = vld [vmem:[%s9488_s1 + $0x38] sm:$0xff]   ;;  %4346 = vmatprep.mubr.bf16.mxu0 %v7162_v33  ;;  %v7166_v36 = vld [vmem:[%s9488_s1 + $0x140] sm:$0xff]  }
   0xc   :  { %6305 = vmatpush3.bf16.msra.mxu0 %v7138_v10  ;;  %v7155_v27 = vld [vmem:[%s9488_s1 + $0xb0] sm:$0xff]   ;;  %v7159_v31 = vld [vmem:[%s9488_s1 + $0xb8] sm:$0xff]   ;;  %v7167_v37 = vld [vmem:[%s9488_s1 + $0x1c0] sm:$0xff]  }
   0xd   :  { %6333 = vmatpush3.bf16.msra.mxu1 %v7139_v11  ;;  %6306 = vmatprep.subr.bf16.mxu0 %v7140_v12  ;;  %v7163_v34 = vld [vmem:[%s9489_s0 + $0x8] ss:$232 sps:$4 sm:$0xff]   ;;  %v7165_v35 = vld [vmem:[%s9489_s0 + $0xc] ss:$232 sps:$4 sm:$0xff]   ;;  %v7168_v38 = vld [vmem:[%s9488_s1 + $0x100] sm:$0xff]  }
   0xe   :  { %6334 = vmatprep.subr.bf16.mxu1 %v7141_v13  ;;  %4394 = vmatprep.mubr.bf16.mxu1 %v7165_v35  ;;  %v7169_v39 = vld [vmem:[%s9488_s1 + $0x180] sm:$0xff]   ;;  %v7170_v40 = vld [vmem:[%s9488_s1 + $0x148] sm:$0xff]   ;;  %v7174_v44 = vld [vmem:[%s9488_s1 + $0x150] sm:$0xff]  }
   0xf   :  { %v7171_v41 = vld [vmem:[%s9488_s1 + $0x1c8] sm:$0xff]   ;;  %v7175_v45 = vld [vmem:[%s9488_s1 + $0x1d0] sm:$0xff]   ;;  %v7178_v48 = vld [vmem:[%s9488_s1 + $0x158] sm:$0xff]  }
  0x10   :  { %6307 = vmatpush3.bf16.msra.mxu0 %v7142_v14  ;;  %v7172_v42 = vld [vmem:[%s9488_s1 + $0x108] sm:$0xff]   ;;  %v7176_v46 = vld [vmem:[%s9488_s1 + $0x110] sm:$0xff]   ;;  %v7179_v49 = vld [vmem:[%s9488_s1 + $0x1d8] sm:$0xff]  }
  0x11   :  { %6335 = vmatpush3.bf16.msra.mxu1 %v7143_v15  ;;  %6308 = vmatprep.subr.bf16.mxu0 %v7144_v16  ;;  %v7173_v43 = vld [vmem:[%s9488_s1 + $0x188] sm:$0xff]   ;;  %v7177_v47 = vld [vmem:[%s9488_s1 + $0x190] sm:$0xff]   ;;  %v7180_v50 = vld [vmem:[%s9488_s1 + $0x118] sm:$0xff]  }
  0x12   :  { %6336 = vmatprep.subr.bf16.mxu1 %v7145_v17  ;;  %v7181_v51 = vld [vmem:[%s9488_s1 + $0x198] sm:$0xff]   ;;  %v7182_v52 = vld [vmem:[%s9488_s1 + $0x160] sm:$0xff]   ;;  %v7186_v56 = vld [vmem:[%s9488_s1 + $0x168] sm:$0xff]  }
  0x13   :  { %v7183_v53 = vld [vmem:[%s9488_s1 + $0x1e0] sm:$0xff]   ;;  %v7187_v57 = vld [vmem:[%s9488_s1 + $0x1e8] sm:$0xff]   ;;  %v73_v58 = vld [vmem:[%s9489_s0 + $0x1d0] sm:$0xff] }
  0x14   :  { %6309 = vmatpush3.bf16.msra.mxu0 %v7146_v18  ;;  %v7184_v54 = vld [vmem:[%s9488_s1 + $0x120] sm:$0xff]   ;;  %v5779_v59 = vcombine.high %v73_v58, %v73_v58  ;;  %v7189_v60 = vld [vmem:[%s9488_s1 + $0x128] sm:$0xff]   ;;  %v5778_v61 = vcombine.low %v73_v58, %v73_v58  ;;  %v74_v63 = vld [vmem:[%s9489_s0 + $0x1d8] sm:$0xff] }
  0x15   :  { %6337 = vmatpush3.bf16.msra.mxu1 %v7147_v19  ;;  %6310 = vmatprep.subr.bf16.mxu0 %v7148_v20  ;;  %v7185_v55 = vld [vmem:[%s9488_s1 + $0x1a0] sm:$0xff]   ;;  %v7190_v62 = vld [vmem:[%s9488_s1 + $0x1a8] sm:$0xff]   ;;  %v5781_v0 = vcombine.high %v74_v63, %v74_v63  ;;  %v5780_v1 = vcombine.low %v74_v63, %v74_v63  ;;  %v7194_v2 = vld [vmem:[%s9488_s1 + $0x170] sm:$0xff]  }
  0x16   :  { %6338 = vmatprep.subr.bf16.mxu1 %v7149_v21  ;;  %v7195_v3 = vld [vmem:[%s9488_s1 + $0x1f0] sm:$0xff]   ;;  %v7198_v6 = vld [vmem:[%s9488_s1 + $0x178] sm:$0xff]   ;;  %v7208_v14 = vld [vmem:[%s9488_s1 + $0x240] sm:$0xff]  }
  0x17   :  { %v7196_v4 = vld [vmem:[%s9488_s1 + $0x130] sm:$0xff]   ;;  %v7199_v7 = vld [vmem:[%s9488_s1 + $0x1f8] sm:$0xff]   ;;  %v7209_v15 = vld [vmem:[%s9488_s1 + $0x2c0] sm:$0xff]  }
  0x18   :  { %6311 = vmatpush3.bf16.msra.mxu0 %v7150_v22  ;;  %v7197_v5 = vld [vmem:[%s9488_s1 + $0x1b0] sm:$0xff]   ;;  %v7200_v8 = vld [vmem:[%s9488_s1 + $0x138] sm:$0xff]   ;;  %v7210_v16 = vld [vmem:[%s9488_s1 + $0x200] sm:$0xff]  }
  0x19   :  { %6339 = vmatpush3.bf16.msra.mxu1 %v7151_v23  ;;  %6312 = vmatprep.subr.bf16.mxu0 %v7152_v24  ;;  %v7201_v9 = vld [vmem:[%s9488_s1 + $0x1b8] sm:$0xff]   ;;  %v7211_v17 = vld [vmem:[%s9488_s1 + $0x280] sm:$0xff]   ;;  %v7212_v18 = vld [vmem:[%s9488_s1 + $0x248] sm:$0xff]  }
  0x1a   :  { %6340 = vmatprep.subr.bf16.mxu1 %v7153_v25  ;;  %v7202_v10 = vld [vmem:[%s9489_s0 + $0x10] ss:$232 sps:$4 sm:$0xff]   ;;  %v7204_v11 = vld [vmem:[%s9489_s0 + $0x14] ss:$232 sps:$4 sm:$0xff]   ;;  %v7213_v19 = vld [vmem:[%s9488_s1 + $0x2c8] sm:$0xff]  }
  0x1b   :  { %v7205_v12 = vld [vmem:[%s9489_s0 + $0x18] ss:$232 sps:$4 sm:$0xff]   ;;  %v7207_v13 = vld [vmem:[%s9489_s0 + $0x1c] ss:$232 sps:$4 sm:$0xff]   ;;  %v7214_v20 = vld [vmem:[%s9488_s1 + $0x208] sm:$0xff]  }
  0x1c   :  { %6313 = vmatpush3.bf16.msra.mxu0 %v7154_v26  ;;  %v7215_v21 = vld [vmem:[%s9488_s1 + $0x288] sm:$0xff]   ;;  %v75_v22 = vld [vmem:[%s9489_s0 + $0x1e0] sm:$0xff]  ;;  %v7218_v25 = vld [vmem:[%s9488_s1 + $0x250] sm:$0xff]  }
  0x1d   :  { %6341 = vmatpush3.bf16.msra.mxu1 %v7155_v27  ;;  %6314 = vmatprep.subr.bf16.mxu0 %v7156_v28  ;;  %v5783_v23 = vcombine.high %v75_v22, %v75_v22  ;;  %v5782_v24 = vcombine.low %v75_v22, %v75_v22  ;;  %v7219_v26 = vld [vmem:[%s9488_s1 + $0x2d0] sm:$0xff]   ;;  %v76_v27 = vld [vmem:[%s9489_s0 + $0x1e8] sm:$0xff]  ;;  %v7225_v33 = vld [vmem:[%s9488_s1 + $0x2d8] sm:$0xff]  }
  0x1e   :  { %6342 = vmatprep.subr.bf16.mxu1 %v7157_v29  ;;  %v5785_v28 = vcombine.high %v76_v27, %v76_v27  ;;  %v7221_v29 = vld [vmem:[%s9488_s1 + $0x210] sm:$0xff]   ;;  %v7227_v35 = vld [vmem:[%s9488_s1 + $0x298] sm:$0xff]   ;;  %v7252_v58 = vld [vmem:[%s9488_s1 + $0x300] sm:$0xff]  }
  0x1f   :  { %v7257_v63 = vld [vmem:[%s9488_s1 + $0x388] sm:$0xff]   ;;  %v7278_v22 = vld [vmem:[%s9488_s1 + $0x370] sm:$0xff]  }
  0x20   :  { %6315 = vmatpush3.bf16.msra.mxu0 %v7158_v30  ;;  %v5784_v30 = vcombine.low %v76_v27, %v76_v27  ;;  %v7283_v27 = vld [vmem:[%s9488_s1 + $0x3f8] sm:$0xff]  }
  0x21   :  { %6343 = vmatpush3.bf16.msra.mxu1 %v7159_v31  ;;  %6356 = vmatprep.subr.bf16.mxu0 %v7166_v36  ;;  %v7222_v31 = vld [vmem:[%s9488_s1 + $0x290] sm:$0xff]   ;;  %v7228_v36 = vld [vmem:[%s9488_s1 + $0x260] sm:$0xff]  }
  0x22   :  { %6384 = vmatprep.subr.bf16.mxu1 %v7167_v37  ;;  %v7229_v37 = vld [vmem:[%s9488_s1 + $0x2e0] sm:$0xff]  }
  0x23   :  { %4347 = vmatmul.mubr.bf16.vlgmr.msra.gmra.mrb[0].mxu0 %v7160_v32  ;;  %v7224_v32 = vld [vmem:[%s9488_s1 + $0x258] sm:$0xff]  }
  0x24   :  { %4395 = vmatmul.mubr.bf16.vlgmr.msra.gmra.mrb[0].mxu1 %v7163_v34  ;;  %6357 = vmatpush3.bf16.msra.mxu0 %v7168_v38  ;;  %v7226_v34 = vld [vmem:[%s9488_s1 + $0x218] sm:$0xff]   ;;  %v7230_v38 = vld [vmem:[%s9488_s1 + $0x220] sm:$0xff]  }
  0x25   :  { %6385 = vmatpush3.bf16.msra.mxu1 %v7169_v39  ;;  %6358 = vmatprep.subr.bf16.mxu0 %v7170_v40  ;;  %v7231_v39 = vld [vmem:[%s9488_s1 + $0x2a0] sm:$0xff]   ;;  %v7232_v40 = vld [vmem:[%s9488_s1 + $0x268] sm:$0xff]  }
  0x26   :  { %6386 = vmatprep.subr.bf16.mxu1 %v7171_v41  ;;  %4354 = vmatprep.mubr.bf16.mxu0 %v5779_v59  ;;  %v7233_v41 = vld [vmem:[%s9488_s1 + $0x2e8] sm:$0xff]   ;;  %v7253_v59 = vld [vmem:[%s9488_s1 + $0x380] sm:$0xff]  }
  0x27   :  { %4402 = vmatprep.mubr.bf16.mxu1 %v5781_v0  ;;  %v77_v0 = vld [vmem:[%s9489_s0 + $0x1f0] sm:$0xff] }
  0x28   :  { %6359 = vmatpush3.bf16.msra.mxu0 %v7172_v42  ;;  %v7234_v42 = vld [vmem:[%s9488_s1 + $0x228] sm:$0xff]  }
  0x29   :  { %6387 = vmatpush3.bf16.msra.mxu1 %v7173_v43  ;;  %6360 = vmatprep.subr.bf16.mxu0 %v7174_v44  ;;  %v7235_v43 = vld [vmem:[%s9488_s1 + $0x2a8] sm:$0xff]   ;;  %v7236_v44 = vld [vmem:[%s9488_s1 + $0x270] sm:$0xff]  }
  0x2a   :  { %6388 = vmatprep.subr.bf16.mxu1 %v7175_v45  ;;  %v7237_v45 = vld [vmem:[%s9488_s1 + $0x2f0] sm:$0xff]  }
  0x2b   :  { %4355 = vmatmul.mubr.bf16.gmra.mrb[4].mxu0 %v5778_v61  ;;  %v7255_v61 = vld [vmem:[%s9488_s1 + $0x3c8] sm:$0xff]  }
  0x2c   :  { %6361 = vmatpush3.bf16.msra.mxu0 %v7176_v46  ;;  %4403 = vmatmul.mubr.bf16.gmra.mrb[4].mxu1 %v5780_v1  ;;  %v7238_v46 = vld [vmem:[%s9488_s1 + $0x230] sm:$0xff]   ;;  %v5787_v1 = vcombine.high %v77_v0, %v77_v0 }
  0x2d   :  { %6389 = vmatpush3.bf16.msra.mxu1 %v7177_v47  ;;  %6362 = vmatprep.subr.bf16.mxu0 %v7178_v48  ;;  %v7239_v47 = vld [vmem:[%s9488_s1 + $0x2b0] sm:$0xff]   ;;  %v7240_v48 = vld [vmem:[%s9488_s1 + $0x278] sm:$0xff]  }
  0x2e   :  { %6390 = vmatprep.subr.bf16.mxu1 %v7179_v49  ;;  %4442 = vmatprep.mubr.bf16.mxu0 %v7204_v11  ;;  %v7241_v49 = vld [vmem:[%s9488_s1 + $0x2f8] sm:$0xff]  }
  0x2f   :  { %4490 = vmatprep.mubr.bf16.mxu1 %v7207_v13  ;;  %v7267_v11 = vld [vmem:[%s9488_s1 + $0x3d8] sm:$0xff]  }
  0x30   :  { %6363 = vmatpush3.bf16.msra.mxu0 %v7180_v50  ;;  %v7242_v50 = vld [vmem:[%s9488_s1 + $0x238] sm:$0xff]  }
  0x31   :  { %6391 = vmatpush3.bf16.msra.mxu1 %v7181_v51  ;;  %6364 = vmatprep.subr.bf16.mxu0 %v7182_v52  ;;  %v7243_v51 = vld [vmem:[%s9488_s1 + $0x2b8] sm:$0xff]   ;;  %v7244_v52 = vld [vmem:[%s9489_s0 + $0x20] ss:$232 sps:$4 sm:$0xff]  }
  0x32   :  { %6392 = vmatprep.subr.bf16.mxu1 %v7183_v53  ;;  %v7246_v53 = vld [vmem:[%s9489_s0 + $0x24] ss:$232 sps:$4 sm:$0xff]   ;;  %v7269_v13 = vld [vmem:[%s9488_s1 + $0x398] sm:$0xff]  }
  0x34   :  { %6365 = vmatpush3.bf16.msra.mxu0 %v7184_v54  ;;  %v7247_v54 = vld [vmem:[%s9489_s0 + $0x28] ss:$232 sps:$4 sm:$0xff]  }
  0x35   :  { %6393 = vmatpush3.bf16.msra.mxu1 %v7185_v55  ;;  %6366 = vmatprep.subr.bf16.mxu0 %v7186_v56  ;;  %v7249_v55 = vld [vmem:[%s9489_s0 + $0x2c] ss:$232 sps:$4 sm:$0xff]   ;;  %v7250_v56 = vld [vmem:[%s9488_s1 + $0x340] sm:$0xff]  }
  0x36   :  { %6394 = vmatprep.subr.bf16.mxu1 %v7187_v57  ;;  %v7251_v57 = vld [vmem:[%s9488_s1 + $0x3c0] sm:$0xff]  }
  0x38   :  { %6367 = vmatpush3.bf16.msra.mxu0 %v7189_v60  ;;  %v7254_v60 = vld [vmem:[%s9488_s1 + $0x348] sm:$0xff]  }
  0x39   :  { %6395 = vmatpush3.bf16.msra.mxu1 %v7190_v62  ;;  %6368 = vmatprep.subr.bf16.mxu0 %v7194_v2  ;;  %v7256_v62 = vld [vmem:[%s9488_s1 + $0x308] sm:$0xff]   ;;  %v5786_v2 = vcombine.low %v77_v0, %v77_v0  ;;  %v7320_v0 = vld [vmem:[%s9488_s1 + $0x470] sm:$0xff]  }
  0x3a   :  { %6396 = vmatprep.subr.bf16.mxu1 %v7195_v3  ;;  %v7260_v3 = vld [vmem:[%s9488_s1 + $0x350] sm:$0xff]  }
  0x3c   :  { %6369 = vmatpush3.bf16.msra.mxu0 %v7196_v4  ;;  %v7261_v4 = vld [vmem:[%s9488_s1 + $0x3d0] sm:$0xff]  }
  0x3d   :  { %6397 = vmatpush3.bf16.msra.mxu1 %v7197_v5  ;;  %6370 = vmatprep.subr.bf16.mxu0 %v7198_v6  ;;  %v78_v5 = vld [vmem:[%s9489_s0 + $0x1f8] sm:$0xff] }
  0x3e   :  { %6398 = vmatprep.subr.bf16.mxu1 %v7199_v7  ;;  %v5789_v6 = vcombine.high %v78_v5, %v78_v5  ;;  %v7263_v7 = vld [vmem:[%s9488_s1 + $0x310] sm:$0xff]  }
  0x40   :  { %6371 = vmatpush3.bf16.msra.mxu0 %v7200_v8  ;;  %v5788_v8 = vcombine.low %v78_v5, %v78_v5  ;;  %v7325_v5 = vld [vmem:[%s9488_s1 + $0x4f8] sm:$0xff]  }
  0x41   :  { %6399 = vmatpush3.bf16.msra.mxu1 %v7201_v9  ;;  %6412 = vmatprep.subr.bf16.mxu0 %v7208_v14  ;;  %v7264_v9 = vld [vmem:[%s9488_s1 + $0x390] sm:$0xff]   ;;  %v7270_v14 = vld [vmem:[%s9488_s1 + $0x360] sm:$0xff]  }
  0x42   :  { %6440 = vmatprep.subr.bf16.mxu1 %v7209_v15  ;;  %v7271_v15 = vld [vmem:[%s9488_s1 + $0x3e0] sm:$0xff]  }
  0x43   :  { %4443 = vmatmul.mubr.bf16.vlgmr.msra.gmra.mrb[8].mxu0 %v7202_v10  ;;  %v7266_v10 = vld [vmem:[%s9488_s1 + $0x358] sm:$0xff]  }
  0x44   :  { %4491 = vmatmul.mubr.bf16.vlgmr.msra.gmra.mrb[8].mxu1 %v7205_v12  ;;  %6413 = vmatpush3.bf16.msra.mxu0 %v7210_v16  ;;  %v7268_v12 = vld [vmem:[%s9488_s1 + $0x318] sm:$0xff]   ;;  %v7272_v16 = vld [vmem:[%s9488_s1 + $0x320] sm:$0xff]  }
  0x45   :  { %6441 = vmatpush3.bf16.msra.mxu1 %v7211_v17  ;;  %6414 = vmatprep.subr.bf16.mxu0 %v7212_v18  ;;  %v7273_v17 = vld [vmem:[%s9488_s1 + $0x3a0] sm:$0xff]   ;;  %v7274_v18 = vld [vmem:[%s9488_s1 + $0x368] sm:$0xff]  }
  0x46   :  { %6442 = vmatprep.subr.bf16.mxu1 %v7213_v19  ;;  %4450 = vmatprep.mubr.bf16.mxu0 %v5783_v23  ;;  %v7275_v19 = vld [vmem:[%s9488_s1 + $0x3e8] sm:$0xff]   ;;  %v7279_v23 = vld [vmem:[%s9488_s1 + $0x3f0] sm:$0xff]  }
  0x47   :  { %4498 = vmatprep.mubr.bf16.mxu1 %v5785_v28  ;;  %v7284_v28 = vld [vmem:[%s9488_s1 + $0x338] sm:$0xff]  }
  0x48   :  { %6415 = vmatpush3.bf16.msra.mxu0 %v7214_v20  ;;  %v7276_v20 = vld [vmem:[%s9488_s1 + $0x328] sm:$0xff]  }
  0x49   :  { %6443 = vmatpush3.bf16.msra.mxu1 %v7215_v21  ;;  %6416 = vmatprep.subr.bf16.mxu0 %v7218_v25  ;;  %v7277_v21 = vld [vmem:[%s9488_s1 + $0x3a8] sm:$0xff]   ;;  %v7281_v25 = vld [vmem:[%s9488_s1 + $0x3b0] sm:$0xff]  }
  0x4a   :  { %6444 = vmatprep.subr.bf16.mxu1 %v7219_v26  ;;  %v7282_v26 = vld [vmem:[%s9488_s1 + $0x378] sm:$0xff]  }
  0x4b   :  { %4451 = vmatmul.mubr.bf16.gmra.mrb[12].mxu0 %v5782_v24  ;;  %v7280_v24 = vld [vmem:[%s9488_s1 + $0x330] sm:$0xff]  }
  0x4c   :  { %6417 = vmatpush3.bf16.msra.mxu0 %v7221_v29  ;;  %4499 = vmatmul.mubr.bf16.gmra.mrb[12].mxu1 %v5784_v30  ;;  %v7285_v29 = vld [vmem:[%s9488_s1 + $0x3b8] sm:$0xff]  }
  0x4d   :  { %6445 = vmatpush3.bf16.msra.mxu1 %v7222_v31  ;;  %6418 = vmatprep.subr.bf16.mxu0 %v7224_v32  ;;  %v7286_v30 = vld [vmem:[%s9489_s0 + $0x30] ss:$232 sps:$4 sm:$0xff]   ;;  %v7288_v31 = vld [vmem:[%s9489_s0 + $0x34] ss:$232 sps:$4 sm:$0xff]  }
  0x4e   :  { %6446 = vmatprep.subr.bf16.mxu1 %v7225_v33  ;;  %4538 = vmatprep.mubr.bf16.mxu0 %v7246_v53  ;;  %v7289_v32 = vld [vmem:[%s9489_s0 + $0x38] ss:$232 sps:$4 sm:$0xff]   ;;  %v7291_v33 = vld [vmem:[%s9489_s0 + $0x3c] ss:$232 sps:$4 sm:$0xff]  }
  0x4f   :  { %4586 = vmatprep.mubr.bf16.mxu1 %v7249_v55  ;;  %v7309_v53 = vld [vmem:[%s9488_s1 + $0x4d8] sm:$0xff]  }
  0x50   :  { %6419 = vmatpush3.bf16.msra.mxu0 %v7226_v34  ;;  %v7292_v34 = vld [vmem:[%s9488_s1 + $0x440] sm:$0xff]   ;;  %v7311_v55 = vld [vmem:[%s9488_s1 + $0x498] sm:$0xff]  }
  0x51   :  { %6447 = vmatpush3.bf16.msra.mxu1 %v7227_v35  ;;  %6420 = vmatprep.subr.bf16.mxu0 %v7228_v36  ;;  %v7293_v35 = vld [vmem:[%s9488_s1 + $0x4c0] sm:$0xff]  }
  0x52   :  { %6448 = vmatprep.subr.bf16.mxu1 %v7229_v37  ;;  %v7294_v36 = vld [vmem:[%s9488_s1 + $0x400] sm:$0xff]  }
  0x53   :  { %v7295_v37 = vld [vmem:[%s9488_s1 + $0x480] sm:$0xff]  }
  0x54   :  { %6421 = vmatpush3.bf16.msra.mxu0 %v7230_v38  ;;  %v7296_v38 = vld [vmem:[%s9488_s1 + $0x448] sm:$0xff]  }
  0x55   :  { %6449 = vmatpush3.bf16.msra.mxu1 %v7231_v39  ;;  %6422 = vmatprep.subr.bf16.mxu0 %v7232_v40  ;;  %v7297_v39 = vld [vmem:[%s9488_s1 + $0x4c8] sm:$0xff]  }
  0x56   :  { %6450 = vmatprep.subr.bf16.mxu1 %v7233_v41  ;;  %v7298_v40 = vld [vmem:[%s9488_s1 + $0x408] sm:$0xff]  }
  0x57   :  { %v7299_v41 = vld [vmem:[%s9488_s1 + $0x488] sm:$0xff]  }
  0x58   :  { %6423 = vmatpush3.bf16.msra.mxu0 %v7234_v42  ;;  %v79_v42 = vld [vmem:[%s9489_s0 + $0x200] sm:$0xff] }
  0x59   :  { %6451 = vmatpush3.bf16.msra.mxu1 %v7235_v43  ;;  %6424 = vmatprep.subr.bf16.mxu0 %v7236_v44  ;;  %v5791_v43 = vcombine.high %v79_v42, %v79_v42  ;;  %v5790_v44 = vcombine.low %v79_v42, %v79_v42  ;;  %v7362_v42 = vld [vmem:[%s9488_s1 + $0x570] sm:$0xff]  }
  0x5a   :  { %6452 = vmatprep.subr.bf16.mxu1 %v7237_v45  ;;  %v7302_v45 = vld [vmem:[%s9488_s1 + $0x450] sm:$0xff]  }
  0x5c   :  { %6425 = vmatpush3.bf16.msra.mxu0 %v7238_v46  ;;  %v7303_v46 = vld [vmem:[%s9488_s1 + $0x4d0] sm:$0xff]  }
  0x5d   :  { %6453 = vmatpush3.bf16.msra.mxu1 %v7239_v47  ;;  %6426 = vmatprep.subr.bf16.mxu0 %v7240_v48  ;;  %v80_v47 = vld [vmem:[%s9489_s0 + $0x208] sm:$0xff] }
  0x5e   :  { %6454 = vmatprep.subr.bf16.mxu1 %v7241_v49  ;;  %v5793_v48 = vcombine.high %v80_v47, %v80_v47  ;;  %v7305_v49 = vld [vmem:[%s9488_s1 + $0x410] sm:$0xff]  }
  0x60   :  { %6427 = vmatpush3.bf16.msra.mxu0 %v7242_v50  ;;  %v5792_v50 = vcombine.low %v80_v47, %v80_v47  ;;  %v7367_v47 = vld [vmem:[%s9488_s1 + $0x5f8] sm:$0xff]  }
  0x61   :  { %6455 = vmatpush3.bf16.msra.mxu1 %v7243_v51  ;;  %6468 = vmatprep.subr.bf16.mxu0 %v7250_v56  ;;  %v7306_v51 = vld [vmem:[%s9488_s1 + $0x490] sm:$0xff]   ;;  %v7312_v56 = vld [vmem:[%s9488_s1 + $0x460] sm:$0xff]  }
  0x62   :  { %6496 = vmatprep.subr.bf16.mxu1 %v7251_v57  ;;  %v7313_v57 = vld [vmem:[%s9488_s1 + $0x4e0] sm:$0xff]  }
  0x63   :  { %4539 = vmatmul.mubr.bf16.vlgmr.msra.gmra.mrb[16].mxu0 %v7244_v52  ;;  %v7308_v52 = vld [vmem:[%s9488_s1 + $0x458] sm:$0xff]  }
  0x64   :  { %4587 = vmatmul.mubr.bf16.vlgmr.msra.gmra.mrb[16].mxu1 %v7247_v54  ;;  %6469 = vmatpush3.bf16.msra.mxu0 %v7252_v58  ;;  %v7310_v54 = vld [vmem:[%s9488_s1 + $0x418] sm:$0xff]   ;;  %v7314_v58 = vld [vmem:[%s9488_s1 + $0x420] sm:$0xff]  }
  0x65   :  { %6497 = vmatpush3.bf16.msra.mxu1 %v7253_v59  ;;  %6470 = vmatprep.subr.bf16.mxu0 %v7254_v60  ;;  %v7315_v59 = vld [vmem:[%s9488_s1 + $0x4a0] sm:$0xff]   ;;  %v7316_v60 = vld [vmem:[%s9488_s1 + $0x468] sm:$0xff]  }
  0x66   :  { %6498 = vmatprep.subr.bf16.mxu1 %v7255_v61  ;;  %4546 = vmatprep.mubr.bf16.mxu0 %v5787_v1  ;;  %v7317_v61 = vld [vmem:[%s9488_s1 + $0x4e8] sm:$0xff]   ;;  %v7321_v1 = vld [vmem:[%s9488_s1 + $0x4f0] sm:$0xff]  }
  0x67   :  { %4594 = vmatprep.mubr.bf16.mxu1 %v5789_v6  ;;  %v7326_v6 = vld [vmem:[%s9488_s1 + $0x438] sm:$0xff]  }
  0x68   :  { %6471 = vmatpush3.bf16.msra.mxu0 %v7256_v62  ;;  %v7318_v62 = vld [vmem:[%s9488_s1 + $0x428] sm:$0xff]  }
  0x69   :  { %6499 = vmatpush3.bf16.msra.mxu1 %v7257_v63  ;;  %6472 = vmatprep.subr.bf16.mxu0 %v7260_v3  ;;  %v7319_v63 = vld [vmem:[%s9488_s1 + $0x4a8] sm:$0xff]   ;;  %v7323_v3 = vld [vmem:[%s9488_s1 + $0x4b0] sm:$0xff]  }
  0x6a   :  { %6500 = vmatprep.subr.bf16.mxu1 %v7261_v4  ;;  %v7324_v4 = vld [vmem:[%s9488_s1 + $0x478] sm:$0xff]  }
  0x6b   :  { %4547 = vmatmul.mubr.bf16.gmra.mrb[20].mxu0 %v5786_v2  ;;  %v7322_v2 = vld [vmem:[%s9488_s1 + $0x430] sm:$0xff]  }
  0x6c   :  { %6473 = vmatpush3.bf16.msra.mxu0 %v7263_v7  ;;  %4595 = vmatmul.mubr.bf16.gmra.mrb[20].mxu1 %v5788_v8  ;;  %v7327_v7 = vld [vmem:[%s9488_s1 + $0x4b8] sm:$0xff]   ;;  %v7328_v8 = vld [vmem:[%s9489_s0 + $0x40] ss:$232 sps:$4 sm:$0xff]  }
  0x6d   :  { %6501 = vmatpush3.bf16.msra.mxu1 %v7264_v9  ;;  %6474 = vmatprep.subr.bf16.mxu0 %v7266_v10  ;;  %v7330_v9 = vld [vmem:[%s9489_s0 + $0x44] ss:$232 sps:$4 sm:$0xff]   ;;  %v7331_v10 = vld [vmem:[%s9489_s0 + $0x48] ss:$232 sps:$4 sm:$0xff]  }
  0x6e   :  { %6502 = vmatprep.subr.bf16.mxu1 %v7267_v11  ;;  %4634 = vmatprep.mubr.bf16.mxu0 %v7288_v31  ;;  %v7333_v11 = vld [vmem:[%s9489_s0 + $0x4c] ss:$232 sps:$4 sm:$0xff]   ;;  %v7351_v31 = vld [vmem:[%s9488_s1 + $0x5d8] sm:$0xff]  }
  0x6f   :  { %4682 = vmatprep.mubr.bf16.mxu1 %v7291_v33  ;;  %v7353_v33 = vld [vmem:[%s9488_s1 + $0x598] sm:$0xff]  }
  0x70   :  { %6475 = vmatpush3.bf16.msra.mxu0 %v7268_v12  ;;  %v7334_v12 = vld [vmem:[%s9488_s1 + $0x540] sm:$0xff]  }
  0x71   :  { %6503 = vmatpush3.bf16.msra.mxu1 %v7269_v13  ;;  %6476 = vmatprep.subr.bf16.mxu0 %v7270_v14  ;;  %v7335_v13 = vld [vmem:[%s9488_s1 + $0x5c0] sm:$0xff]  }
  0x72   :  { %6504 = vmatprep.subr.bf16.mxu1 %v7271_v15  ;;  %v7336_v14 = vld [vmem:[%s9488_s1 + $0x500] sm:$0xff]  }
  0x73   :  { %v7337_v15 = vld [vmem:[%s9488_s1 + $0x580] sm:$0xff]  }
  0x74   :  { %6477 = vmatpush3.bf16.msra.mxu0 %v7272_v16  ;;  %v7338_v16 = vld [vmem:[%s9488_s1 + $0x548] sm:$0xff]  }
  0x75   :  { %6505 = vmatpush3.bf16.msra.mxu1 %v7273_v17  ;;  %6478 = vmatprep.subr.bf16.mxu0 %v7274_v18  ;;  %v7339_v17 = vld [vmem:[%s9488_s1 + $0x5c8] sm:$0xff]  }
  0x76   :  { %6506 = vmatprep.subr.bf16.mxu1 %v7275_v19  ;;  %v7340_v18 = vld [vmem:[%s9488_s1 + $0x508] sm:$0xff]  }
  0x77   :  { %v7341_v19 = vld [vmem:[%s9488_s1 + $0x588] sm:$0xff]  }
  0x78   :  { %6479 = vmatpush3.bf16.msra.mxu0 %v7276_v20  ;;  %v81_v20 = vld [vmem:[%s9489_s0 + $0x210] sm:$0xff] }
  0x79   :  { %6507 = vmatpush3.bf16.msra.mxu1 %v7277_v21  ;;  %6480 = vmatprep.subr.bf16.mxu0 %v7278_v22  ;;  %v5795_v21 = vcombine.high %v81_v20, %v81_v20  ;;  %v5794_v22 = vcombine.low %v81_v20, %v81_v20  ;;  %v7404_v20 = vld [vmem:[%s9488_s1 + $0x670] sm:$0xff]  }
  0x7a   :  { %6508 = vmatprep.subr.bf16.mxu1 %v7279_v23  ;;  %v7344_v23 = vld [vmem:[%s9488_s1 + $0x550] sm:$0xff]  }
  0x7c   :  { %6481 = vmatpush3.bf16.msra.mxu0 %v7280_v24  ;;  %v7345_v24 = vld [vmem:[%s9488_s1 + $0x5d0] sm:$0xff]  }
  0x7d   :  { %6509 = vmatpush3.bf16.msra.mxu1 %v7281_v25  ;;  %6482 = vmatprep.subr.bf16.mxu0 %v7282_v26  ;;  %v82_v25 = vld [vmem:[%s9489_s0 + $0x218] sm:$0xff] }
  0x7e   :  { %6510 = vmatprep.subr.bf16.mxu1 %v7283_v27  ;;  %v5797_v26 = vcombine.high %v82_v25, %v82_v25  ;;  %v7347_v27 = vld [vmem:[%s9488_s1 + $0x510] sm:$0xff]  }
  0x80   :  { %6483 = vmatpush3.bf16.msra.mxu0 %v7284_v28  ;;  %v5796_v28 = vcombine.low %v82_v25, %v82_v25  ;;  %v7409_v25 = vld [vmem:[%s9488_s1 + $0x6f8] sm:$0xff]  }
  0x81   :  { %6511 = vmatpush3.bf16.msra.mxu1 %v7285_v29  ;;  %6524 = vmatprep.subr.bf16.mxu0 %v7292_v34  ;;  %v7348_v29 = vld [vmem:[%s9488_s1 + $0x590] sm:$0xff]   ;;  %v7354_v34 = vld [vmem:[%s9488_s1 + $0x560] sm:$0xff]  }
  0x82   :  { %6552 = vmatprep.subr.bf16.mxu1 %v7293_v35  ;;  %v7355_v35 = vld [vmem:[%s9488_s1 + $0x5e0] sm:$0xff]  }
  0x83   :  { %4635 = vmatmul.mubr.bf16.vlgmr.msra.gmra.mrb[24].mxu0 %v7286_v30  ;;  %v7350_v30 = vld [vmem:[%s9488_s1 + $0x558] sm:$0xff]  }
  0x84   :  { %4683 = vmatmul.mubr.bf16.vlgmr.msra.gmra.mrb[24].mxu1 %v7289_v32  ;;  %6525 = vmatpush3.bf16.msra.mxu0 %v7294_v36  ;;  %v7352_v32 = vld [vmem:[%s9488_s1 + $0x518] sm:$0xff]   ;;  %v7356_v36 = vld [vmem:[%s9488_s1 + $0x520] sm:$0xff]  }
  0x85   :  { %6553 = vmatpush3.bf16.msra.mxu1 %v7295_v37  ;;  %6526 = vmatprep.subr.bf16.mxu0 %v7296_v38  ;;  %v7357_v37 = vld [vmem:[%s9488_s1 + $0x5a0] sm:$0xff]   ;;  %v7358_v38 = vld [vmem:[%s9488_s1 + $0x568] sm:$0xff]  }
  0x86   :  { %6554 = vmatprep.subr.bf16.mxu1 %v7297_v39  ;;  %4642 = vmatprep.mubr.bf16.mxu0 %v5791_v43  ;;  %v7359_v39 = vld [vmem:[%s9488_s1 + $0x5e8] sm:$0xff]   ;;  %v7363_v43 = vld [vmem:[%s9488_s1 + $0x5f0] sm:$0xff]  }
  0x87   :  { %4690 = vmatprep.mubr.bf16.mxu1 %v5793_v48  ;;  %v7368_v48 = vld [vmem:[%s9488_s1 + $0x538] sm:$0xff]  }
  0x88   :  { %6527 = vmatpush3.bf16.msra.mxu0 %v7298_v40  ;;  %v7360_v40 = vld [vmem:[%s9488_s1 + $0x528] sm:$0xff]  }
  0x89   :  { %6555 = vmatpush3.bf16.msra.mxu1 %v7299_v41  ;;  %6528 = vmatprep.subr.bf16.mxu0 %v7302_v45  ;;  %v7361_v41 = vld [vmem:[%s9488_s1 + $0x5a8] sm:$0xff]   ;;  %v7365_v45 = vld [vmem:[%s9488_s1 + $0x5b0] sm:$0xff]  }
  0x8a   :  { %6556 = vmatprep.subr.bf16.mxu1 %v7303_v46  ;;  %v7366_v46 = vld [vmem:[%s9488_s1 + $0x578] sm:$0xff]  }
  0x8b   :  { %4643 = vmatmul.mubr.bf16.gmra.mrb[28].mxu0 %v5790_v44  ;;  %v7364_v44 = vld [vmem:[%s9488_s1 + $0x530] sm:$0xff]  }
  0x8c   :  { %6529 = vmatpush3.bf16.msra.mxu0 %v7305_v49  ;;  %4691 = vmatmul.mubr.bf16.gmra.mrb[28].mxu1 %v5792_v50  ;;  %v7369_v49 = vld [vmem:[%s9488_s1 + $0x5b8] sm:$0xff]  }
  0x8d   :  { %6557 = vmatpush3.bf16.msra.mxu1 %v7306_v51  ;;  %6530 = vmatprep.subr.bf16.mxu0 %v7308_v52  ;;  %v7370_v50 = vld [vmem:[%s9489_s0 + $0x50] ss:$232 sps:$4 sm:$0xff]   ;;  %v7372_v51 = vld [vmem:[%s9489_s0 + $0x54] ss:$232 sps:$4 sm:$0xff]  }
  0x8e   :  { %6558 = vmatprep.subr.bf16.mxu1 %v7309_v53  ;;  %4730 = vmatprep.mubr.bf16.mxu0 %v7330_v9  ;;  %v7373_v52 = vld [vmem:[%s9489_s0 + $0x58] ss:$232 sps:$4 sm:$0xff]   ;;  %v7375_v53 = vld [vmem:[%s9489_s0 + $0x5c] ss:$232 sps:$4 sm:$0xff]  }
  0x8f   :  { %4778 = vmatprep.mubr.bf16.mxu1 %v7333_v11  ;;  %v7393_v9 = vld [vmem:[%s9488_s1 + $0x6d8] sm:$0xff]  }
  0x90   :  { %6531 = vmatpush3.bf16.msra.mxu0 %v7310_v54  ;;  %v7376_v54 = vld [vmem:[%s9488_s1 + $0x640] sm:$0xff]   ;;  %v7395_v11 = vld [vmem:[%s9488_s1 + $0x698] sm:$0xff]  }
  0x91   :  { %6559 = vmatpush3.bf16.msra.mxu1 %v7311_v55  ;;  %6532 = vmatprep.subr.bf16.mxu0 %v7312_v56  ;;  %v7377_v55 = vld [vmem:[%s9488_s1 + $0x6c0] sm:$0xff]  }
  0x92   :  { %6560 = vmatprep.subr.bf16.mxu1 %v7313_v57  ;;  %v7378_v56 = vld [vmem:[%s9488_s1 + $0x600] sm:$0xff]  }
  0x93   :  { %v7379_v57 = vld [vmem:[%s9488_s1 + $0x680] sm:$0xff]  }
  0x94   :  { %6533 = vmatpush3.bf16.msra.mxu0 %v7314_v58  ;;  %v7380_v58 = vld [vmem:[%s9488_s1 + $0x648] sm:$0xff]  }
  0x95   :  { %6561 = vmatpush3.bf16.msra.mxu1 %v7315_v59  ;;  %6534 = vmatprep.subr.bf16.mxu0 %v7316_v60  ;;  %v7381_v59 = vld [vmem:[%s9488_s1 + $0x6c8] sm:$0xff]  }
  0x96   :  { %6562 = vmatprep.subr.bf16.mxu1 %v7317_v61  ;;  %v7382_v60 = vld [vmem:[%s9488_s1 + $0x608] sm:$0xff]  }
  0x97   :  { %v7383_v61 = vld [vmem:[%s9488_s1 + $0x688] sm:$0xff]  }
  0x98   :  { %6535 = vmatpush3.bf16.msra.mxu0 %v7318_v62  ;;  %v83_v62 = vld [vmem:[%s9489_s0 + $0x220] sm:$0xff] }
  0x99   :  { %6563 = vmatpush3.bf16.msra.mxu1 %v7319_v63  ;;  %6536 = vmatprep.subr.bf16.mxu0 %v7320_v0  ;;  %v5799_v63 = vcombine.high %v83_v62, %v83_v62  ;;  %v5798_v0 = vcombine.low %v83_v62, %v83_v62  ;;  %v7434_v62 = vld [vmem:[%s9488_s1 + $0x758] sm:$0xff]  }
  0x9a   :  { %6564 = vmatprep.subr.bf16.mxu1 %v7321_v1  ;;  %v7386_v1 = vld [vmem:[%s9488_s1 + $0x650] sm:$0xff]  }
  0x9c   :  { %6537 = vmatpush3.bf16.msra.mxu0 %v7322_v2  ;;  %v7387_v2 = vld [vmem:[%s9488_s1 + $0x6d0] sm:$0xff]  }
  0x9d   :  { %6565 = vmatpush3.bf16.msra.mxu1 %v7323_v3  ;;  %6538 = vmatprep.subr.bf16.mxu0 %v7324_v4  ;;  %v84_v3 = vld [vmem:[%s9489_s0 + $0x228] sm:$0xff] }
  0x9e   :  { %6566 = vmatprep.subr.bf16.mxu1 %v7325_v5  ;;  %v5801_v4 = vcombine.high %v84_v3, %v84_v3  ;;  %v7389_v5 = vld [vmem:[%s9488_s1 + $0x610] sm:$0xff]  }
  0xa0   :  { %6539 = vmatpush3.bf16.msra.mxu0 %v7326_v6  ;;  %v5800_v6 = vcombine.low %v84_v3, %v84_v3  ;;  %v7439_v3 = vld [vmem:[%s9488_s1 + $0x7e0] sm:$0xff]  }
  0xa1   :  { %6567 = vmatpush3.bf16.msra.mxu1 %v7327_v7  ;;  %6580 = vmatprep.subr.bf16.mxu0 %v7334_v12  ;;  %v7390_v7 = vld [vmem:[%s9488_s1 + $0x690] sm:$0xff]   ;;  %v7396_v12 = vld [vmem:[%s9488_s1 + $0x660] sm:$0xff]  }
  0xa2   :  { %6608 = vmatprep.subr.bf16.mxu1 %v7335_v13  ;;  %v7397_v13 = vld [vmem:[%s9488_s1 + $0x6e0] sm:$0xff]  }
  0xa3   :  { %4731 = vmatmul.mubr.bf16.vlgmr.msra.gmra.mrb[32].mxu0 %v7328_v8  ;;  %v7392_v8 = vld [vmem:[%s9488_s1 + $0x658] sm:$0xff]  }
  0xa4   :  { %4779 = vmatmul.mubr.bf16.vlgmr.msra.gmra.mrb[32].mxu1 %v7331_v10  ;;  %6581 = vmatpush3.bf16.msra.mxu0 %v7336_v14  ;;  %v7394_v10 = vld [vmem:[%s9488_s1 + $0x618] sm:$0xff]   ;;  %v7398_v14 = vld [vmem:[%s9488_s1 + $0x620] sm:$0xff]  }
  0xa5   :  { %6609 = vmatpush3.bf16.msra.mxu1 %v7337_v15  ;;  %6582 = vmatprep.subr.bf16.mxu0 %v7338_v16  ;;  %v7399_v15 = vld [vmem:[%s9488_s1 + $0x6a0] sm:$0xff]   ;;  %v7400_v16 = vld [vmem:[%s9488_s1 + $0x668] sm:$0xff]  }
  0xa6   :  { %6610 = vmatprep.subr.bf16.mxu1 %v7339_v17  ;;  %4738 = vmatprep.mubr.bf16.mxu0 %v5795_v21  ;;  %v7401_v17 = vld [vmem:[%s9488_s1 + $0x6e8] sm:$0xff]   ;;  %v7405_v21 = vld [vmem:[%s9488_s1 + $0x6f0] sm:$0xff]  }
  0xa7   :  { %4786 = vmatprep.mubr.bf16.mxu1 %v5797_v26  ;;  %v7410_v26 = vld [vmem:[%s9488_s1 + $0x638] sm:$0xff]  }
  0xa8   :  { %6583 = vmatpush3.bf16.msra.mxu0 %v7340_v18  ;;  %v7402_v18 = vld [vmem:[%s9488_s1 + $0x628] sm:$0xff]  }
  0xa9   :  { %6611 = vmatpush3.bf16.msra.mxu1 %v7341_v19  ;;  %6584 = vmatprep.subr.bf16.mxu0 %v7344_v23  ;;  %v7403_v19 = vld [vmem:[%s9488_s1 + $0x6a8] sm:$0xff]   ;;  %v7407_v23 = vld [vmem:[%s9488_s1 + $0x6b0] sm:$0xff]  }
  0xaa   :  { %6612 = vmatprep.subr.bf16.mxu1 %v7345_v24  ;;  %v7408_v24 = vld [vmem:[%s9488_s1 + $0x678] sm:$0xff]  }
  0xab   :  { %4739 = vmatmul.mubr.bf16.gmra.mrb[36].mxu0 %v5794_v22  ;;  %v7406_v22 = vld [vmem:[%s9488_s1 + $0x630] sm:$0xff]  }
  0xac   :  { %6585 = vmatpush3.bf16.msra.mxu0 %v7347_v27  ;;  %4787 = vmatmul.mubr.bf16.gmra.mrb[36].mxu1 %v5796_v28  ;;  %v7411_v27 = vld [vmem:[%s9488_s1 + $0x6b8] sm:$0xff]   ;;  %v7412_v28 = vld [vmem:[%s9489_s0 + $0x60] ss:$232 sps:$4 sm:$0xff]  }
  0xad   :  { %6613 = vmatpush3.bf16.msra.mxu1 %v7348_v29  ;;  %6586 = vmatprep.subr.bf16.mxu0 %v7350_v30  ;;  %v7414_v29 = vld [vmem:[%s9489_s0 + $0x64] ss:$232 sps:$4 sm:$0xff]   ;;  %v7415_v30 = vld [vmem:[%s9489_s0 + $0x68] ss:$232 sps:$4 sm:$0xff]  }
  0xae   :  { %6614 = vmatprep.subr.bf16.mxu1 %v7351_v31  ;;  %4826 = vmatprep.mubr.bf16.mxu0 %v7372_v51  ;;  %v7417_v31 = vld [vmem:[%s9489_s0 + $0x6c] ss:$232 sps:$4 sm:$0xff]  }
  0xaf   :  { %4874 = vmatprep.mubr.bf16.mxu1 %v7375_v53 }
  0xb0   :  { %6587 = vmatpush3.bf16.msra.mxu0 %v7352_v32  ;;  %v7418_v32 = vld [vmem:[%s9488_s1 + $0x740] sm:$0xff]  }
  0xb1   :  { %6615 = vmatpush3.bf16.msra.mxu1 %v7353_v33  ;;  %6588 = vmatprep.subr.bf16.mxu0 %v7354_v34  ;;  %v7419_v34 = vld [vmem:[%s9488_s1 + $0x7c0] sm:$0xff]  }
  0xb2   :  { %6616 = vmatprep.subr.bf16.mxu1 %v7355_v35 }
  0xb4   :  { %6589 = vmatpush3.bf16.msra.mxu0 %v7356_v36  ;;  %v7420_v36 = vld [vmem:[%s9488_s1 + $0x700] sm:$0xff]  }
  0xb5   :  { %6617 = vmatpush3.bf16.msra.mxu1 %v7357_v37  ;;  %6590 = vmatprep.subr.bf16.mxu0 %v7358_v38  ;;  %v7421_v38 = vld [vmem:[%s9488_s1 + $0x780] sm:$0xff]  }
  0xb6   :  { %6618 = vmatprep.subr.bf16.mxu1 %v7359_v39 }
  0xb8   :  { %6591 = vmatpush3.bf16.msra.mxu0 %v7360_v40 }
  0xb9   :  { %6619 = vmatpush3.bf16.msra.mxu1 %v7361_v41  ;;  %6592 = vmatprep.subr.bf16.mxu0 %v7362_v42  ;;  %v7422_v41 = vld [vmem:[%s9488_s1 + $0x748] sm:$0xff]  }
  0xba   :  { %6620 = vmatprep.subr.bf16.mxu1 %v7363_v43 }
  0xbc   :  { %6593 = vmatpush3.bf16.msra.mxu0 %v7364_v44  ;;  %v7423_v44 = vld [vmem:[%s9488_s1 + $0x7c8] sm:$0xff]  }
  0xbd   :  { %6621 = vmatpush3.bf16.msra.mxu1 %v7365_v45  ;;  %6594 = vmatprep.subr.bf16.mxu0 %v7366_v46  ;;  %v7424_v46 = vld [vmem:[%s9488_s1 + $0x708] sm:$0xff]  }
  0xbe   :  { %6622 = vmatprep.subr.bf16.mxu1 %v7367_v47 }
  0xc0   :  { %6595 = vmatpush3.bf16.msra.mxu0 %v7368_v48  ;;  %v7425_v48 = vld [vmem:[%s9488_s1 + $0x788] sm:$0xff]  }
  0xc1   :  { %6623 = vmatpush3.bf16.msra.mxu1 %v7369_v49  ;;  %6636 = vmatprep.subr.bf16.mxu0 %v7376_v54  ;;  %v85_v49 = vld [vmem:[%s9489_s0 + $0x230] sm:$0xff] }
  0xc2   :  { %6664 = vmatprep.subr.bf16.mxu1 %v7377_v55  ;;  %v5802_v53 = vcombine.low %v85_v49, %v85_v49  ;;  %v7428_v54 = vld [vmem:[%s9488_s1 + $0x750] sm:$0xff]  }
  0xc3   :  { %4827 = vmatmul.mubr.bf16.vlgmr.msra.gmra.mrb[40].mxu0 %v7370_v50 }
  0xc4   :  { %4875 = vmatmul.mubr.bf16.vlgmr.msra.gmra.mrb[40].mxu1 %v7373_v52  ;;  %6637 = vmatpush3.bf16.msra.mxu0 %v7378_v56  ;;  %v5803_v52 = vcombine.high %v85_v49, %v85_v49  ;;  %v7429_v56 = vld [vmem:[%s9488_s1 + $0x7d0] sm:$0xff]  }
  0xc5   :  { %6665 = vmatpush3.bf16.msra.mxu1 %v7379_v57  ;;  %6638 = vmatprep.subr.bf16.mxu0 %v7380_v58  ;;  %v86_v57 = vld [vmem:[%s9489_s0 + $0x238] sm:$0xff] }
  0xc6   :  { %6666 = vmatprep.subr.bf16.mxu1 %v7381_v59  ;;  %4834 = vmatprep.mubr.bf16.mxu0 %v5799_v63  ;;  %v5805_v58 = vcombine.high %v86_v57, %v86_v57  ;;  %v7431_v59 = vld [vmem:[%s9488_s1 + $0x710] sm:$0xff]   ;;  %v7435_v63 = vld [vmem:[%s9488_s1 + $0x7d8] sm:$0xff]  }
  0xc7   :  { %4882 = vmatprep.mubr.bf16.mxu1 %v5801_v4  ;;  %v7440_v4 = vld [vmem:[%s9488_s1 + $0x720] sm:$0xff]  }
  0xc8   :  { %6639 = vmatpush3.bf16.msra.mxu0 %v7382_v60  ;;  %v5804_v60 = vcombine.low %v86_v57, %v86_v57  ;;  %v87_v57 = vld [vmem:[%s9489_s0 + $0x240] sm:$0xff] }
  0xc9   :  { %6667 = vmatpush3.bf16.msra.mxu1 %v7383_v61  ;;  %6640 = vmatprep.subr.bf16.mxu0 %v7386_v1  ;;  %v7432_v61 = vld [vmem:[%s9488_s1 + $0x790] sm:$0xff]   ;;  %v7437_v1 = vld [vmem:[%s9488_s1 + $0x798] sm:$0xff]  }
  0xca   :  { %6668 = vmatprep.subr.bf16.mxu1 %v7387_v2  ;;  %v7438_v2 = vld [vmem:[%s9488_s1 + $0x760] sm:$0xff]  }
  0xcb   :  { %4835 = vmatmul.mubr.bf16.gmra.mrb[44].mxu0 %v5798_v0  ;;  %v7436_v0 = vld [vmem:[%s9488_s1 + $0x718] sm:$0xff]  }
  0xcc   :  { %6641 = vmatpush3.bf16.msra.mxu0 %v7389_v5  ;;  %4883 = vmatmul.mubr.bf16.gmra.mrb[44].mxu1 %v5800_v6  ;;  %v7441_v5 = vld [vmem:[%s9488_s1 + $0x7a0] sm:$0xff]  }
  0xcd   :  { %6669 = vmatpush3.bf16.msra.mxu1 %v7390_v7  ;;  %6642 = vmatprep.subr.bf16.mxu0 %v7392_v8  ;;  %v5719_v6 = vld [vmem:[%s9490_s2] ss:$0 sm:$0xff]  ;;  %v7442_v8 = vld [vmem:[%s9488_s1 + $0x768] sm:$0xff]  }
  0xce   :  { %6670 = vmatprep.subr.bf16.mxu1 %v7393_v9  ;;  %4922 = vmatprep.mubr.bf16.mxu0 %v7414_v29 }
  0xcf   :  { %4970 = vmatprep.mubr.bf16.mxu1 %v7417_v31  ;;  %v7452_v31 = vld [vmem:[%s9488_s1 + $0x738] sm:$0xff]  }
  0xd0   :  { %6643 = vmatpush3.bf16.msra.mxu0 %v7394_v10  ;;  %v7443_v10 = vld [vmem:[%s9488_s1 + $0x7e8] sm:$0xff]  }
  0xd1   :  { %6671 = vmatpush3.bf16.msra.mxu1 %v7395_v11  ;;  %6644 = vmatprep.subr.bf16.mxu0 %v7396_v12  ;;  %v7444_v12 = vld [vmem:[%s9488_s1 + $0x728] sm:$0xff]  }
  0xd2   :  { %6672 = vmatprep.subr.bf16.mxu1 %v7397_v13 }
  0xd4   :  { %6645 = vmatpush3.bf16.msra.mxu0 %v7398_v14  ;;  %v7445_v14 = vld [vmem:[%s9488_s1 + $0x7a8] sm:$0xff]  }
  0xd5   :  { %6673 = vmatpush3.bf16.msra.mxu1 %v7399_v15  ;;  %6646 = vmatprep.subr.bf16.mxu0 %v7400_v16  ;;  %v7446_v16 = vld [vmem:[%s9488_s1 + $0x770] sm:$0xff]  }
  0xd6   :  { %6674 = vmatprep.subr.bf16.mxu1 %v7401_v17 }
  0xd8   :  { %6647 = vmatpush3.bf16.msra.mxu0 %v7402_v18  ;;  %v7447_v18 = vld [vmem:[%s9488_s1 + $0x7f0] sm:$0xff]  }
  0xd9   :  { %6675 = vmatpush3.bf16.msra.mxu1 %v7403_v19  ;;  %6648 = vmatprep.subr.bf16.mxu0 %v7404_v20 }
  0xda   :  { %6676 = vmatprep.subr.bf16.mxu1 %v7405_v21  ;;  %v7448_v21 = vld [vmem:[%s9488_s1 + $0x730] sm:$0xff]  }
  0xdc   :  { %6649 = vmatpush3.bf16.msra.mxu0 %v7406_v22 }
  0xdd   :  { %6677 = vmatpush3.bf16.msra.mxu1 %v7407_v23  ;;  %6650 = vmatprep.subr.bf16.mxu0 %v7408_v24  ;;  %v7449_v23 = vld [vmem:[%s9488_s1 + $0x7b0] sm:$0xff]  }
  0xde   :  { %6678 = vmatprep.subr.bf16.mxu1 %v7409_v25 }
  0xe0   :  { %6651 = vmatpush3.bf16.msra.mxu0 %v7410_v26  ;;  %v7450_v26 = vld [vmem:[%s9488_s1 + $0x778] sm:$0xff]  }
  0xe1   :  { %6679 = vmatpush3.bf16.msra.mxu1 %v7411_v27  ;;  %6692 = vmatprep.subr.bf16.mxu0 %v7418_v32 }
  0xe2   :  { %6720 = vmatprep.subr.bf16.mxu1 %v7419_v34 }
  0xe3   :  { %4923 = vmatmul.mubr.bf16.vlgmr.msra.gmra.mrb[48].mxu0 %v7412_v28  ;;  %v7451_v28 = vld [vmem:[%s9488_s1 + $0x7f8] sm:$0xff]  }
  0xe4   :  { %4971 = vmatmul.mubr.bf16.vlgmr.msra.gmra.mrb[48].mxu1 %v7415_v30  ;;  %6693 = vmatpush3.bf16.msra.mxu0 %v7420_v36  ;;  %v7456_v36 = vld [vmem:[%s9489_s0 + $0x74] ss:$232 sps:$4 sm:$0xff]  }
  0xe5   :  { %6721 = vmatpush3.bf16.msra.mxu1 %v7421_v38  ;;  %6694 = vmatprep.subr.bf16.mxu0 %v7422_v41  ;;  %v7459_v38 = vld [vmem:[%s9489_s0 + $0x7c] ss:$232 sps:$4 sm:$0xff]  }
  0xe6   :  { %6722 = vmatprep.subr.bf16.mxu1 %v7423_v44  ;;  %4930 = vmatprep.mubr.bf16.mxu0 %v5803_v52  ;;  %v7461_v41 = vld [vmem:[%s9488_s1 + $0x8c0] sm:$0xff]  }
  0xe7   :  { %4978 = vmatprep.mubr.bf16.mxu1 %v5805_v58 }
  0xe8   :  { %6695 = vmatpush3.bf16.msra.mxu0 %v7424_v46 }
  0xe9   :  { %6723 = vmatpush3.bf16.msra.mxu1 %v7425_v48  ;;  %6696 = vmatprep.subr.bf16.mxu0 %v7428_v54  ;;  %v7464_v48 = vld [vmem:[%s9488_s1 + $0x848] sm:$0xff]  }
  0xea   :  { %6724 = vmatprep.subr.bf16.mxu1 %v7429_v56  ;;  %v7466_v54 = vld [vmem:[%s9488_s1 + $0x808] sm:$0xff]  }
  0xeb   :  { %4931 = vmatmul.mubr.bf16.gmra.mrb[52].mxu0 %v5802_v53  ;;  %v7467_v56 = vld [vmem:[%s9488_s1 + $0x888] sm:$0xff]  }
  0xec   :  { %6697 = vmatpush3.bf16.msra.mxu0 %v7431_v59  ;;  %4979 = vmatmul.mubr.bf16.gmra.mrb[52].mxu1 %v5804_v60 }
  0xed   :  { %6725 = vmatpush3.bf16.msra.mxu1 %v7432_v61  ;;  %6698 = vmatprep.subr.bf16.mxu0 %v7434_v62  ;;  %v5807_v61 = vcombine.high %v87_v57, %v87_v57  ;;  %v5806_v62 = vcombine.low %v87_v57, %v87_v57  ;;  %v7507_v57 = vld [vmem:[%s9488_s1 + $0x9c8] sm:$0xff]  }
  0xee   :  { %6726 = vmatprep.subr.bf16.mxu1 %v7435_v63  ;;  %5018 = vmatprep.mubr.bf16.mxu0 %v7456_v36  ;;  %v7470_v63 = vld [vmem:[%s9488_s1 + $0x850] sm:$0xff]  }
  0xef   :  { %5066 = vmatprep.mubr.bf16.mxu1 %v7459_v38  ;;  %v7491_v36 = vld [vmem:[%s9488_s1 + $0x8b0] sm:$0xff]   ;;  %v7493_v38 = vld [vmem:[%s9488_s1 + $0x8f8] sm:$0xff]  }
  0xf0   :  { %6699 = vmatpush3.bf16.msra.mxu0 %v7436_v0 }
  0xf1   :  { %6727 = vmatpush3.bf16.msra.mxu1 %v7437_v1  ;;  %6700 = vmatprep.subr.bf16.mxu0 %v7438_v2  ;;  %v7471_v1 = vld [vmem:[%s9488_s1 + $0x8d0] sm:$0xff]   ;;  %v88_v2 = vld [vmem:[%s9489_s0 + $0x248] sm:$0xff] }
  0xf2   :  { %6728 = vmatprep.subr.bf16.mxu1 %v7439_v3 }
  0xf4   :  { %6701 = vmatpush3.bf16.msra.mxu0 %v7440_v4  ;;  %v5809_v4 = vcombine.high %v88_v2, %v88_v2 }
  0xf5   :  { %6729 = vmatpush3.bf16.msra.mxu1 %v7441_v5  ;;  %6702 = vmatprep.subr.bf16.mxu0 %v7442_v8  ;;  %v7473_v5 = vld [vmem:[%s9488_s1 + $0x810] sm:$0xff]  }
  0xf6   :  { %v6316_v33 = vpop.f32.mrb[0].mxu0  ;;  %6730 = vmatprep.subr.bf16.mxu1 %v7443_v10  ;;  %v7474_v8 = vld [vmem:[%s9488_s1 + $0x890] sm:$0xff]  }
  0xf7   :  { %v6344_v35 = vpop.f32.mrb[0].mxu1  ;;  %v6317_v37 = vpop.f32.mrb[1].mxu0 }
  0xf8   :  { %v6318_v39 = vadd.f32 %v6317_v37, %v6316_v33  ;;  %v6345_v40 = vpop.f32.mrb[1].mxu1  ;;  %v6319_v43 = vpop.f32.mrb[2].mxu0  ;;  %6703 = vmatpush3.bf16.msra.mxu0 %v7444_v12  ;;  %v7453_v33 = vld [vmem:[%s9488_s1 + $0x7b8] sm:$0xff]  }
  0xf9   :  { %v6346_v42 = vadd.f32 %v6345_v40, %v6344_v35  ;;  %v6347_v45 = vpop.f32.mrb[2].mxu1  ;;  %v6320_v47 = vpop.f32.mrb[3].mxu0  ;;  %6731 = vmatpush3.bf16.msra.mxu1 %v7445_v14  ;;  %6704 = vmatprep.subr.bf16.mxu0 %v7446_v16  ;;  %v7454_v35 = vld [vmem:[%s9489_s0 + $0x70] ss:$232 sps:$4 sm:$0xff]  }
  0xfa   :  { %v6321_v50 = vadd.f32 %v6320_v47, %v6319_v43  ;;  %v6348_v51 = vpop.f32.mrb[3].mxu1  ;;  %v4349_v7 = vadd.f32 %v6318_v39, %v5719_v6  ;;  %6732 = vmatprep.subr.bf16.mxu1 %v7447_v18  ;;  %v7457_v37 = vld [vmem:[%s9489_s0 + $0x78] ss:$232 sps:$4 sm:$0xff]  }
  0xfb   :  { %v6349_v55 = vadd.f32 %v6348_v51, %v6347_v45  ;;  %v7460_v39 = vld [vmem:[%s9488_s1 + $0x840] sm:$0xff]   ;;  %v7465_v51 = vld [vmem:[%s9488_s1 + $0x8c8] sm:$0xff]   ;;  %v7477_v14 = vld [vmem:[%s9488_s1 + $0x8d8] sm:$0xff]  }
  0xfc   :  { %v4352_v9 = vadd.f32 %v6321_v50, %v5719_v6  ;;  %v4397_v11 = vadd.f32 %v6346_v42, %v4349_v7  ;;  %6705 = vmatpush3.bf16.msra.mxu0 %v7448_v21  ;;  %v7462_v43 = vld [vmem:[%s9488_s1 + $0x800] sm:$0xff]   ;;  %v7478_v16 = vld [vmem:[%s9488_s1 + $0x818] sm:$0xff]  }
  0xfd   :  { %6733 = vmatpush3.bf16.msra.mxu1 %v7449_v23  ;;  %6706 = vmatprep.subr.bf16.mxu0 %v7450_v26  ;;  %v7463_v45 = vld [vmem:[%s9488_s1 + $0x880] sm:$0xff]  }
  0xfe   :  { %v8627_v13 = vadd.f32 %v6349_v55, %v4352_v9  ;;  %v6322_v15 = vpop.f32.mrb[4].mxu0  ;;  %6734 = vmatprep.subr.bf16.mxu1 %v7451_v28  ;;  %v7483_v28 = vld [vmem:[%s9488_s1 + $0x8a0] sm:$0xff]  }
  0xff   :  { %v6323_v17 = vpop.f32.mrb[5].mxu0  ;;  %v6350_v22 = vpop.f32.mrb[4].mxu1 }
 0x100   :  { %v6324_v19 = vadd.f32 %v6323_v17, %v6322_v15  ;;  %v6325_v20 = vpop.f32.mrb[6].mxu0  ;;  %v6351_v27 = vpop.f32.mrb[5].mxu1  ;;  %6707 = vmatpush3.bf16.msra.mxu0 %v7452_v31  ;;  %v7486_v31 = vld [vmem:[%s9488_s1 + $0x828] sm:$0xff]  }
 0x101   :  { %v6326_v25 = vpop.f32.mrb[7].mxu0  ;;  %v6352_v29 = vadd.f32 %v6351_v27, %v6350_v22  ;;  %v6353_v30 = vpop.f32.mrb[6].mxu1  ;;  %6735 = vmatpush3.bf16.msra.mxu1 %v7453_v33  ;;  %6748 = vmatprep.subr.bf16.mxu0 %v7460_v39  ;;  %v7480_v22 = vld [vmem:[%s9488_s1 + $0x860] sm:$0xff]   ;;  %v7488_v33 = vld [vmem:[%s9488_s1 + $0x870] sm:$0xff]   ;;  %v7494_v39 = vld [vmem:[%s9488_s1 + $0x838] sm:$0xff]  }
 0x102   :  { %v4357_v24 = vadd.f32 %v6324_v19, %v5719_v6  ;;  %v6354_v32 = vpop.f32.mrb[7].mxu1  ;;  %6776 = vmatprep.subr.bf16.mxu1 %v7461_v41  ;;  %v5808_v6 = vcombine.low %v88_v2, %v88_v2  ;;  %v7479_v19 = vld [vmem:[%s9488_s1 + $0x898] sm:$0xff]   ;;  %v7482_v27 = vld [vmem:[%s9488_s1 + $0x820] sm:$0xff]   ;;  %v7485_v30 = vld [vmem:[%s9488_s1 + $0x8e8] sm:$0xff]  }
 0x103   :  { %5019 = vmatmul.mubr.bf16.vlgmr.msra.gmra.mrb[56].mxu0 %v7454_v35  ;;  %v7487_v32 = vld [vmem:[%s9488_s1 + $0x8a8] sm:$0xff]   ;;  %v7490_v35 = vld [vmem:[%s9488_s1 + $0x830] sm:$0xff]  }
 0x104   :  { %v8656_v34 = vadd.f32 %v6352_v29, %v4357_v24  ;;  %5067 = vmatmul.mubr.bf16.vlgmr.msra.gmra.mrb[56].mxu1 %v7457_v37  ;;  %6749 = vmatpush3.bf16.msra.mxu0 %v7462_v43  ;;  %v7481_v24 = vld [vmem:[%s9488_s1 + $0x8e0] sm:$0xff]   ;;  %v7484_v29 = vld [vmem:[%s9488_s1 + $0x868] sm:$0xff]   ;;  %v7492_v37 = vld [vmem:[%s9488_s1 + $0x878] sm:$0xff]  }
 0x105   :  { %6777 = vmatpush3.bf16.msra.mxu1 %v7463_v45  ;;  %6750 = vmatprep.subr.bf16.mxu0 %v7464_v48  ;;  %v7496_v41 = vld [vmem:[%s9489_s0 + $0x80] ss:$232 sps:$4 sm:$0xff]  }
 0x106   :  { %6778 = vmatprep.subr.bf16.mxu1 %v7465_v51  ;;  %5026 = vmatprep.mubr.bf16.mxu0 %v5807_v61  ;;  %v7499_v43 = vld [vmem:[%s9489_s0 + $0x88] ss:$232 sps:$4 sm:$0xff]   ;;  %v7502_v45 = vld [vmem:[%s9488_s1 + $0x940] sm:$0xff]  }
 0x107   :  { %5074 = vmatprep.mubr.bf16.mxu1 %v5809_v4  ;;  %v7505_v51 = vld [vmem:[%s9488_s1 + $0x980] sm:$0xff]   ;;  %v7508_v61 = vld [vmem:[%s9488_s1 + $0x908] sm:$0xff]  }
 0x108   :  { %6751 = vmatpush3.bf16.msra.mxu0 %v7466_v54  ;;  %v7506_v54 = vld [vmem:[%s9488_s1 + $0x948] sm:$0xff]  }
 0x109   :  { %6779 = vmatpush3.bf16.msra.mxu1 %v7467_v56  ;;  %6752 = vmatprep.subr.bf16.mxu0 %v7470_v63  ;;  %v7509_v63 = vld [vmem:[%s9488_s1 + $0x988] sm:$0xff]  }
 0x10a   :  { %6780 = vmatprep.subr.bf16.mxu1 %v7471_v1 }
 0x10b   :  { %5027 = vmatmul.mubr.bf16.gmra.mrb[60].mxu0 %v5806_v62 }
 0x10c   :  { %6753 = vmatpush3.bf16.msra.mxu0 %v7473_v5  ;;  %5075 = vmatmul.mubr.bf16.gmra.mrb[60].mxu1 %v5808_v6  ;;  %v7512_v5 = vld [vmem:[%s9488_s1 + $0x950] sm:$0xff]  }
 0x10d   :  { %6781 = vmatpush3.bf16.msra.mxu1 %v7474_v8 }
 0x10e   :  { %6782 = vmatprep.subr.bf16.mxu1 %v7477_v14 }
 0x111   :  { %6783 = vmatpush3.bf16.msra.mxu1 %v7479_v19  ;;  %v7518_v19 = vld [vmem:[%s9488_s1 + $0x958] sm:$0xff]  }
 0x112   :  { %6784 = vmatprep.subr.bf16.mxu1 %v7481_v24  ;;  %v7520_v24 = vld [vmem:[%s9488_s1 + $0x918] sm:$0xff]  }
 0x115   :  { %6785 = vmatpush3.bf16.msra.mxu1 %v7483_v28  ;;  %v7521_v28 = vld [vmem:[%s9488_s1 + $0x998] sm:$0xff]  }
 0x116   :  { %v6372_v40 = vpop.f32.mrb[8].mxu0  ;;  %6786 = vmatprep.subr.bf16.mxu1 %v7485_v30 }
 0x117   :  { %v6400_v42 = vpop.f32.mrb[8].mxu1  ;;  %v6373_v44 = vpop.f32.mrb[9].mxu0 }
 0x118   :  { %v6374_v46 = vadd.f32 %v6373_v44, %v6372_v40  ;;  %v6401_v47 = vpop.f32.mrb[9].mxu1  ;;  %v6375_v50 = vpop.f32.mrb[10].mxu0  ;;  %v7495_v40 = vld [vmem:[%s9488_s1 + $0x8b8] sm:$0xff]   ;;  %v7501_v44 = vld [vmem:[%s9489_s0 + $0x8c] ss:$232 sps:$4 sm:$0xff]  }
 0x119   :  { %v6402_v49 = vadd.f32 %v6401_v47, %v6400_v42  ;;  %v6403_v53 = vpop.f32.mrb[10].mxu1  ;;  %v6376_v55 = vpop.f32.mrb[11].mxu0  ;;  %6787 = vmatpush3.bf16.msra.mxu1 %v7487_v32  ;;  %v7498_v42 = vld [vmem:[%s9489_s0 + $0x84] ss:$232 sps:$4 sm:$0xff]   ;;  %5162 = vmatprep.mubr.bf16.mxu1 %v7501_v44  ;;  %v7535_v44 = vld [vmem:[%s9488_s1 + $0x9f8] sm:$0xff]  }
 0x11a   :  { %v4445_v52 = vadd.f32 %v6374_v46, %v4397_v11  ;;  %v6377_v59 = vadd.f32 %v6376_v55, %v6375_v50  ;;  %v6404_v60 = vpop.f32.mrb[11].mxu1  ;;  %v7476_v11 = vld [vmem:[%s9488_s1 + $0x858] sm:$0xff]   ;;  %5114 = vmatprep.mubr.bf16.mxu0 %v7498_v42  ;;  %v7503_v47 = vld [vmem:[%s9488_s1 + $0x9c0] sm:$0xff]   ;;  %v7533_v42 = vld [vmem:[%s9488_s1 + $0x9b0] sm:$0xff]  }
 0x11b   :  { %v6405_v0 = vadd.f32 %v6404_v60, %v6403_v53  ;;  %6754 = vmatprep.subr.bf16.mxu0 %v7476_v11  ;;  %v7523_v32 = vld [vmem:[%s9488_s1 + $0x9e0] sm:$0xff]  }
 0x11c   :  { %v8697_v58 = vadd.f32 %v6402_v49, %v4445_v52  ;;  %v4448_v3 = vadd.f32 %v6377_v59, %v8627_v13  ;;  %6755 = vmatpush3.bf16.msra.mxu0 %v7478_v16  ;;  %v7504_v49 = vld [vmem:[%s9488_s1 + $0x900] sm:$0xff]  }
 0x11d   :  { %6756 = vmatprep.subr.bf16.mxu0 %v7480_v22 }
 0x11e   :  { %v6378_v7 = vpop.f32.mrb[12].mxu0  ;;  %v8715_v9 = vadd.f32 %v6405_v0, %v4448_v3  ;;  %v89_v0 = vld [vmem:[%s9489_s0 + $0x250] sm:$0xff] }
 0x11f   :  { %v6379_v10 = vpop.f32.mrb[13].mxu0  ;;  %v6406_v15 = vpop.f32.mrb[12].mxu1  ;;  %v5811_v3 = vcombine.high %v89_v0, %v89_v0  ;;  %v5810_v4 = vcombine.low %v89_v0, %v89_v0  ;;  %v7549_v0 = vld [vmem:[%s9488_s1 + $0xac8] sm:$0xff]  }
 0x120   :  { %v6380_v12 = vadd.f32 %v6379_v10, %v6378_v7  ;;  %v6381_v13 = vpop.f32.mrb[14].mxu0  ;;  %v6407_v18 = vpop.f32.mrb[13].mxu1  ;;  %6757 = vmatpush3.bf16.msra.mxu0 %v7482_v27  ;;  %v7513_v7 = vld [vmem:[%s9488_s1 + $0x9d0] sm:$0xff]   ;;  %v90_v10 = vld [vmem:[%s9489_s0 + $0x258] sm:$0xff] }
 0x121   :  { %v6408_v20 = vadd.f32 %v6407_v18, %v6406_v15  ;;  %v6382_v21 = vpop.f32.mrb[15].mxu0  ;;  %v6409_v23 = vpop.f32.mrb[14].mxu1  ;;  %6758 = vmatprep.subr.bf16.mxu0 %v7484_v29  ;;  %v7515_v13 = vld [vmem:[%s9488_s1 + $0x910] sm:$0xff]   ;;  %v5812_v14 = vcombine.low %v90_v10, %v90_v10 }
 0x122   :  { %v4453_v17 = vadd.f32 %v6380_v12, %v8656_v34  ;;  %v6410_v26 = vpop.f32.mrb[15].mxu1  ;;  %v7489_v34 = vld [vmem:[%s9488_s1 + $0x8f0] sm:$0xff]   ;;  %v5813_v12 = vcombine.high %v90_v10, %v90_v10  ;;  %v7519_v21 = vld [vmem:[%s9488_s1 + $0x9d8] sm:$0xff]  }
 0x123   :  { %6788 = vmatprep.subr.bf16.mxu1 %v7489_v34  ;;  %v7525_v34 = vld [vmem:[%s9488_s1 + $0x9a0] sm:$0xff]  }
 0x124   :  { %v8736_v25 = vadd.f32 %v6408_v20, %v4453_v17  ;;  %6759 = vmatpush3.bf16.msra.mxu0 %v7486_v31  ;;  %6789 = vmatpush3.bf16.msra.mxu1 %v7491_v36  ;;  %v7527_v36 = vld [vmem:[%s9488_s1 + $0x9e8] sm:$0xff]  }
 0x125   :  { %6760 = vmatprep.subr.bf16.mxu0 %v7488_v33  ;;  %6790 = vmatprep.subr.bf16.mxu1 %v7493_v38  ;;  %v7524_v33 = vld [vmem:[%s9488_s1 + $0x920] sm:$0xff]   ;;  %v7529_v38 = vld [vmem:[%s9488_s1 + $0x9a8] sm:$0xff]  }
 0x128   :  { %6761 = vmatpush3.bf16.msra.mxu0 %v7490_v35  ;;  %6791 = vmatpush3.bf16.msra.mxu1 %v7495_v40  ;;  %v7526_v35 = vld [vmem:[%s9488_s1 + $0x968] sm:$0xff]   ;;  %v7531_v40 = vld [vmem:[%s9488_s1 + $0x9f0] sm:$0xff]  }
 0x129   :  { %6762 = vmatprep.subr.bf16.mxu0 %v7492_v37  ;;  %6832 = vmatprep.subr.bf16.mxu1 %v7503_v47  ;;  %v7528_v37 = vld [vmem:[%s9488_s1 + $0x928] sm:$0xff]   ;;  %v7538_v47 = vld [vmem:[%s9489_s0 + $0x90] ss:$232 sps:$4 sm:$0xff]  }
 0x12b   :  { %5163 = vmatmul.mubr.bf16.vlgmr.msra.gmra.mrb[64].mxu1 %v7499_v43  ;;  %v7534_v43 = vld [vmem:[%s9488_s1 + $0x978] sm:$0xff]  }
 0x12c   :  { %6763 = vmatpush3.bf16.msra.mxu0 %v7494_v39  ;;  %6833 = vmatpush3.bf16.msra.mxu1 %v7505_v51  ;;  %v7530_v39 = vld [vmem:[%s9488_s1 + $0x970] sm:$0xff]   ;;  %v7544_v51 = vld [vmem:[%s9488_s1 + $0xa40] sm:$0xff]  }
 0x12d   :  { %6804 = vmatprep.subr.bf16.mxu0 %v7502_v45  ;;  %6834 = vmatprep.subr.bf16.mxu1 %v7507_v57  ;;  %v7536_v45 = vld [vmem:[%s9488_s1 + $0x938] sm:$0xff]   ;;  %v7547_v57 = vld [vmem:[%s9488_s1 + $0xa80] sm:$0xff]  }
 0x12e   :  { %5170 = vmatprep.mubr.bf16.mxu1 %v5813_v12 }
 0x12f   :  { %5115 = vmatmul.mubr.bf16.vlgmr.msra.gmra.mrb[64].mxu0 %v7496_v41  ;;  %v7532_v41 = vld [vmem:[%s9488_s1 + $0x930] sm:$0xff]  }
 0x130   :  { %6805 = vmatpush3.bf16.msra.mxu0 %v7504_v49  ;;  %6835 = vmatpush3.bf16.msra.mxu1 %v7509_v63  ;;  %v7541_v49 = vld [vmem:[%s9489_s0 + $0x98] ss:$232 sps:$4 sm:$0xff]  }
 0x131   :  { %6806 = vmatprep.subr.bf16.mxu0 %v7506_v54  ;;  %5122 = vmatprep.mubr.bf16.mxu0 %v5811_v3  ;;  %v7550_v3 = vld [vmem:[%s9488_s1 + $0xa08] sm:$0xff]  }
 0x132   :  { %6836 = vmatprep.subr.bf16.mxu1 %v7513_v7 }
 0x133   :  { %5171 = vmatmul.mubr.bf16.gmra.mrb[68].mxu1 %v5812_v14 }
 0x134   :  { %6807 = vmatpush3.bf16.msra.mxu0 %v7508_v61  ;;  %v7548_v61 = vld [vmem:[%s9488_s1 + $0xa48] sm:$0xff]  }
 0x135   :  { %6808 = vmatprep.subr.bf16.mxu0 %v7512_v5  ;;  %v7551_v5 = vld [vmem:[%s9488_s1 + $0xa88] sm:$0xff]  }
 0x136   :  { %v6428_v46 = vpop.f32.mrb[16].mxu0 }
 0x137   :  { %v6456_v48 = vpop.f32.mrb[16].mxu1  ;;  %v6429_v50 = vpop.f32.mrb[17].mxu0  ;;  %5123 = vmatmul.mubr.bf16.gmra.mrb[68].mxu0 %v5810_v4 }
 0x138   :  { %v6430_v52 = vadd.f32 %v6429_v50, %v6428_v46  ;;  %v6457_v53 = vpop.f32.mrb[17].mxu1  ;;  %v6431_v56 = vpop.f32.mrb[18].mxu0  ;;  %6809 = vmatpush3.bf16.msra.mxu0 %v7515_v13  ;;  %v7537_v46 = vld [vmem:[%s9488_s1 + $0x9b8] sm:$0xff]   ;;  %v7554_v13 = vld [vmem:[%s9488_s1 + $0xa50] sm:$0xff]  }
 0x139   :  { %v6458_v55 = vadd.f32 %v6457_v53, %v6456_v48  ;;  %v6459_v60 = vpop.f32.mrb[18].mxu1  ;;  %v6432_v62 = vpop.f32.mrb[19].mxu0  ;;  %6810 = vmatprep.subr.bf16.mxu0 %v7518_v19  ;;  %v7540_v48 = vld [vmem:[%s9489_s0 + $0x94] ss:$232 sps:$4 sm:$0xff]   ;;  %v7545_v53 = vld [vmem:[%s9488_s1 + $0xac0] sm:$0xff]  }
 0x13a   :  { %v4541_v59 = vadd.f32 %v6430_v52, %v8697_v58  ;;  %v6433_v2 = vadd.f32 %v6432_v62, %v6431_v56  ;;  %v6460_v58 = vpop.f32.mrb[19].mxu1  ;;  %v7543_v50 = vld [vmem:[%s9489_s0 + $0x9c] ss:$232 sps:$4 sm:$0xff]   ;;  %5210 = vmatprep.mubr.bf16.mxu0 %v7540_v48  ;;  %v7557_v19 = vld [vmem:[%s9488_s1 + $0xa10] sm:$0xff]  }
 0x13b   :  { %v6461_v6 = vadd.f32 %v6460_v58, %v6459_v60  ;;  %5258 = vmatprep.mubr.bf16.mxu1 %v7543_v50  ;;  %v7575_v48 = vld [vmem:[%s9488_s1 + $0xab0] sm:$0xff]   ;;  %v7577_v50 = vld [vmem:[%s9488_s1 + $0xaf8] sm:$0xff]  }
 0x13c   :  { %v8820_v1 = vadd.f32 %v6458_v55, %v4541_v59  ;;  %v4544_v8 = vadd.f32 %v6433_v2, %v8715_v9  ;;  %v7516_v9 = vld [vmem:[%s9488_s1 + $0x990] sm:$0xff]   ;;  %6811 = vmatpush3.bf16.msra.mxu0 %v7520_v24  ;;  %v7546_v55 = vld [vmem:[%s9488_s1 + $0xa00] sm:$0xff]  }
 0x13d   :  { %6837 = vmatpush3.bf16.msra.mxu1 %v7516_v9  ;;  %v92_v9 = vld [vmem:[%s9489_s0 + $0x268] sm:$0xff] }
 0x13e   :  { %v6434_v11 = vpop.f32.mrb[20].mxu0  ;;  %v8835_v15 = vadd.f32 %v6461_v6, %v4544_v8  ;;  %6838 = vmatprep.subr.bf16.mxu1 %v7519_v21 }
 0x13f   :  { %v6435_v16 = vpop.f32.mrb[21].mxu0  ;;  %v6462_v20 = vpop.f32.mrb[20].mxu1 }
 0x140   :  { %v6436_v17 = vadd.f32 %v6435_v16, %v6434_v11  ;;  %v6437_v18 = vpop.f32.mrb[22].mxu0  ;;  %v6463_v23 = vpop.f32.mrb[21].mxu1  ;;  %v7555_v16 = vld [vmem:[%s9488_s1 + $0xad0] sm:$0xff]  }
 0x141   :  { %v6464_v26 = vadd.f32 %v6463_v23, %v6462_v20  ;;  %v6438_v27 = vpop.f32.mrb[23].mxu0  ;;  %v6465_v29 = vpop.f32.mrb[22].mxu1  ;;  %6839 = vmatpush3.bf16.msra.mxu1 %v7521_v28  ;;  %v5817_v18 = vcombine.high %v92_v9, %v92_v9  ;;  %v5816_v20 = vcombine.low %v92_v9, %v92_v9  ;;  %v7561_v28 = vld [vmem:[%s9488_s1 + $0xad8] sm:$0xff]  }
 0x142   :  { %v4549_v22 = vadd.f32 %v6436_v17, %v8736_v25  ;;  %v7522_v25 = vld [vmem:[%s9488_s1 + $0x960] sm:$0xff]   ;;  %v6466_v31 = vpop.f32.mrb[23].mxu1  ;;  %6840 = vmatprep.subr.bf16.mxu1 %v7523_v32 }
 0x143   :  { %6812 = vmatprep.subr.bf16.mxu0 %v7522_v25  ;;  %v7562_v31 = vld [vmem:[%s9488_s1 + $0xa18] sm:$0xff]  }
 0x144   :  { %v8856_v30 = vadd.f32 %v6464_v26, %v4549_v22  ;;  %6813 = vmatpush3.bf16.msra.mxu0 %v7524_v33  ;;  %v7558_v22 = vld [vmem:[%s9488_s1 + $0xa90] sm:$0xff]   ;;  %v7560_v26 = vld [vmem:[%s9488_s1 + $0xa58] sm:$0xff]  }
 0x145   :  { %6841 = vmatpush3.bf16.msra.mxu1 %v7525_v34  ;;  %6814 = vmatprep.subr.bf16.mxu0 %v7526_v35  ;;  %v7563_v33 = vld [vmem:[%s9488_s1 + $0xa98] sm:$0xff]  }
 0x146   :  { %6842 = vmatprep.subr.bf16.mxu1 %v7527_v36 }
 0x148   :  { %6815 = vmatpush3.bf16.msra.mxu0 %v7528_v37  ;;  %v7565_v37 = vld [vmem:[%s9488_s1 + $0xae0] sm:$0xff]  }
 0x149   :  { %6843 = vmatpush3.bf16.msra.mxu1 %v7529_v38  ;;  %6816 = vmatprep.subr.bf16.mxu0 %v7530_v39  ;;  %v7566_v39 = vld [vmem:[%s9488_s1 + $0xa20] sm:$0xff]  }
 0x14a   :  { %6844 = vmatprep.subr.bf16.mxu1 %v7531_v40  ;;  %v7567_v40 = vld [vmem:[%s9488_s1 + $0xaa0] sm:$0xff]  }
 0x14c   :  { %6817 = vmatpush3.bf16.msra.mxu0 %v7532_v41  ;;  %v7568_v41 = vld [vmem:[%s9488_s1 + $0xa68] sm:$0xff]  }
 0x14d   :  { %6845 = vmatpush3.bf16.msra.mxu1 %v7533_v42  ;;  %6818 = vmatprep.subr.bf16.mxu0 %v7534_v43  ;;  %v7569_v42 = vld [vmem:[%s9488_s1 + $0xae8] sm:$0xff]  }
 0x14e   :  { %6846 = vmatprep.subr.bf16.mxu1 %v7535_v44  ;;  %v7570_v43 = vld [vmem:[%s9488_s1 + $0xa28] sm:$0xff]  }
 0x14f   :  { %v7571_v44 = vld [vmem:[%s9488_s1 + $0xaa8] sm:$0xff]  }
 0x150   :  { %6819 = vmatpush3.bf16.msra.mxu0 %v7536_v45  ;;  %v7572_v45 = vld [vmem:[%s9488_s1 + $0xa70] sm:$0xff]  }
 0x151   :  { %6847 = vmatpush3.bf16.msra.mxu1 %v7537_v46  ;;  %6860 = vmatprep.subr.bf16.mxu0 %v7544_v51  ;;  %v7573_v46 = vld [vmem:[%s9488_s1 + $0xaf0] sm:$0xff]   ;;  %v7578_v51 = vld [vmem:[%s9488_s1 + $0xa38] sm:$0xff]  }
 0x152   :  { %6888 = vmatprep.subr.bf16.mxu1 %v7545_v53  ;;  %v7580_v53 = vld [vmem:[%s9489_s0 + $0xa0] ss:$232 sps:$4 sm:$0xff]  }
 0x153   :  { %5211 = vmatmul.mubr.bf16.vlgmr.msra.gmra.mrb[72].mxu0 %v7538_v47  ;;  %v7574_v47 = vld [vmem:[%s9488_s1 + $0xa30] sm:$0xff]  }
 0x154   :  { %5259 = vmatmul.mubr.bf16.vlgmr.msra.gmra.mrb[72].mxu1 %v7541_v49  ;;  %6861 = vmatpush3.bf16.msra.mxu0 %v7546_v55  ;;  %v7576_v49 = vld [vmem:[%s9488_s1 + $0xa78] sm:$0xff]   ;;  %v7583_v55 = vld [vmem:[%s9489_s0 + $0xa8] ss:$232 sps:$4 sm:$0xff]  }
 0x155   :  { %6889 = vmatpush3.bf16.msra.mxu1 %v7547_v57  ;;  %6862 = vmatprep.subr.bf16.mxu0 %v7548_v61  ;;  %v7586_v57 = vld [vmem:[%s9488_s1 + $0xb40] sm:$0xff]  }
 0x156   :  { %v6484_v52 = vpop.f32.mrb[24].mxu0  ;;  %6890 = vmatprep.subr.bf16.mxu1 %v7549_v0  ;;  %5266 = vmatprep.mubr.bf16.mxu1 %v5817_v18  ;;  %v7589_v0 = vld [vmem:[%s9488_s1 + $0xb80] sm:$0xff]   ;;  %v7596_v18 = vld [vmem:[%s9488_s1 + $0xb50] sm:$0xff]  }
 0x157   :  { %v6512_v54 = vpop.f32.mrb[24].mxu1  ;;  %v6485_v56 = vpop.f32.mrb[25].mxu0 }
 0x158   :  { %v6486_v59 = vadd.f32 %v6485_v56, %v6484_v52  ;;  %v6513_v60 = vpop.f32.mrb[25].mxu1  ;;  %v6487_v63 = vpop.f32.mrb[26].mxu0  ;;  %6863 = vmatpush3.bf16.msra.mxu0 %v7550_v3  ;;  %v7579_v52 = vld [vmem:[%s9488_s1 + $0xab8] sm:$0xff]   ;;  %v7585_v56 = vld [vmem:[%s9489_s0 + $0xac] ss:$232 sps:$4 sm:$0xff]  }
 0x159   :  { %v6514_v62 = vadd.f32 %v6513_v60, %v6512_v54  ;;  %v6515_v58 = vpop.f32.mrb[26].mxu1  ;;  %v6488_v4 = vpop.f32.mrb[27].mxu0  ;;  %6891 = vmatpush3.bf16.msra.mxu1 %v7551_v5  ;;  %6864 = vmatprep.subr.bf16.mxu0 %v7554_v13  ;;  %v7582_v54 = vld [vmem:[%s9489_s0 + $0xa4] ss:$232 sps:$4 sm:$0xff]   ;;  %v93_v13 = vld [vmem:[%s9489_s0 + $0x270] sm:$0xff] }
 0x15a   :  { %v4637_v2 = vadd.f32 %v6486_v59, %v8820_v1  ;;  %v6489_v7 = vadd.f32 %v6488_v4, %v6487_v63  ;;  %v6516_v8 = vpop.f32.mrb[27].mxu1  ;;  %v91_v1 = vld [vmem:[%s9489_s0 + $0x260] sm:$0xff]  ;;  %6892 = vmatprep.subr.bf16.mxu1 %v7555_v16  ;;  %v7590_v3 = vld [vmem:[%s9488_s1 + $0xb48] sm:$0xff]   ;;  %v5819_v9 = vcombine.high %v93_v13, %v93_v13 }
 0x15b   :  { %v6517_v10 = vadd.f32 %v6516_v8, %v6515_v58  ;;  %v5815_v11 = vcombine.high %v91_v1, %v91_v1  ;;  %v5814_v12 = vcombine.low %v91_v1, %v91_v1  ;;  %v7587_v60 = vld [vmem:[%s9488_s1 + $0xbc0] sm:$0xff]  }
 0x15c   :  { %v8940_v6 = vadd.f32 %v6514_v62, %v4637_v2  ;;  %v4640_v14 = vadd.f32 %v6489_v7, %v8835_v15  ;;  %6865 = vmatpush3.bf16.msra.mxu0 %v7557_v19  ;;  %5267 = vmatmul.mubr.bf16.gmra.mrb[76].mxu1 %v5816_v20  ;;  %v7588_v62 = vld [vmem:[%s9488_s1 + $0xb00] sm:$0xff]   ;;  %v7591_v7 = vld [vmem:[%s9488_s1 + $0xbc8] sm:$0xff]   ;;  %v7597_v20 = vld [vmem:[%s9488_s1 + $0xbd0] sm:$0xff]  }
 0x15d   :  { %5218 = vmatprep.mubr.bf16.mxu0 %v5815_v11  ;;  %6893 = vmatpush3.bf16.msra.mxu1 %v7558_v22 }
 0x15e   :  { %v6490_v17 = vpop.f32.mrb[28].mxu0  ;;  %v8958_v21 = vadd.f32 %v6517_v10, %v4640_v14  ;;  %5219 = vmatmul.mubr.bf16.gmra.mrb[76].mxu0 %v5814_v12  ;;  %6866 = vmatprep.subr.bf16.mxu0 %v7560_v26  ;;  %v7592_v10 = vld [vmem:[%s9488_s1 + $0xb08] sm:$0xff]  }
 0x15f   :  { %v6491_v15 = vpop.f32.mrb[29].mxu0  ;;  %v6518_v25 = vpop.f32.mrb[28].mxu1  ;;  %6894 = vmatprep.subr.bf16.mxu1 %v7561_v28  ;;  %5306 = vmatprep.mubr.bf16.mxu0 %v7582_v54  ;;  %v7593_v12 = vld [vmem:[%s9488_s1 + $0xb88] sm:$0xff]   ;;  %v7600_v28 = vld [vmem:[%s9488_s1 + $0xb90] sm:$0xff]  }
 0x160   :  { %v6492_v23 = vadd.f32 %v6491_v15, %v6490_v17  ;;  %v6493_v24 = vpop.f32.mrb[30].mxu0  ;;  %v6519_v32 = vpop.f32.mrb[29].mxu1  ;;  %6867 = vmatpush3.bf16.msra.mxu0 %v7562_v31  ;;  %5354 = vmatprep.mubr.bf16.mxu1 %v7585_v56  ;;  %v5818_v17 = vcombine.low %v93_v13, %v93_v13  ;;  %v94_v15 = vld [vmem:[%s9489_s0 + $0x278] sm:$0xff]  ;;  %v7617_v54 = vld [vmem:[%s9488_s1 + $0xbb0] sm:$0xff]   ;;  %v7633_v13 = vld [vmem:[%s9488_s1 + $0xcc8] sm:$0xff]  }
 0x161   :  { %v6494_v27 = vpop.f32.mrb[31].mxu0  ;;  %v6520_v34 = vadd.f32 %v6519_v32, %v6518_v25  ;;  %v6521_v35 = vpop.f32.mrb[30].mxu1  ;;  %6895 = vmatpush3.bf16.msra.mxu1 %v7563_v33  ;;  %v7599_v24 = vld [vmem:[%s9488_s1 + $0xb10] sm:$0xff]   ;;  %v5820_v26 = vcombine.low %v94_v15, %v94_v15  ;;  %v7603_v33 = vld [vmem:[%s9488_s1 + $0xbd8] sm:$0xff]  }
 0x162   :  { %v4645_v29 = vadd.f32 %v6492_v23, %v8856_v30  ;;  %v7564_v30 = vld [vmem:[%s9488_s1 + $0xa60] sm:$0xff]   ;;  %v6522_v36 = vpop.f32.mrb[31].mxu1  ;;  %6896 = vmatprep.subr.bf16.mxu1 %v7565_v37  ;;  %v5821_v23 = vcombine.high %v94_v15, %v94_v15  ;;  %v7604_v35 = vld [vmem:[%s9488_s1 + $0xb18] sm:$0xff]  }
 0x163   :  { %6868 = vmatprep.subr.bf16.mxu0 %v7564_v30  ;;  %v7605_v37 = vld [vmem:[%s9488_s1 + $0xb98] sm:$0xff]  }
 0x164   :  { %v8982_v38 = vadd.f32 %v6520_v34, %v4645_v29  ;;  %6869 = vmatpush3.bf16.msra.mxu0 %v7566_v39  ;;  %v7619_v56 = vld [vmem:[%s9488_s1 + $0xbf8] sm:$0xff]  }
 0x165   :  { %6897 = vmatpush3.bf16.msra.mxu1 %v7567_v40  ;;  %6870 = vmatprep.subr.bf16.mxu0 %v7568_v41  ;;  %v7606_v41 = vld [vmem:[%s9488_s1 + $0xb60] sm:$0xff]  }
 0x166   :  { %6898 = vmatprep.subr.bf16.mxu1 %v7569_v42 }
 0x168   :  { %6871 = vmatpush3.bf16.msra.mxu0 %v7570_v43  ;;  %v7607_v43 = vld [vmem:[%s9488_s1 + $0xbe0] sm:$0xff]  }
 0x169   :  { %6899 = vmatpush3.bf16.msra.mxu1 %v7571_v44  ;;  %6872 = vmatprep.subr.bf16.mxu0 %v7572_v45  ;;  %v7608_v45 = vld [vmem:[%s9488_s1 + $0xb20] sm:$0xff]  }
 0x16a   :  { %6900 = vmatprep.subr.bf16.mxu1 %v7573_v46  ;;  %v7609_v46 = vld [vmem:[%s9488_s1 + $0xba0] sm:$0xff]  }
 0x16c   :  { %6873 = vmatpush3.bf16.msra.mxu0 %v7574_v47  ;;  %v7610_v47 = vld [vmem:[%s9488_s1 + $0xb68] sm:$0xff]  }
 0x16d   :  { %6901 = vmatpush3.bf16.msra.mxu1 %v7575_v48  ;;  %6874 = vmatprep.subr.bf16.mxu0 %v7576_v49  ;;  %v7611_v48 = vld [vmem:[%s9488_s1 + $0xbe8] sm:$0xff]  }
 0x16e   :  { %6902 = vmatprep.subr.bf16.mxu1 %v7577_v50  ;;  %v7612_v49 = vld [vmem:[%s9488_s1 + $0xb28] sm:$0xff]  }
 0x16f   :  { %v7613_v50 = vld [vmem:[%s9488_s1 + $0xba8] sm:$0xff]  }
 0x170   :  { %6875 = vmatpush3.bf16.msra.mxu0 %v7578_v51  ;;  %v7614_v51 = vld [vmem:[%s9488_s1 + $0xb70] sm:$0xff]  }
 0x171   :  { %6903 = vmatpush3.bf16.msra.mxu1 %v7579_v52  ;;  %6916 = vmatprep.subr.bf16.mxu0 %v7586_v57  ;;  %v7615_v52 = vld [vmem:[%s9488_s1 + $0xbf0] sm:$0xff]   ;;  %v7620_v57 = vld [vmem:[%s9488_s1 + $0xb38] sm:$0xff]  }
 0x172   :  { %6944 = vmatprep.subr.bf16.mxu1 %v7587_v60  ;;  %v7622_v60 = vld [vmem:[%s9489_s0 + $0xb0] ss:$232 sps:$4 sm:$0xff]  }
 0x173   :  { %5307 = vmatmul.mubr.bf16.vlgmr.msra.gmra.mrb[80].mxu0 %v7580_v53  ;;  %v7616_v53 = vld [vmem:[%s9488_s1 + $0xb30] sm:$0xff]  }
 0x174   :  { %5355 = vmatmul.mubr.bf16.vlgmr.msra.gmra.mrb[80].mxu1 %v7583_v55  ;;  %6917 = vmatpush3.bf16.msra.mxu0 %v7588_v62  ;;  %v7618_v55 = vld [vmem:[%s9488_s1 + $0xb78] sm:$0xff]  }
 0x175   :  { %6945 = vmatpush3.bf16.msra.mxu1 %v7589_v0  ;;  %6918 = vmatprep.subr.bf16.mxu0 %v7590_v3  ;;  %v7625_v62 = vld [vmem:[%s9489_s0 + $0xb8] ss:$232 sps:$4 sm:$0xff]  }
 0x176   :  { %v6540_v59 = vpop.f32.mrb[32].mxu0  ;;  %6946 = vmatprep.subr.bf16.mxu1 %v7591_v7  ;;  %5314 = vmatprep.mubr.bf16.mxu0 %v5819_v9  ;;  %v7628_v0 = vld [vmem:[%s9488_s1 + $0xc40] sm:$0xff]   ;;  %v7634_v9 = vld [vmem:[%s9488_s1 + $0xc08] sm:$0xff]  }
 0x177   :  { %v6568_v61 = vpop.f32.mrb[32].mxu1  ;;  %v6541_v63 = vpop.f32.mrb[33].mxu0  ;;  %5362 = vmatprep.mubr.bf16.mxu1 %v5821_v23  ;;  %v7631_v7 = vld [vmem:[%s9488_s1 + $0xc80] sm:$0xff]  }
 0x178   :  { %v6542_v2 = vadd.f32 %v6541_v63, %v6540_v59  ;;  %v6569_v58 = vpop.f32.mrb[33].mxu1  ;;  %v6543_v5 = vpop.f32.mrb[34].mxu0  ;;  %6919 = vmatpush3.bf16.msra.mxu0 %v7592_v10  ;;  %v7621_v59 = vld [vmem:[%s9488_s1 + $0xbb8] sm:$0xff]   ;;  %v7632_v10 = vld [vmem:[%s9488_s1 + $0xc48] sm:$0xff]  }
 0x179   :  { %v6570_v4 = vadd.f32 %v6569_v58, %v6568_v61  ;;  %v6571_v1 = vpop.f32.mrb[34].mxu1  ;;  %v6544_v11 = vpop.f32.mrb[35].mxu0  ;;  %6947 = vmatpush3.bf16.msra.mxu1 %v7593_v12  ;;  %6920 = vmatprep.subr.bf16.mxu0 %v7596_v18  ;;  %v7624_v61 = vld [vmem:[%s9489_s0 + $0xb4] ss:$232 sps:$4 sm:$0xff]   ;;  %v7629_v58 = vld [vmem:[%s9488_s1 + $0xcc0] sm:$0xff]   ;;  %v7635_v18 = vld [vmem:[%s9488_s1 + $0xc88] sm:$0xff]  }
 0x17a   :  { %v4733_v8 = vadd.f32 %v6542_v2, %v8940_v6  ;;  %v6545_v16 = vadd.f32 %v6544_v11, %v6543_v5  ;;  %v6572_v6 = vpop.f32.mrb[35].mxu1  ;;  %6948 = vmatprep.subr.bf16.mxu1 %v7597_v20  ;;  %v7627_v63 = vld [vmem:[%s9489_s0 + $0xbc] ss:$232 sps:$4 sm:$0xff]  }
 0x17b   :  { %v6573_v19 = vadd.f32 %v6572_v6, %v6571_v1  ;;  %5315 = vmatmul.mubr.bf16.gmra.mrb[84].mxu0 %v5818_v17 }
 0x17c   :  { %v9066_v14 = vadd.f32 %v6570_v4, %v4733_v8  ;;  %v4736_v22 = vadd.f32 %v6545_v16, %v8958_v21  ;;  %6921 = vmatpush3.bf16.msra.mxu0 %v7599_v24  ;;  %v7602_v21 = vld [vmem:[%s9488_s1 + $0xb58] sm:$0xff]   ;;  %5363 = vmatmul.mubr.bf16.gmra.mrb[84].mxu1 %v5820_v26  ;;  %v7630_v4 = vld [vmem:[%s9488_s1 + $0xc00] sm:$0xff]   ;;  %v7638_v24 = vld [vmem:[%s9488_s1 + $0xc50] sm:$0xff]  }
 0x17d   :  { %6949 = vmatpush3.bf16.msra.mxu1 %v7600_v28  ;;  %6922 = vmatprep.subr.bf16.mxu0 %v7602_v21 }
 0x17e   :  { %v6546_v27 = vpop.f32.mrb[36].mxu0  ;;  %v9084_v29 = vadd.f32 %v6573_v19, %v4736_v22  ;;  %6950 = vmatprep.subr.bf16.mxu1 %v7603_v33  ;;  %5402 = vmatprep.mubr.bf16.mxu0 %v7624_v61  ;;  %v95_v19 = vld [vmem:[%s9489_s0 + $0x280] sm:$0xff]  ;;  %v7659_v61 = vld [vmem:[%s9488_s1 + $0xcb0] sm:$0xff]  }
 0x17f   :  { %v6547_v25 = vpop.f32.mrb[37].mxu0  ;;  %v6574_v34 = vpop.f32.mrb[36].mxu1  ;;  %5450 = vmatprep.mubr.bf16.mxu1 %v7627_v63  ;;  %v5823_v22 = vcombine.high %v95_v19, %v95_v19  ;;  %v5822_v23 = vcombine.low %v95_v19, %v95_v19  ;;  %v7661_v63 = vld [vmem:[%s9488_s1 + $0xcf8] sm:$0xff]   ;;  %v7675_v19 = vld [vmem:[%s9488_s1 + $0xdc8] sm:$0xff]  }
 0x180   :  { %v6548_v31 = vadd.f32 %v6547_v25, %v6546_v27  ;;  %v6549_v32 = vpop.f32.mrb[38].mxu0  ;;  %v6575_v36 = vpop.f32.mrb[37].mxu1  ;;  %6923 = vmatpush3.bf16.msra.mxu0 %v7604_v35  ;;  %v7639_v27 = vld [vmem:[%s9488_s1 + $0xcd0] sm:$0xff]   ;;  %v96_v25 = vld [vmem:[%s9489_s0 + $0x288] sm:$0xff] }
 0x181   :  { %v6576_v39 = vadd.f32 %v6575_v36, %v6574_v34  ;;  %v6550_v40 = vpop.f32.mrb[39].mxu0  ;;  %v6577_v42 = vpop.f32.mrb[38].mxu1  ;;  %6951 = vmatpush3.bf16.msra.mxu1 %v7605_v37  ;;  %6924 = vmatprep.subr.bf16.mxu0 %v7606_v41  ;;  %v7641_v32 = vld [vmem:[%s9488_s1 + $0xc10] sm:$0xff]   ;;  %v5824_v33 = vcombine.low %v96_v25, %v96_v25  ;;  %v7644_v37 = vld [vmem:[%s9488_s1 + $0xc58] sm:$0xff]  }
 0x182   :  { %v4741_v30 = vadd.f32 %v6548_v31, %v8982_v38  ;;  %v6578_v44 = vpop.f32.mrb[39].mxu1  ;;  %6952 = vmatprep.subr.bf16.mxu1 %v7607_v43  ;;  %v5825_v31 = vcombine.high %v96_v25, %v96_v25  ;;  %v7645_v40 = vld [vmem:[%s9488_s1 + $0xcd8] sm:$0xff]  }
 0x183   :  { %v7646_v43 = vld [vmem:[%s9488_s1 + $0xc18] sm:$0xff]  }
 0x184   :  { %v9105_v38 = vadd.f32 %v6576_v39, %v4741_v30  ;;  %6925 = vmatpush3.bf16.msra.mxu0 %v7608_v45 }
 0x185   :  { %6953 = vmatpush3.bf16.msra.mxu1 %v7609_v46  ;;  %6926 = vmatprep.subr.bf16.mxu0 %v7610_v47  ;;  %v7647_v46 = vld [vmem:[%s9488_s1 + $0xc98] sm:$0xff]  }
 0x186   :  { %6954 = vmatprep.subr.bf16.mxu1 %v7611_v48 }
 0x188   :  { %6927 = vmatpush3.bf16.msra.mxu0 %v7612_v49 }
 0x189   :  { %6955 = vmatpush3.bf16.msra.mxu1 %v7613_v50  ;;  %6928 = vmatprep.subr.bf16.mxu0 %v7614_v51  ;;  %v7649_v50 = vld [vmem:[%s9488_s1 + $0xce0] sm:$0xff]  }
 0x18a   :  { %6956 = vmatprep.subr.bf16.mxu1 %v7615_v52  ;;  %v7650_v51 = vld [vmem:[%s9488_s1 + $0xc20] sm:$0xff]  }
 0x18b   :  { %v7651_v52 = vld [vmem:[%s9488_s1 + $0xca0] sm:$0xff]  }
 0x18c   :  { %6929 = vmatpush3.bf16.msra.mxu0 %v7616_v53  ;;  %v7652_v53 = vld [vmem:[%s9488_s1 + $0xc68] sm:$0xff]  }
 0x18d   :  { %6957 = vmatpush3.bf16.msra.mxu1 %v7617_v54  ;;  %6930 = vmatprep.subr.bf16.mxu0 %v7618_v55  ;;  %v7653_v54 = vld [vmem:[%s9488_s1 + $0xce8] sm:$0xff]  }
 0x18e   :  { %6958 = vmatprep.subr.bf16.mxu1 %v7619_v56  ;;  %v7654_v55 = vld [vmem:[%s9488_s1 + $0xc28] sm:$0xff]  }
 0x18f   :  { %v7655_v56 = vld [vmem:[%s9488_s1 + $0xca8] sm:$0xff]  }
 0x190   :  { %6931 = vmatpush3.bf16.msra.mxu0 %v7620_v57  ;;  %v7656_v57 = vld [vmem:[%s9488_s1 + $0xc70] sm:$0xff]  }
 0x191   :  { %6959 = vmatpush3.bf16.msra.mxu1 %v7621_v59  ;;  %6972 = vmatprep.subr.bf16.mxu0 %v7628_v0  ;;  %v7657_v59 = vld [vmem:[%s9488_s1 + $0xcf0] sm:$0xff]   ;;  %v7662_v0 = vld [vmem:[%s9488_s1 + $0xc38] sm:$0xff]  }
 0x192   :  { %7000 = vmatprep.subr.bf16.mxu1 %v7629_v58  ;;  %v7664_v58 = vld [vmem:[%s9489_s0 + $0xc0] ss:$232 sps:$4 sm:$0xff]  }
 0x193   :  { %5403 = vmatmul.mubr.bf16.vlgmr.msra.gmra.mrb[88].mxu0 %v7622_v60  ;;  %v7658_v60 = vld [vmem:[%s9488_s1 + $0xc30] sm:$0xff]  }
 0x194   :  { %5451 = vmatmul.mubr.bf16.vlgmr.msra.gmra.mrb[88].mxu1 %v7625_v62  ;;  %6973 = vmatpush3.bf16.msra.mxu0 %v7630_v4  ;;  %v7660_v62 = vld [vmem:[%s9488_s1 + $0xc78] sm:$0xff]   ;;  %v7667_v4 = vld [vmem:[%s9489_s0 + $0xc8] ss:$232 sps:$4 sm:$0xff]  }
 0x195   :  { %7001 = vmatpush3.bf16.msra.mxu1 %v7631_v7  ;;  %6974 = vmatprep.subr.bf16.mxu0 %v7632_v10  ;;  %v7670_v7 = vld [vmem:[%s9488_s1 + $0xd40] sm:$0xff]  }
 0x196   :  { %v6596_v2 = vpop.f32.mrb[40].mxu0  ;;  %7002 = vmatprep.subr.bf16.mxu1 %v7633_v13  ;;  %5410 = vmatprep.mubr.bf16.mxu0 %v5823_v22  ;;  %v7673_v13 = vld [vmem:[%s9488_s1 + $0xd80] sm:$0xff]   ;;  %v7676_v22 = vld [vmem:[%s9488_s1 + $0xd08] sm:$0xff]  }
 0x197   :  { %v6624_v3 = vpop.f32.mrb[40].mxu1  ;;  %v6597_v5 = vpop.f32.mrb[41].mxu0  ;;  %5458 = vmatprep.mubr.bf16.mxu1 %v5825_v31 }
 0x198   :  { %v6598_v8 = vadd.f32 %v6597_v5, %v6596_v2  ;;  %v6625_v1 = vpop.f32.mrb[41].mxu1  ;;  %v6599_v12 = vpop.f32.mrb[42].mxu0  ;;  %6975 = vmatpush3.bf16.msra.mxu0 %v7634_v9  ;;  %v7663_v2 = vld [vmem:[%s9488_s1 + $0xcb8] sm:$0xff]   ;;  %v7669_v5 = vld [vmem:[%s9489_s0 + $0xcc] ss:$232 sps:$4 sm:$0xff]  }
 0x199   :  { %v6626_v11 = vadd.f32 %v6625_v1, %v6624_v3  ;;  %v6627_v6 = vpop.f32.mrb[42].mxu1  ;;  %v6600_v17 = vpop.f32.mrb[43].mxu0  ;;  %7003 = vmatpush3.bf16.msra.mxu1 %v7635_v18  ;;  %6976 = vmatprep.subr.bf16.mxu0 %v7638_v24  ;;  %v7666_v3 = vld [vmem:[%s9489_s0 + $0xc4] ss:$232 sps:$4 sm:$0xff]  }
 0x19a   :  { %v4829_v16 = vadd.f32 %v6598_v8, %v9066_v14  ;;  %v6601_v15 = vadd.f32 %v6600_v17, %v6599_v12  ;;  %v6628_v14 = vpop.f32.mrb[43].mxu1  ;;  %7004 = vmatprep.subr.bf16.mxu1 %v7639_v27  ;;  %v7671_v1 = vld [vmem:[%s9488_s1 + $0xdc0] sm:$0xff]   ;;  %v7674_v9 = vld [vmem:[%s9488_s1 + $0xd48] sm:$0xff]  }
 0x19b   :  { %v6629_v26 = vadd.f32 %v6628_v14, %v6627_v6  ;;  %5411 = vmatmul.mubr.bf16.gmra.mrb[92].mxu0 %v5822_v23  ;;  %v7677_v24 = vld [vmem:[%s9488_s1 + $0xd88] sm:$0xff]  }
 0x19c   :  { %v9189_v20 = vadd.f32 %v6626_v11, %v4829_v16  ;;  %v4832_v28 = vadd.f32 %v6601_v15, %v9084_v29  ;;  %v7642_v29 = vld [vmem:[%s9488_s1 + $0xc90] sm:$0xff]   ;;  %6977 = vmatpush3.bf16.msra.mxu0 %v7641_v32  ;;  %5459 = vmatmul.mubr.bf16.gmra.mrb[92].mxu1 %v5824_v33  ;;  %v7672_v11 = vld [vmem:[%s9488_s1 + $0xd00] sm:$0xff]  }
 0x19d   :  { %7005 = vmatpush3.bf16.msra.mxu1 %v7642_v29  ;;  %6978 = vmatprep.subr.bf16.mxu0 %v7644_v37  ;;  %v7680_v32 = vld [vmem:[%s9488_s1 + $0xd50] sm:$0xff]   ;;  %v98_v29 = vld [vmem:[%s9489_s0 + $0x298] sm:$0xff] }
 0x19e   :  { %v6602_v21 = vpop.f32.mrb[44].mxu0  ;;  %v9204_v34 = vadd.f32 %v6629_v26, %v4832_v28  ;;  %7006 = vmatprep.subr.bf16.mxu1 %v7645_v40  ;;  %5498 = vmatprep.mubr.bf16.mxu0 %v7666_v3  ;;  %v7683_v37 = vld [vmem:[%s9488_s1 + $0xd10] sm:$0xff]  }
 0x19f   :  { %v6603_v35 = vpop.f32.mrb[45].mxu0  ;;  %v6630_v39 = vpop.f32.mrb[44].mxu1  ;;  %5546 = vmatprep.mubr.bf16.mxu1 %v7669_v5  ;;  %v7701_v3 = vld [vmem:[%s9488_s1 + $0xdb0] sm:$0xff]   ;;  %v7703_v5 = vld [vmem:[%s9488_s1 + $0xdf8] sm:$0xff]  }
 0x1a0   :  { %v6604_v30 = vadd.f32 %v6603_v35, %v6602_v21  ;;  %v6605_v36 = vpop.f32.mrb[46].mxu0  ;;  %v6631_v42 = vpop.f32.mrb[45].mxu1  ;;  %6979 = vmatpush3.bf16.msra.mxu0 %v7646_v43  ;;  %v7681_v35 = vld [vmem:[%s9488_s1 + $0xdd0] sm:$0xff]  }
 0x1a1   :  { %v6632_v44 = vadd.f32 %v6631_v42, %v6630_v39  ;;  %v6606_v45 = vpop.f32.mrb[47].mxu0  ;;  %v6633_v47 = vpop.f32.mrb[46].mxu1  ;;  %7007 = vmatpush3.bf16.msra.mxu1 %v7647_v46  ;;  %v5829_v36 = vcombine.high %v98_v29, %v98_v29  ;;  %v5828_v39 = vcombine.low %v98_v29, %v98_v29  ;;  %v7687_v46 = vld [vmem:[%s9488_s1 + $0xdd8] sm:$0xff]  }
 0x1a2   :  { %v4837_v41 = vadd.f32 %v6604_v30, %v9105_v38  ;;  %v7648_v38 = vld [vmem:[%s9488_s1 + $0xc60] sm:$0xff]   ;;  %v6634_v49 = vpop.f32.mrb[47].mxu1  ;;  %7008 = vmatprep.subr.bf16.mxu1 %v7649_v50 }
 0x1a3   :  { %6980 = vmatprep.subr.bf16.mxu0 %v7648_v38  ;;  %v7688_v49 = vld [vmem:[%s9488_s1 + $0xd18] sm:$0xff]  }
 0x1a4   :  { %v9225_v48 = vadd.f32 %v6632_v44, %v4837_v41  ;;  %6981 = vmatpush3.bf16.msra.mxu0 %v7650_v51  ;;  %v7684_v41 = vld [vmem:[%s9488_s1 + $0xd90] sm:$0xff]   ;;  %v7686_v44 = vld [vmem:[%s9488_s1 + $0xd58] sm:$0xff]  }
 0x1a5   :  { %7009 = vmatpush3.bf16.msra.mxu1 %v7651_v52  ;;  %6982 = vmatprep.subr.bf16.mxu0 %v7652_v53  ;;  %v7689_v51 = vld [vmem:[%s9488_s1 + $0xd98] sm:$0xff]  }
 0x1a6   :  { %7010 = vmatprep.subr.bf16.mxu1 %v7653_v54 }
 0x1a8   :  { %6983 = vmatpush3.bf16.msra.mxu0 %v7654_v55  ;;  %v7691_v55 = vld [vmem:[%s9488_s1 + $0xde0] sm:$0xff]  }
 0x1a9   :  { %7011 = vmatpush3.bf16.msra.mxu1 %v7655_v56  ;;  %6984 = vmatprep.subr.bf16.mxu0 %v7656_v57  ;;  %v7692_v57 = vld [vmem:[%s9488_s1 + $0xd20] sm:$0xff]  }
 0x1aa   :  { %7012 = vmatprep.subr.bf16.mxu1 %v7657_v59  ;;  %v7693_v59 = vld [vmem:[%s9488_s1 + $0xda0] sm:$0xff]  }
 0x1ac   :  { %6985 = vmatpush3.bf16.msra.mxu0 %v7658_v60  ;;  %v7694_v60 = vld [vmem:[%s9488_s1 + $0xd68] sm:$0xff]  }
 0x1ad   :  { %7013 = vmatpush3.bf16.msra.mxu1 %v7659_v61  ;;  %6986 = vmatprep.subr.bf16.mxu0 %v7660_v62  ;;  %v7695_v61 = vld [vmem:[%s9488_s1 + $0xde8] sm:$0xff]  }
 0x1ae   :  { %7014 = vmatprep.subr.bf16.mxu1 %v7661_v63  ;;  %v7696_v62 = vld [vmem:[%s9488_s1 + $0xd28] sm:$0xff]  }
 0x1af   :  { %v7697_v63 = vld [vmem:[%s9488_s1 + $0xda8] sm:$0xff]  }
 0x1b0   :  { %6987 = vmatpush3.bf16.msra.mxu0 %v7662_v0  ;;  %v7698_v0 = vld [vmem:[%s9488_s1 + $0xd70] sm:$0xff]  }
 0x1b1   :  { %7015 = vmatpush3.bf16.msra.mxu1 %v7663_v2  ;;  %7028 = vmatprep.subr.bf16.mxu0 %v7670_v7  ;;  %v7699_v2 = vld [vmem:[%s9488_s1 + $0xdf0] sm:$0xff]   ;;  %v7704_v7 = vld [vmem:[%s9488_s1 + $0xd38] sm:$0xff]  }
 0x1b2   :  { %7056 = vmatprep.subr.bf16.mxu1 %v7671_v1  ;;  %v7706_v1 = vld [vmem:[%s9489_s0 + $0xd0] ss:$232 sps:$4 sm:$0xff]  }
 0x1b3   :  { %5499 = vmatmul.mubr.bf16.vlgmr.msra.gmra.mrb[96].mxu0 %v7664_v58  ;;  %v7700_v58 = vld [vmem:[%s9488_s1 + $0xd30] sm:$0xff]  }
 0x1b4   :  { %5547 = vmatmul.mubr.bf16.vlgmr.msra.gmra.mrb[96].mxu1 %v7667_v4  ;;  %7029 = vmatpush3.bf16.msra.mxu0 %v7672_v11  ;;  %v7702_v4 = vld [vmem:[%s9488_s1 + $0xd78] sm:$0xff]  }
 0x1b5   :  { %7057 = vmatpush3.bf16.msra.mxu1 %v7673_v13  ;;  %7030 = vmatprep.subr.bf16.mxu0 %v7674_v9  ;;  %v7709_v11 = vld [vmem:[%s9489_s0 + $0xd8] ss:$232 sps:$4 sm:$0xff]  }
 0x1b6   :  { %v6652_v8 = vpop.f32.mrb[48].mxu0  ;;  %7058 = vmatprep.subr.bf16.mxu1 %v7675_v19  ;;  %5554 = vmatprep.mubr.bf16.mxu1 %v5829_v36  ;;  %v7712_v13 = vld [vmem:[%s9488_s1 + $0xe40] sm:$0xff]   ;;  %v7715_v19 = vld [vmem:[%s9488_s1 + $0xe08] sm:$0xff]  }
 0x1b7   :  { %v6680_v10 = vpop.f32.mrb[48].mxu1  ;;  %v6653_v12 = vpop.f32.mrb[49].mxu0 }
 0x1b8   :  { %v6654_v16 = vadd.f32 %v6653_v12, %v6652_v8  ;;  %v6681_v6 = vpop.f32.mrb[49].mxu1  ;;  %v6655_v18 = vpop.f32.mrb[50].mxu0  ;;  %7031 = vmatpush3.bf16.msra.mxu0 %v7676_v22  ;;  %v7705_v8 = vld [vmem:[%s9488_s1 + $0xdb8] sm:$0xff]  }
 0x1b9   :  { %v6682_v17 = vadd.f32 %v6681_v6, %v6680_v10  ;;  %v6683_v14 = vpop.f32.mrb[50].mxu1  ;;  %v6656_v23 = vpop.f32.mrb[51].mxu0  ;;  %7059 = vmatpush3.bf16.msra.mxu1 %v7677_v24  ;;  %7032 = vmatprep.subr.bf16.mxu0 %v7680_v32  ;;  %v7708_v10 = vld [vmem:[%s9489_s0 + $0xd4] ss:$232 sps:$4 sm:$0xff]   ;;  %v7713_v6 = vld [vmem:[%s9488_s1 + $0xe00] sm:$0xff]  }
 0x1ba   :  { %v4925_v15 = vadd.f32 %v6654_v16, %v9189_v20  ;;  %v6657_v27 = vadd.f32 %v6656_v23, %v6655_v18  ;;  %v6684_v28 = vpop.f32.mrb[51].mxu1  ;;  %v97_v20 = vld [vmem:[%s9489_s0 + $0x290] sm:$0xff]  ;;  %7060 = vmatprep.subr.bf16.mxu1 %v7681_v35  ;;  %v7711_v12 = vld [vmem:[%s9489_s0 + $0xdc] ss:$232 sps:$4 sm:$0xff]  }
 0x1bb   :  { %v6685_v25 = vadd.f32 %v6684_v28, %v6683_v14  ;;  %v5827_v21 = vcombine.high %v97_v20, %v97_v20  ;;  %v5826_v31 = vcombine.low %v97_v20, %v97_v20  ;;  %v100_v28 = vld [vmem:[%s9489_s0 + $0x2a8] sm:$0xff] }
 0x1bc   :  { %v9309_v26 = vadd.f32 %v6682_v17, %v4925_v15  ;;  %v4928_v33 = vadd.f32 %v6657_v27, %v9204_v34  ;;  %7033 = vmatpush3.bf16.msra.mxu0 %v7683_v37  ;;  %5555 = vmatmul.mubr.bf16.gmra.mrb[100].mxu1 %v5828_v39  ;;  %v7714_v17 = vld [vmem:[%s9488_s1 + $0xe48] sm:$0xff]   ;;  %v99_v15 = vld [vmem:[%s9489_s0 + $0x2a0] sm:$0xff]  ;;  %v5833_v32 = vcombine.high %v100_v28, %v100_v28  ;;  %v7720_v37 = vld [vmem:[%s9488_s1 + $0xe10] sm:$0xff]  }
 0x1bd   :  { %5506 = vmatprep.mubr.bf16.mxu0 %v5827_v21  ;;  %7061 = vmatpush3.bf16.msra.mxu1 %v7684_v41  ;;  %v5831_v24 = vcombine.high %v99_v15, %v99_v15  ;;  %v5830_v27 = vcombine.low %v99_v15, %v99_v15 }
 0x1be   :  { %v6658_v30 = vpop.f32.mrb[52].mxu0  ;;  %v9327_v40 = vadd.f32 %v6685_v25, %v4928_v33  ;;  %5507 = vmatmul.mubr.bf16.gmra.mrb[100].mxu0 %v5826_v31  ;;  %7034 = vmatprep.subr.bf16.mxu0 %v7686_v44  ;;  %v7718_v31 = vld [vmem:[%s9488_s1 + $0xe50] sm:$0xff]  }
 0x1bf   :  { %v6659_v34 = vpop.f32.mrb[53].mxu0  ;;  %v6686_v38 = vpop.f32.mrb[52].mxu1  ;;  %7062 = vmatprep.subr.bf16.mxu1 %v7687_v46  ;;  %5594 = vmatprep.mubr.bf16.mxu0 %v7708_v10 }
 0x1c0   :  { %v6660_v42 = vadd.f32 %v6659_v34, %v6658_v30  ;;  %v6661_v43 = vpop.f32.mrb[54].mxu0  ;;  %v6687_v50 = vpop.f32.mrb[53].mxu1  ;;  %7035 = vmatpush3.bf16.msra.mxu0 %v7688_v49  ;;  %5642 = vmatprep.mubr.bf16.mxu1 %v7711_v12  ;;  %v5832_v30 = vcombine.low %v100_v28, %v100_v28 }
 0x1c1   :  { %v6662_v45 = vpop.f32.mrb[55].mxu0  ;;  %v6688_v52 = vadd.f32 %v6687_v50, %v6686_v38  ;;  %v6689_v53 = vpop.f32.mrb[54].mxu1  ;;  %7063 = vmatpush3.bf16.msra.mxu1 %v7689_v51  ;;  %v7723_v43 = vld [vmem:[%s9488_s1 + $0xe18] sm:$0xff]   ;;  %v7725_v50 = vld [vmem:[%s9488_s1 + $0xe20] sm:$0xff]  }
 0x1c2   :  { %v4933_v47 = vadd.f32 %v6660_v42, %v9225_v48  ;;  %v7690_v48 = vld [vmem:[%s9488_s1 + $0xd60] sm:$0xff]   ;;  %v6690_v54 = vpop.f32.mrb[55].mxu1  ;;  %7064 = vmatprep.subr.bf16.mxu1 %v7691_v55  ;;  %v7726_v53 = vld [vmem:[%s9488_s1 + $0xe68] sm:$0xff]  }
 0x1c3   :  { %7036 = vmatprep.subr.bf16.mxu0 %v7690_v48  ;;  %v7734_v55 = vld [vmem:[%s9489_s0 + $0xe4] ss:$232 sps:$4 sm:$0xff]  }
 0x1c4   :  { %v9351_v56 = vadd.f32 %v6688_v52, %v4933_v47  ;;  %7037 = vmatpush3.bf16.msra.mxu0 %v7692_v57 }
 0x1c5   :  { %7065 = vmatpush3.bf16.msra.mxu1 %v7693_v59  ;;  %7038 = vmatprep.subr.bf16.mxu0 %v7694_v60  ;;  %v7727_v60 = vld [vmem:[%s9488_s1 + $0xe28] sm:$0xff]  }
 0x1c6   :  { %7066 = vmatprep.subr.bf16.mxu1 %v7695_v61  ;;  %v7728_v61 = vld [vmem:[%s9488_s1 + $0xe70] sm:$0xff]  }
 0x1c8   :  { %7039 = vmatpush3.bf16.msra.mxu0 %v7696_v62  ;;  %v7729_v62 = vld [vmem:[%s9488_s1 + $0xe30] sm:$0xff]  }
 0x1c9   :  { %7067 = vmatpush3.bf16.msra.mxu1 %v7697_v63  ;;  %7040 = vmatprep.subr.bf16.mxu0 %v7698_v0  ;;  %v7730_v63 = vld [vmem:[%s9488_s1 + $0xe78] sm:$0xff]  }
 0x1ca   :  { %7068 = vmatprep.subr.bf16.mxu1 %v7699_v2  ;;  %v7731_v0 = vld [vmem:[%s9488_s1 + $0xe38] sm:$0xff]   ;;  %v7732_v2 = vld [vmem:[%s9489_s0 + $0xe0] ss:$232 sps:$4 sm:$0xff]  }
 0x1cc   :  { %7041 = vmatpush3.bf16.msra.mxu0 %v7700_v58 }
 0x1cd   :  { %7069 = vmatpush3.bf16.msra.mxu1 %v7701_v3  ;;  %7042 = vmatprep.subr.bf16.mxu0 %v7702_v4 }
 0x1ce   :  { %7070 = vmatprep.subr.bf16.mxu1 %v7703_v5 }
 0x1d0   :  { %7043 = vmatpush3.bf16.msra.mxu0 %v7704_v7 }
 0x1d1   :  { %7071 = vmatpush3.bf16.msra.mxu1 %v7705_v8  ;;  %7084 = vmatprep.subr.bf16.mxu0 %v7712_v13 }
 0x1d2   :  { %7112 = vmatprep.subr.bf16.mxu1 %v7712_v13 }
 0x1d3   :  { %5595 = vmatmul.mubr.bf16.vlgmr.msra.gmra.mrb[104].mxu0 %v7706_v1 }
 0x1d4   :  { %5643 = vmatmul.mubr.bf16.vlgmr.msra.gmra.mrb[104].mxu1 %v7709_v11  ;;  %7085 = vmatpush3.bf16.msra.mxu0 %v7713_v6 }
 0x1d5   :  { %7120 = vmatpush3.bf16.msra.mxu1 %v7713_v6  ;;  %7086 = vmatprep.subr.bf16.mxu0 %v7714_v17 }
 0x1d6   :  { %v6708_v16 = vpop.f32.mrb[56].mxu0  ;;  %7113 = vmatprep.subr.bf16.mxu1 %v7714_v17  ;;  %5602 = vmatprep.mubr.bf16.mxu0 %v5831_v24 }
 0x1d7   :  { %v6736_v9 = vpop.f32.mrb[56].mxu1  ;;  %v6709_v18 = vpop.f32.mrb[57].mxu0  ;;  %5650 = vmatprep.mubr.bf16.mxu1 %v5833_v32 }
 0x1d8   :  { %v6710_v14 = vadd.f32 %v6709_v18, %v6708_v16  ;;  %v6737_v22 = vpop.f32.mrb[57].mxu1  ;;  %v6711_v23 = vpop.f32.mrb[58].mxu0  ;;  %7087 = vmatpush3.bf16.msra.mxu0 %v7715_v19 }
 0x1d9   :  { %v6738_v20 = vadd.f32 %v6737_v22, %v6736_v9  ;;  %v6739_v25 = vpop.f32.mrb[58].mxu1  ;;  %v6712_v21 = vpop.f32.mrb[59].mxu0  ;;  %7121 = vmatpush3.bf16.msra.mxu1 %v7715_v19  ;;  %7088 = vmatprep.subr.bf16.mxu0 %v7718_v31 }
 0x1da   :  { %v5021_v33 = vadd.f32 %v6710_v14, %v9309_v26  ;;  %v6713_v35 = vadd.f32 %v6712_v21, %v6711_v23  ;;  %v6740_v29 = vpop.f32.mrb[59].mxu1  ;;  %v7722_v26 = vld [vmem:[%s9488_s1 + $0xe58] sm:$0xff]   ;;  %7114 = vmatprep.subr.bf16.mxu1 %v7718_v31 }
 0x1db   :  { %v6741_v36 = vadd.f32 %v6740_v29, %v6739_v25  ;;  %5603 = vmatmul.mubr.bf16.gmra.mrb[108].mxu0 %v5830_v27 }
 0x1dc   :  { %v9432_v39 = vadd.f32 %v6738_v20, %v5021_v33  ;;  %v5024_v34 = vadd.f32 %v6713_v35, %v9327_v40  ;;  %5651 = vmatmul.mubr.bf16.gmra.mrb[108].mxu1 %v5832_v30  ;;  %7089 = vmatpush3.bf16.msra.mxu0 %v7720_v37  ;;  %v7724_v40 = vld [vmem:[%s9488_s1 + $0xe60] sm:$0xff]  }
 0x1dd   :  { %7122 = vmatpush3.bf16.msra.mxu1 %v7720_v37  ;;  %7090 = vmatprep.subr.bf16.mxu0 %v7722_v26 }
 0x1de   :  { %v9438_v41 = vadd.f32 %v6741_v36, %v5024_v34  ;;  %v6714_v42 = vpop.f32.mrb[60].mxu0  ;;  %7115 = vmatprep.subr.bf16.mxu1 %v7722_v26  ;;  %5690 = vmatprep.mubr.bf16.mxu0 %v7734_v55 }
 0x1df   :  { %v6715_v44 = vpop.f32.mrb[61].mxu0  ;;  %v6742_v47 = vpop.f32.mrb[60].mxu1 }
 0x1e0   :  { %v6716_v45 = vadd.f32 %v6715_v44, %v6714_v42  ;;  %v6717_v46 = vpop.f32.mrb[62].mxu0  ;;  %v6743_v49 = vpop.f32.mrb[61].mxu1  ;;  %7091 = vmatpush3.bf16.msra.mxu0 %v7723_v43 }
 0x1e1   :  { %v6744_v51 = vadd.f32 %v6743_v49, %v6742_v47  ;;  %v6718_v52 = vpop.f32.mrb[63].mxu0  ;;  %7123 = vmatpush3.bf16.msra.mxu1 %v7723_v43  ;;  %7092 = vmatprep.subr.bf16.mxu0 %v7724_v40  ;;  %v6745_v48 = vpop.f32.mrb[62].mxu1 }
 0x1e2   :  { %v5029_v38 = vadd.f32 %v6716_v45, %v9351_v56  ;;  %7116 = vmatprep.subr.bf16.mxu1 %v7724_v40  ;;  %v101_v56 = vld [vmem:[%s9489_s0 + $0x2b0] sm:$0xff]  ;;  %v6746_v57 = vpop.f32.mrb[63].mxu1 }
 0x1e3   :  { %v5835_v59 = vcombine.high %v101_v56, %v101_v56  ;;  %v5834_v58 = vcombine.low %v101_v56, %v101_v56 }
 0x1e4   :  { %v5077_v54 = vadd.f32 %v6744_v51, %v5029_v38  ;;  %7093 = vmatpush3.bf16.msra.mxu0 %v7725_v50 }
 0x1e5   :  { %7124 = vmatpush3.bf16.msra.mxu1 %v7725_v50  ;;  %7094 = vmatprep.subr.bf16.mxu0 %v7726_v53 }
 0x1e6   :  { %7117 = vmatprep.subr.bf16.mxu1 %v7726_v53  ;;  %5698 = vmatprep.mubr.bf16.mxu1 %v5835_v59 }
 0x1e8   :  { %7095 = vmatpush3.bf16.msra.mxu0 %v7727_v60 }
 0x1e9   :  { %7125 = vmatpush3.bf16.msra.mxu1 %v7727_v60  ;;  %7096 = vmatprep.subr.bf16.mxu0 %v7728_v61 }
 0x1ea   :  { %7118 = vmatprep.subr.bf16.mxu1 %v7728_v61 }
 0x1ec   :  { %7097 = vmatpush3.bf16.msra.mxu0 %v7729_v62 }
 0x1ed   :  { %7126 = vmatpush3.bf16.msra.mxu1 %v7729_v62  ;;  %7098 = vmatprep.subr.bf16.mxu0 %v7730_v63 }
 0x1ee   :  { %7119 = vmatprep.subr.bf16.mxu1 %v7730_v63 }
 0x1f0   :  { %7099 = vmatpush3.bf16.msra.mxu0 %v7731_v0 }
 0x1f1   :  { %7127 = vmatpush3.bf16.msra.mxu1 %v7731_v0 }
 0x1f3   :  { %5691 = vmatmul.mubr.bf16.vlgmr.msra.gmra.mrb[112].mxu0 %v7732_v2 }
 0x1f4   :  { %5699 = vmatmul.mubr.bf16.vlgmr.msra.gmra.mrb[112].mxu1 %v5834_v58 }
 0x1fe   :  { %v6792_v4 = vpop.f32.mrb[64].mxu1 }
 0x1ff   :  { %v6793_v8 = vpop.f32.mrb[65].mxu1 }
 0x200   :  { %v6794_v10 = vadd.f32 %v6793_v8, %v6792_v4  ;;  %v6795_v11 = vpop.f32.mrb[66].mxu1 }
 0x201   :  { %v6796_v6 = vpop.f32.mrb[67].mxu1 }
 0x202   :  { %v6764_v3 = vpop.f32.mrb[64].mxu0  ;;  %v6797_v9 = vadd.f32 %v6796_v6, %v6795_v11 }
 0x203   :  { %v6765_v5 = vpop.f32.mrb[65].mxu0 }
 0x204   :  { %v6766_v7 = vadd.f32 %v6765_v5, %v6764_v3  ;;  %v6767_v1 = vpop.f32.mrb[66].mxu0 }
 0x205   :  { %v6768_v12 = vpop.f32.mrb[67].mxu0 }
 0x206   :  { %v5117_v13 = vadd.f32 %v6766_v7, %v9432_v39  ;;  %v6769_v16 = vadd.f32 %v6768_v12, %v6767_v1  ;;  %v6798_v28 = vpop.f32.mrb[68].mxu1 }
 0x207   :  { %v6799_v20 = vpop.f32.mrb[69].mxu1 }
 0x208   :  { %v5165_v17 = vadd.f32 %v6794_v10, %v5117_v13  ;;  %v5120_v18 = vadd.f32 %v6769_v16, %v9438_v41  ;;  %v6800_v25 = vadd.f32 %v6799_v20, %v6798_v28  ;;  %v6801_v21 = vpop.f32.mrb[70].mxu1 }
 0x209   :  { %v6802_v31 = vpop.f32.mrb[71].mxu1 }
 0x20a   :  { %v5168_v19 = vadd.f32 %v6797_v9, %v5120_v18  ;;  %v6770_v15 = vpop.f32.mrb[68].mxu0 }
 0x20b   :  { %v6771_v14 = vpop.f32.mrb[69].mxu0 }
 0x20c   :  { %v6772_v22 = vadd.f32 %v6771_v14, %v6770_v15  ;;  %v6773_v23 = vpop.f32.mrb[70].mxu0 }
 0x20d   :  { %v6774_v24 = vpop.f32.mrb[71].mxu0 }
 0x20e   :  { %v5125_v27 = vadd.f32 %v6772_v22, %v5077_v54 }
 0x210   :  { %v5173_v32 = vadd.f32 %v6800_v25, %v5125_v27 }
 0x226   :  { %v6820_v33 = vpop.f32.mrb[72].mxu0 }
 0x227   :  { %v6848_v35 = vpop.f32.mrb[72].mxu1  ;;  %v6821_v29 = vpop.f32.mrb[73].mxu0 }
 0x228   :  { %v6822_v30 = vadd.f32 %v6821_v29, %v6820_v33  ;;  %v6849_v36 = vpop.f32.mrb[73].mxu1  ;;  %v6823_v37 = vpop.f32.mrb[74].mxu0 }
 0x229   :  { %v6850_v39 = vadd.f32 %v6849_v36, %v6848_v35  ;;  %v6851_v34 = vpop.f32.mrb[74].mxu1  ;;  %v6824_v26 = vpop.f32.mrb[75].mxu0 }
 0x22a   :  { %v5213_v41 = vadd.f32 %v6822_v30, %v5165_v17  ;;  %v6825_v42 = vadd.f32 %v6824_v26, %v6823_v37  ;;  %v6852_v43 = vpop.f32.mrb[75].mxu1 }
 0x22b   :  { %v6853_v44 = vadd.f32 %v6852_v43, %v6851_v34 }
 0x22c   :  { %v5261_v40 = vadd.f32 %v6850_v39, %v5213_v41  ;;  %v5216_v45 = vadd.f32 %v6825_v42, %v5168_v19 }
 0x22e   :  { %v5264_v46 = vadd.f32 %v6853_v44, %v5216_v45 }
 0x22f   :  { %v6854_v51 = vpop.f32.mrb[76].mxu1 }
 0x230   :  { %v6855_v48 = vpop.f32.mrb[77].mxu1 }
 0x231   :  { %v6826_v47 = vpop.f32.mrb[76].mxu0  ;;  %v6856_v54 = vadd.f32 %v6855_v48, %v6854_v51  ;;  %v6857_v55 = vpop.f32.mrb[78].mxu1 }
 0x232   :  { %v6827_v38 = vpop.f32.mrb[77].mxu0  ;;  %v6858_v56 = vpop.f32.mrb[79].mxu1 }
 0x233   :  { %v6828_v49 = vadd.f32 %v6827_v38, %v6826_v47  ;;  %v6829_v50 = vpop.f32.mrb[78].mxu0 }
 0x234   :  { %v6830_v52 = vpop.f32.mrb[79].mxu0 }
 0x235   :  { %v5221_v53 = vadd.f32 %v6828_v49, %v5173_v32 }
 0x237   :  { %v5269_v57 = vadd.f32 %v6856_v54, %v5221_v53 }
 0x246   :  { %v6876_v59 = vpop.f32.mrb[80].mxu0 }
 0x247   :  { %v6877_v60 = vpop.f32.mrb[81].mxu0  ;;  %v6904_v61 = vpop.f32.mrb[80].mxu1 }
 0x248   :  { %v6878_v62 = vadd.f32 %v6877_v60, %v6876_v59  ;;  %v6879_v63 = vpop.f32.mrb[82].mxu0  ;;  %v6905_v0 = vpop.f32.mrb[81].mxu1 }
 0x249   :  { %v6880_v2 = vpop.f32.mrb[83].mxu0  ;;  %v6906_v3 = vadd.f32 %v6905_v0, %v6904_v61  ;;  %v6907_v4 = vpop.f32.mrb[82].mxu1 }
 0x24a   :  { %v5309_v58 = vadd.f32 %v6878_v62, %v5261_v40  ;;  %v6881_v5 = vadd.f32 %v6880_v2, %v6879_v63  ;;  %v6908_v7 = vpop.f32.mrb[83].mxu1 }
 0x24b   :  { %v6909_v10 = vadd.f32 %v6908_v7, %v6907_v4 }
 0x24c   :  { %v5357_v8 = vadd.f32 %v6906_v3, %v5309_v58  ;;  %v5312_v1 = vadd.f32 %v6881_v5, %v5264_v46 }
 0x24e   :  { %v5360_v11 = vadd.f32 %v6909_v10, %v5312_v1  ;;  %v6882_v12 = vpop.f32.mrb[84].mxu0 }
 0x24f   :  { %v6883_v13 = vpop.f32.mrb[85].mxu0  ;;  %v6910_v9 = vpop.f32.mrb[84].mxu1 }
 0x250   :  { %v6884_v16 = vadd.f32 %v6883_v13, %v6882_v12  ;;  %v6885_v6 = vpop.f32.mrb[86].mxu0  ;;  %v6911_v19 = vpop.f32.mrb[85].mxu1 }
 0x251   :  { %v6886_v17 = vpop.f32.mrb[87].mxu0  ;;  %v6912_v15 = vadd.f32 %v6911_v19, %v6910_v9  ;;  %v6913_v14 = vpop.f32.mrb[86].mxu1 }
 0x252   :  { %v5317_v18 = vadd.f32 %v6884_v16, %v5269_v57  ;;  %v6914_v22 = vpop.f32.mrb[87].mxu1 }
 0x254   :  { %v5365_v23 = vadd.f32 %v6912_v15, %v5317_v18 }
 0x266   :  { %v6932_v24 = vpop.f32.mrb[88].mxu0 }
 0x267   :  { %v6960_v27 = vpop.f32.mrb[88].mxu1  ;;  %v6933_v28 = vpop.f32.mrb[89].mxu0 }
 0x268   :  { %v6934_v20 = vadd.f32 %v6933_v28, %v6932_v24  ;;  %v6961_v25 = vpop.f32.mrb[89].mxu1  ;;  %v6935_v21 = vpop.f32.mrb[90].mxu0 }
 0x269   :  { %v6962_v31 = vadd.f32 %v6961_v25, %v6960_v27  ;;  %v6963_v32 = vpop.f32.mrb[90].mxu1  ;;  %v6936_v33 = vpop.f32.mrb[91].mxu0 }
 0x26a   :  { %v5405_v35 = vadd.f32 %v6934_v20, %v5357_v8  ;;  %v6937_v29 = vadd.f32 %v6936_v33, %v6935_v21  ;;  %v6964_v30 = vpop.f32.mrb[91].mxu1 }
 0x26b   :  { %v6965_v36 = vadd.f32 %v6964_v30, %v6963_v32 }
 0x26c   :  { %v5453_v37 = vadd.f32 %v6962_v31, %v5405_v35  ;;  %v5408_v39 = vadd.f32 %v6937_v29, %v5360_v11 }
 0x26e   :  { %v5456_v34 = vadd.f32 %v6965_v36, %v5408_v39  ;;  %v6938_v26 = vpop.f32.mrb[92].mxu0 }
 0x26f   :  { %v6939_v41 = vpop.f32.mrb[93].mxu0  ;;  %v6966_v45 = vpop.f32.mrb[92].mxu1 }
 0x270   :  { %v6940_v42 = vadd.f32 %v6939_v41, %v6938_v26  ;;  %v6941_v43 = vpop.f32.mrb[94].mxu0  ;;  %v6967_v46 = vpop.f32.mrb[93].mxu1 }
 0x271   :  { %v6942_v44 = vpop.f32.mrb[95].mxu0  ;;  %v6968_v47 = vadd.f32 %v6967_v46, %v6966_v45  ;;  %v6969_v38 = vpop.f32.mrb[94].mxu1 }
 0x272   :  { %v5413_v40 = vadd.f32 %v6940_v42, %v5365_v23  ;;  %v6970_v49 = vpop.f32.mrb[95].mxu1 }
 0x274   :  { %v5461_v50 = vadd.f32 %v6968_v47, %v5413_v40 }
 0x286   :  { %v6988_v51 = vpop.f32.mrb[96].mxu0 }
 0x287   :  { %v7016_v52 = vpop.f32.mrb[96].mxu1  ;;  %v6989_v53 = vpop.f32.mrb[97].mxu0 }
 0x288   :  { %v6990_v48 = vadd.f32 %v6989_v53, %v6988_v51  ;;  %v7017_v54 = vpop.f32.mrb[97].mxu1  ;;  %v6991_v55 = vpop.f32.mrb[98].mxu0 }
 0x289   :  { %v7018_v56 = vadd.f32 %v7017_v54, %v7016_v52  ;;  %v7019_v57 = vpop.f32.mrb[98].mxu1  ;;  %v6992_v59 = vpop.f32.mrb[99].mxu0 }
 0x28a   :  { %v5501_v60 = vadd.f32 %v6990_v48, %v5453_v37  ;;  %v6993_v61 = vadd.f32 %v6992_v59, %v6991_v55  ;;  %v7020_v62 = vpop.f32.mrb[99].mxu1 }
 0x28b   :  { %v7021_v63 = vadd.f32 %v7020_v62, %v7019_v57 }
 0x28c   :  { %v5549_v0 = vadd.f32 %v7018_v56, %v5501_v60  ;;  %v5504_v2 = vadd.f32 %v6993_v61, %v5456_v34 }
 0x28e   :  { %v5552_v58 = vadd.f32 %v7021_v63, %v5504_v2 }
 0x28f   :  { %v7022_v8 = vpop.f32.mrb[100].mxu1 }
 0x290   :  { %v7023_v11 = vpop.f32.mrb[101].mxu1 }
 0x291   :  { %v6994_v3 = vpop.f32.mrb[100].mxu0  ;;  %v7024_v12 = vadd.f32 %v7023_v11, %v7022_v8  ;;  %v7025_v13 = vpop.f32.mrb[102].mxu1 }
 0x292   :  { %v6995_v4 = vpop.f32.mrb[101].mxu0  ;;  %v7026_v16 = vpop.f32.mrb[103].mxu1 }
 0x293   :  { %v6996_v5 = vadd.f32 %v6995_v4, %v6994_v3  ;;  %v6997_v7 = vpop.f32.mrb[102].mxu0 }
 0x294   :  { %v6998_v1 = vpop.f32.mrb[103].mxu0 }
 0x295   :  { %v5509_v10 = vadd.f32 %v6996_v5, %v5461_v50 }
 0x297   :  { %v5557_v6 = vadd.f32 %v7024_v12, %v5509_v10 }
 0x2a6   :  { %v7044_v9 = vpop.f32.mrb[104].mxu0 }
 0x2a7   :  { %v7045_v17 = vpop.f32.mrb[105].mxu0  ;;  %v7072_v18 = vpop.f32.mrb[104].mxu1 }
 0x2a8   :  { %v7046_v19 = vadd.f32 %v7045_v17, %v7044_v9  ;;  %v7047_v15 = vpop.f32.mrb[106].mxu0  ;;  %v7073_v14 = vpop.f32.mrb[105].mxu1 }
 0x2a9   :  { %v7048_v22 = vpop.f32.mrb[107].mxu0  ;;  %v7074_v24 = vadd.f32 %v7073_v14, %v7072_v18  ;;  %v7075_v27 = vpop.f32.mrb[106].mxu1 }
 0x2aa   :  { %v5597_v23 = vadd.f32 %v7046_v19, %v5549_v0  ;;  %v7049_v28 = vadd.f32 %v7048_v22, %v7047_v15  ;;  %v7076_v20 = vpop.f32.mrb[107].mxu1 }
 0x2ab   :  { %v7077_v31 = vadd.f32 %v7076_v20, %v7075_v27 }
 0x2ac   :  { %v5645_v25 = vadd.f32 %v7074_v24, %v5597_v23  ;;  %v5600_v21 = vadd.f32 %v7049_v28, %v5552_v58 }
 0x2ae   :  { %v5648_v32 = vadd.f32 %v7077_v31, %v5600_v21  ;;  %v7050_v33 = vpop.f32.mrb[108].mxu0 }
 0x2af   :  { %v7051_v35 = vpop.f32.mrb[109].mxu0  ;;  %v7078_v30 = vpop.f32.mrb[108].mxu1 }
 0x2b0   :  { %v7052_v29 = vadd.f32 %v7051_v35, %v7050_v33  ;;  %v7053_v36 = vpop.f32.mrb[110].mxu0  ;;  %v7079_v37 = vpop.f32.mrb[109].mxu1 }
 0x2b1   :  { %v7054_v39 = vpop.f32.mrb[111].mxu0  ;;  %v7080_v26 = vadd.f32 %v7079_v37, %v7078_v30  ;;  %v7081_v41 = vpop.f32.mrb[110].mxu1 }
 0x2b2   :  { %v5605_v34 = vadd.f32 %v7052_v29, %v5557_v6  ;;  %v7082_v42 = vpop.f32.mrb[111].mxu1 }
 0x2b4   :  { %v5653_v43 = vadd.f32 %v7080_v26, %v5605_v34 }
 0x2c6   :  { %v7100_v44 = vpop.f32.mrb[112].mxu0 }
 0x2c7   :  { %v7106_v40 = vpop.f32.mrb[112].mxu1  ;;  %v7101_v45 = vpop.f32.mrb[113].mxu0 }
 0x2c8   :  { %v7102_v46 = vadd.f32 %v7101_v45, %v7100_v44  ;;  %v7107_v47 = vpop.f32.mrb[113].mxu1  ;;  %v7103_v38 = vpop.f32.mrb[114].mxu0 }
 0x2c9   :  { %v7108_v49 = vadd.f32 %v7107_v47, %v7106_v40  ;;  %v7109_v50 = vpop.f32.mrb[114].mxu1  ;;  %v7104_v51 = vpop.f32.mrb[115].mxu0 }
 0x2ca   :  { %v5693_v52 = vadd.f32 %v7102_v46, %v5645_v25  ;;  %v7105_v53 = vadd.f32 %v7104_v51, %v7103_v38  ;;  %v7110_v48 = vpop.f32.mrb[115].mxu1 }
 0x2cb   :  { %v5701_v54 = vadd.f32 %v7108_v49, %v5653_v43 }
 0x2cc   :  { %v5706_v55 = vmax.f32 %v5693_v52, 0.0  ;;  %v5696_v56 = vadd.f32 %v7105_v53, %v5648_v32 }
 0x2cd   :  { %v5708_v57 = vmax.f32 %v5701_v54, 0.0 }
 0x2ce   :  { %v5709_v59 = vmin.f32 %v5706_v55, 20.0  ;;  %v5707_v60 = vmax.f32 %v5696_v56, 0.0 }
 0x2cf   :  { %v5711_v61 = vmin.f32 %v5708_v57, 20.0 }
 0x2d0   :  { %5712 = vst [vmem:[%s9491_s3] sm:$0xff] %v5709_v59  ;;  %v5710_v62 = vmin.f32 %v5707_v60, 20.0 }
 0x2d1   :  { %5714 = vst [vmem:[%s9491_s3 + $0x10] sm:$0xff] %v5711_v61 }
 0x2d2   :  { %5713 = vst [vmem:[%s9491_s3 + $0x8] sm:$0xff] %v5710_v62 }

// kernel: custom-call.6
= control target key start
LH: loop header
LB: loop body
LE: loop exit
PB: predicated region body
PF: predicated region fallthrough
CT: control target
= control target key end

     0   :  { %s6_s0 = inlined_call_operand.vmem [shape: f32[768], index: 0, kind: output, shape index: {}]  }

// kernel: deepspeech_forward.9
= control target key start
LH: loop header
LB: loop body
LE: loop exit
PB: predicated region body
PF: predicated region fallthrough
CT: control target
= control target key end

     0   :  { %v704_v3 = vmov 0.0   ;;  %s1345_s1 = inlined_call_operand.vmem [shape: f32[128,768], index: 1, kind: input, shape index: {}]   ;;  %s1346_s0 = inlined_call_operand.vmem [shape: f32[80,128], index: 0, kind: input, shape index: {}]   ;;  %s1347_s2 = inlined_call_operand.vmem [shape: f32[1,768], index: 2, kind: input, shape index: {}]   ;;  %s1348_s3 = inlined_call_operand.vmem [shape: f32[80,768], index: 3, kind: output, shape index: {}]  }
   0x1   :  { %v25_v0 = vld [vmem:[%s1345_s1 + $0x8] sm:$0xff]  ;;  %v31_v1 = vld [vmem:[%s1345_s1 + $0x38] sm:$0xff]  ;;  %216 = vmatprep.mubr.f32.mxu0 %v704_v3  ;;  %341 = vmatprep.mubr.f32.mxu1 %v704_v3  ;;  %v24_v6 = vld [vmem:[%s1345_s1] sm:$0xff] }
   0x2   :  { %v27_v2 = vld [vmem:[%s1345_s1 + $0x18] sm:$0xff]  ;;  %v591_v4 = vpack.c.bf16 %v31_v1, %v25_v0  ;;  %v33_v5 = vld [vmem:[%s1345_s1 + $0x48] sm:$0xff]  ;;  %v30_v7 = vld [vmem:[%s1345_s1 + $0x30] sm:$0xff] }
   0x3   :  { %v623_v8 = vpack.c.bf16 %v33_v5, %v27_v2  ;;  %v593_v9 = vpack.c.bf16 %v30_v7, %v24_v6  ;;  %v26_v10 = vld [vmem:[%s1345_s1 + $0x10] sm:$0xff]  ;;  %v32_v11 = vld [vmem:[%s1345_s1 + $0x40] sm:$0xff]  ;;  %v37_v12 = vld [vmem:[%s1345_s1 + $0x68] sm:$0xff] }
   0x4   :  { %592 = vmatprep.subr.bf16.mxu0 %v591_v4  ;;  %v625_v13 = vpack.c.bf16 %v32_v11, %v26_v10  ;;  %v43_v14 = vld [vmem:[%s1345_s1 + $0x98] sm:$0xff]  ;;  %v45_v16 = vld [vmem:[%s1345_s1 + $0xa8] sm:$0xff]  ;;  %v36_v19 = vld [vmem:[%s1345_s1 + $0x60] sm:$0xff] }
   0x5   :  { %v39_v15 = vld [vmem:[%s1345_s1 + $0x78] sm:$0xff]  ;;  %624 = vmatprep.subr.bf16.mxu1 %v623_v8  ;;  %594 = vmatpush1.bf16.msra.mxu0 %v593_v9  ;;  %v595_v17 = vpack.c.bf16 %v43_v14, %v37_v12  ;;  %v42_v20 = vld [vmem:[%s1345_s1 + $0x90] sm:$0xff]  ;;  %v44_v23 = vld [vmem:[%s1345_s1 + $0xa0] sm:$0xff] }
   0x6   :  { %v627_v18 = vpack.c.bf16 %v45_v16, %v39_v15  ;;  %v38_v21 = vld [vmem:[%s1345_s1 + $0x70] sm:$0xff]  ;;  %626 = vmatpush1.bf16.msra.mxu1 %v625_v13  ;;  %v597_v22 = vpack.c.bf16 %v42_v20, %v36_v19  ;;  %v49_v24 = vld [vmem:[%s1345_s1 + $0xc8] sm:$0xff]  ;;  %v55_v25 = vld [vmem:[%s1345_s1 + $0xf8] sm:$0xff] }
   0x7   :  { %596 = vmatprep.subr.bf16.mxu0 %v595_v17  ;;  %v629_v26 = vpack.c.bf16 %v44_v23, %v38_v21  ;;  %v599_v27 = vpack.c.bf16 %v55_v25, %v49_v24  ;;  %v51_v28 = vld [vmem:[%s1345_s1 + $0xd8] sm:$0xff]  ;;  %v57_v29 = vld [vmem:[%s1345_s1 + $0x108] sm:$0xff]  ;;  %v48_v30 = vld [vmem:[%s1345_s1 + $0xc0] sm:$0xff] }
   0x8   :  { %628 = vmatprep.subr.bf16.mxu1 %v627_v18  ;;  %v631_v31 = vpack.c.bf16 %v57_v29, %v51_v28  ;;  %v54_v32 = vld [vmem:[%s1345_s1 + $0xf0] sm:$0xff]  ;;  %v56_v34 = vld [vmem:[%s1345_s1 + $0x100] sm:$0xff]  ;;  %v61_v36 = vld [vmem:[%s1345_s1 + $0x128] sm:$0xff] }
   0x9   :  { %v50_v33 = vld [vmem:[%s1345_s1 + $0xd0] sm:$0xff]  ;;  %598 = vmatpush1.bf16.msra.mxu0 %v597_v22  ;;  %v601_v35 = vpack.c.bf16 %v54_v32, %v48_v30  ;;  %v67_v37 = vld [vmem:[%s1345_s1 + $0x158] sm:$0xff]  ;;  %v69_v41 = vld [vmem:[%s1345_s1 + $0x168] sm:$0xff] }
   0xa   :  { %v63_v38 = vld [vmem:[%s1345_s1 + $0x138] sm:$0xff]  ;;  %630 = vmatpush1.bf16.msra.mxu1 %v629_v26  ;;  %600 = vmatprep.subr.bf16.mxu0 %v599_v27  ;;  %v633_v39 = vpack.c.bf16 %v56_v34, %v50_v33  ;;  %v603_v40 = vpack.c.bf16 %v67_v37, %v61_v36  ;;  %v60_v42 = vld [vmem:[%s1345_s1 + $0x120] sm:$0xff]  ;;  %v66_v43 = vld [vmem:[%s1345_s1 + $0x150] sm:$0xff] }
   0xb   :  { %632 = vmatprep.subr.bf16.mxu1 %v631_v31  ;;  %v635_v44 = vpack.c.bf16 %v69_v41, %v63_v38  ;;  %v62_v45 = vld [vmem:[%s1345_s1 + $0x130] sm:$0xff]  ;;  %v68_v46 = vld [vmem:[%s1345_s1 + $0x160] sm:$0xff]  ;;  %v73_v47 = vld [vmem:[%s1345_s1 + $0x188] sm:$0xff]  ;;  %v605_v51 = vpack.c.bf16 %v66_v43, %v60_v42 }
   0xc   :  { %v79_v48 = vld [vmem:[%s1345_s1 + $0x1b8] sm:$0xff]  ;;  %v81_v50 = vld [vmem:[%s1345_s1 + $0x1c8] sm:$0xff]  ;;  %v637_v52 = vpack.c.bf16 %v68_v46, %v62_v45  ;;  %v72_v54 = vld [vmem:[%s1345_s1 + $0x180] sm:$0xff] }
   0xd   :  { %v75_v49 = vld [vmem:[%s1345_s1 + $0x198] sm:$0xff]  ;;  %602 = vmatpush1.bf16.msra.mxu0 %v601_v35  ;;  %v607_v53 = vpack.c.bf16 %v79_v48, %v73_v47  ;;  %v78_v55 = vld [vmem:[%s1345_s1 + $0x1b0] sm:$0xff]  ;;  %v80_v58 = vld [vmem:[%s1345_s1 + $0x1c0] sm:$0xff] }
   0xe   :  { %634 = vmatpush1.bf16.msra.mxu1 %v633_v39  ;;  %604 = vmatprep.subr.bf16.mxu0 %v603_v40  ;;  %v74_v56 = vld [vmem:[%s1345_s1 + $0x190] sm:$0xff]  ;;  %v639_v57 = vpack.c.bf16 %v81_v50, %v75_v49  ;;  %v85_v59 = vld [vmem:[%s1345_s1 + $0x1e8] sm:$0xff]  ;;  %v91_v60 = vld [vmem:[%s1345_s1 + $0x218] sm:$0xff]  ;;  %v609_v63 = vpack.c.bf16 %v78_v55, %v72_v54 }
   0xf   :  { %636 = vmatprep.subr.bf16.mxu1 %v635_v44  ;;  %v87_v61 = vld [vmem:[%s1345_s1 + $0x1f8] sm:$0xff]  ;;  %v93_v62 = vld [vmem:[%s1345_s1 + $0x228] sm:$0xff]  ;;  %v641_v0 = vpack.c.bf16 %v80_v58, %v74_v56  ;;  %v611_v1 = vpack.c.bf16 %v91_v60, %v85_v59  ;;  %v84_v2 = vld [vmem:[%s1345_s1 + $0x1e0] sm:$0xff] }
  0x10   :  { %v90_v4 = vld [vmem:[%s1345_s1 + $0x210] sm:$0xff]  ;;  %v643_v6 = vpack.c.bf16 %v93_v62, %v87_v61  ;;  %v92_v7 = vld [vmem:[%s1345_s1 + $0x220] sm:$0xff]  ;;  %v97_v8 = vld [vmem:[%s1345_s1 + $0x248] sm:$0xff] }
  0x11   :  { %606 = vmatpush1.bf16.msra.mxu0 %v605_v51  ;;  %v86_v5 = vld [vmem:[%s1345_s1 + $0x1f0] sm:$0xff]  ;;  %v103_v9 = vld [vmem:[%s1345_s1 + $0x278] sm:$0xff]  ;;  %v105_v11 = vld [vmem:[%s1345_s1 + $0x288] sm:$0xff]  ;;  %v613_v12 = vpack.c.bf16 %v90_v4, %v84_v2 }
  0x12   :  { %638 = vmatpush1.bf16.msra.mxu1 %v637_v52  ;;  %608 = vmatprep.subr.bf16.mxu0 %v607_v53  ;;  %v99_v10 = vld [vmem:[%s1345_s1 + $0x258] sm:$0xff]  ;;  %v645_v13 = vpack.c.bf16 %v92_v7, %v86_v5  ;;  %v615_v14 = vpack.c.bf16 %v103_v9, %v97_v8  ;;  %v96_v15 = vld [vmem:[%s1345_s1 + $0x240] sm:$0xff]  ;;  %v102_v16 = vld [vmem:[%s1345_s1 + $0x270] sm:$0xff] }
  0x13   :  { %640 = vmatprep.subr.bf16.mxu1 %v639_v57  ;;  %v98_v17 = vld [vmem:[%s1345_s1 + $0x250] sm:$0xff]  ;;  %v647_v18 = vpack.c.bf16 %v105_v11, %v99_v10  ;;  %v104_v19 = vld [vmem:[%s1345_s1 + $0x280] sm:$0xff]  ;;  %v109_v20 = vld [vmem:[%s1345_s1 + $0x2a8] sm:$0xff]  ;;  %v617_v24 = vpack.c.bf16 %v102_v16, %v96_v15 }
  0x14   :  { %v115_v21 = vld [vmem:[%s1345_s1 + $0x2d8] sm:$0xff]  ;;  %v117_v23 = vld [vmem:[%s1345_s1 + $0x2e8] sm:$0xff]  ;;  %v649_v25 = vpack.c.bf16 %v104_v19, %v98_v17  ;;  %v108_v27 = vld [vmem:[%s1345_s1 + $0x2a0] sm:$0xff] }
  0x15   :  { %610 = vmatpush1.bf16.msra.mxu0 %v609_v63  ;;  %v111_v22 = vld [vmem:[%s1345_s1 + $0x2b8] sm:$0xff]  ;;  %v619_v26 = vpack.c.bf16 %v115_v21, %v109_v20  ;;  %v114_v28 = vld [vmem:[%s1345_s1 + $0x2d0] sm:$0xff]  ;;  %v116_v31 = vld [vmem:[%s1345_s1 + $0x2e0] sm:$0xff] }
  0x16   :  { %642 = vmatpush1.bf16.msra.mxu1 %v641_v0  ;;  %612 = vmatprep.subr.bf16.mxu0 %v611_v1  ;;  %v110_v29 = vld [vmem:[%s1345_s1 + $0x2b0] sm:$0xff]  ;;  %v651_v30 = vpack.c.bf16 %v117_v23, %v111_v22  ;;  %v29_v32 = vld [vmem:[%s1345_s1 + $0x28] sm:$0xff]  ;;  %v35_v33 = vld [vmem:[%s1345_s1 + $0x58] sm:$0xff]  ;;  %v621_v34 = vpack.c.bf16 %v114_v28, %v108_v27 }
  0x17   :  { %644 = vmatprep.subr.bf16.mxu1 %v643_v6  ;;  %v653_v35 = vpack.c.bf16 %v116_v31, %v110_v29  ;;  %v655_v36 = vpack.c.bf16 %v35_v33, %v29_v32  ;;  %v28_v37 = vld [vmem:[%s1345_s1 + $0x20] sm:$0xff]  ;;  %v34_v38 = vld [vmem:[%s1345_s1 + $0x50] sm:$0xff]  ;;  %v41_v39 = vld [vmem:[%s1345_s1 + $0x88] sm:$0xff]  ;;  %v122_v29 = vlaneseq }
  0x18   :  { %v47_v40 = vld [vmem:[%s1345_s1 + $0xb8] sm:$0xff]  ;;  %v940_v41 = vld [vmem:[%s1346_s0] sm:$0xff]  ;;  %v657_v42 = vpack.c.bf16 %v34_v38, %v28_v37  ;;  %v46_v44 = vld [vmem:[%s1345_s1 + $0xb0] sm:$0xff] }
  0x19   :  { %614 = vmatpush1.bf16.msra.mxu0 %v613_v12  ;;  %v40_v43 = vld [vmem:[%s1345_s1 + $0x80] sm:$0xff]  ;;  %v659_v45 = vpack.c.bf16 %v47_v40, %v41_v39  ;;  %v53_v46 = vld [vmem:[%s1345_s1 + $0xe8] sm:$0xff]  ;;  %v59_v47 = vld [vmem:[%s1345_s1 + $0x118] sm:$0xff] }
  0x1a   :  { %646 = vmatpush1.bf16.msra.mxu1 %v645_v13  ;;  %616 = vmatprep.subr.bf16.mxu0 %v615_v14  ;;  %v959_v48 = vld [vmem:[%s1346_s0 + $0x8] sm:$0xff]  ;;  %v661_v49 = vpack.c.bf16 %v46_v44, %v40_v43  ;;  %v663_v50 = vpack.c.bf16 %v59_v47, %v53_v46  ;;  %v52_v51 = vld [vmem:[%s1345_s1 + $0xe0] sm:$0xff]  ;;  %v58_v52 = vld [vmem:[%s1345_s1 + $0x110] sm:$0xff] }
  0x1b   :  { %648 = vmatprep.subr.bf16.mxu1 %v647_v18  ;;  %v65_v53 = vld [vmem:[%s1345_s1 + $0x148] sm:$0xff]  ;;  %v71_v54 = vld [vmem:[%s1345_s1 + $0x178] sm:$0xff]  ;;  %v980_v55 = vld [vmem:[%s1346_s0 + $0x10] sm:$0xff]  ;;  %v665_v56 = vpack.c.bf16 %v58_v52, %v52_v51 }
  0x1c   :  { %v667_v57 = vpack.c.bf16 %v71_v54, %v65_v53  ;;  %v64_v58 = vld [vmem:[%s1345_s1 + $0x140] sm:$0xff]  ;;  %v70_v59 = vld [vmem:[%s1345_s1 + $0x170] sm:$0xff]  ;;  %v77_v60 = vld [vmem:[%s1345_s1 + $0x1a8] sm:$0xff] }
  0x1d   :  { %618 = vmatpush1.bf16.msra.mxu0 %v617_v24  ;;  %v83_v61 = vld [vmem:[%s1345_s1 + $0x1d8] sm:$0xff]  ;;  %v669_v63 = vpack.c.bf16 %v70_v59, %v64_v58  ;;  %v76_v1 = vld [vmem:[%s1345_s1 + $0x1a0] sm:$0xff]  ;;  %v82_v2 = vld [vmem:[%s1345_s1 + $0x1d0] sm:$0xff] }
  0x1e   :  { %650 = vmatpush1.bf16.msra.mxu1 %v649_v25  ;;  %620 = vmatprep.subr.bf16.mxu0 %v619_v26  ;;  %v1002_v62 = vld [vmem:[%s1346_s0 + $0x18] sm:$0xff]  ;;  %v671_v0 = vpack.c.bf16 %v83_v61, %v77_v60  ;;  %v89_v4 = vld [vmem:[%s1345_s1 + $0x208] sm:$0xff]  ;;  %v1023_v6 = vld [vmem:[%s1346_s0 + $0x20] sm:$0xff]  ;;  %v673_v7 = vpack.c.bf16 %v82_v2, %v76_v1 }
  0x1f   :  { %652 = vmatprep.subr.bf16.mxu1 %v651_v30  ;;  %v95_v5 = vld [vmem:[%s1345_s1 + $0x238] sm:$0xff]  ;;  %v88_v9 = vld [vmem:[%s1345_s1 + $0x200] sm:$0xff]  ;;  %v94_v10 = vld [vmem:[%s1345_s1 + $0x230] sm:$0xff]  ;;  %v1098_v30 = vshrl.u32 %v122_v29, 7 }
  0x20   :  { %v675_v8 = vpack.c.bf16 %v95_v5, %v89_v4  ;;  %v101_v11 = vld [vmem:[%s1345_s1 + $0x268] sm:$0xff]  ;;  %v107_v12 = vld [vmem:[%s1345_s1 + $0x298] sm:$0xff]  ;;  %v677_v14 = vpack.c.bf16 %v94_v10, %v88_v9  ;;  %v100_v16 = vld [vmem:[%s1345_s1 + $0x260] sm:$0xff] }
  0x21   :  { %622 = vmatpush1.bf16.msra.mxu0 %v621_v34  ;;  %v19_v13 = vld [vmem:[%s1346_s0 + $0x28] sm:$0xff]  ;;  %v679_v15 = vpack.c.bf16 %v107_v12, %v101_v11  ;;  %v106_v17 = vld [vmem:[%s1345_s1 + $0x290] sm:$0xff]  ;;  %v119_v19 = vld [vmem:[%s1345_s1 + $0x2f8] sm:$0xff]  ;;  %v124_v31 = vsub.s32 0, %v1098_v30  ;;  %v132_v33 = vsub.s32 2, %v1098_v30  ;;  %v128_v34 = vsub.s32 1, %v1098_v30 }
  0x22   :  { %654 = vmatpush1.bf16.msra.mxu1 %v653_v35  ;;  %656 = vmatprep.subr.bf16.mxu0 %v655_v36  ;;  %v113_v18 = vld [vmem:[%s1345_s1 + $0x2c8] sm:$0xff]  ;;  %v20_v20 = vld [vmem:[%s1346_s0 + $0x30] sm:$0xff]  ;;  %v681_v21 = vpack.c.bf16 %v106_v17, %v100_v16  ;;  %v112_v23 = vld [vmem:[%s1345_s1 + $0x2c0] sm:$0xff]  ;;  %v136_v35 = vsub.s32 3, %v1098_v30 }
  0x23   :  { %687 = vmatprep.subr.bf16.mxu1 %v655_v36  ;;  %v683_v22 = vpack.c.bf16 %v119_v19, %v113_v18  ;;  %v118_v24 = vld [vmem:[%s1345_s1 + $0x2f0] sm:$0xff]  ;;  %v21_v25 = vld [vmem:[%s1346_s0 + $0x38] sm:$0xff]  ;;  %v22_v27 = vld [vmem:[%s1346_s0 + $0x40] sm:$0xff] }
  0x24   :  { %217 = vmatmul.mubr.f32.vlgmr.msra.gmra.mrb[0].mxu0 %v940_v41  ;;  %v685_v26 = vpack.c.bf16 %v118_v24, %v112_v23  ;;  %v23_v28 = vld [vmem:[%s1346_s0 + $0x48] sm:$0xff]  ;;  %v1104_v32 = vld [vmem:[%s1347_s2] sm:$0x3f] }
  0x25   :  { %342 = vmatmul.mubr.f32.vlgmr.msra.gmra.mrb[0].mxu1 %v940_v41  ;;  %658 = vmatpush1.bf16.msra.mxu0 %v657_v42  ;;  %v1113_v36 = vrot.slane %v1104_v32, %v132_v33  ;;  %v1116_v37 = vrot.slane %v1104_v32, %v128_v34  ;;  %v1119_v38 = vrot.slane %v1104_v32, %v136_v35 }
  0x26   :  { %695 = vmatpush1.bf16.msra.mxu1 %v657_v42  ;;  %222 = vmatprep.mubr.f32.mxu0 %v704_v3 }
  0x27   :  { %347 = vmatprep.mubr.f32.mxu1 %v704_v3  ;;  %660 = vmatprep.subr.bf16.mxu0 %v659_v45 }
  0x28   :  { %223 = vmatmul.mubr.f32.gmra.mrb[2].mxu0 %v959_v48  ;;  %688 = vmatprep.subr.bf16.mxu1 %v659_v45 }
  0x29   :  { %348 = vmatmul.mubr.f32.gmra.mrb[2].mxu1 %v959_v48  ;;  %662 = vmatpush1.bf16.msra.mxu0 %v661_v49 }
  0x2a   :  { %696 = vmatpush1.bf16.msra.mxu1 %v661_v49  ;;  %228 = vmatprep.mubr.f32.mxu0 %v704_v3 }
  0x2b   :  { %353 = vmatprep.mubr.f32.mxu1 %v704_v3  ;;  %664 = vmatprep.subr.bf16.mxu0 %v663_v50 }
  0x2c   :  { %229 = vmatmul.mubr.f32.gmra.mrb[4].mxu0 %v980_v55  ;;  %689 = vmatprep.subr.bf16.mxu1 %v663_v50 }
  0x2d   :  { %354 = vmatmul.mubr.f32.gmra.mrb[4].mxu1 %v980_v55  ;;  %234 = vmatprep.mubr.f32.mxu0 %v704_v3 }
  0x2e   :  { %359 = vmatprep.mubr.f32.mxu1 %v704_v3  ;;  %666 = vmatpush1.bf16.msra.mxu0 %v665_v56 }
  0x2f   :  { %697 = vmatpush1.bf16.msra.mxu1 %v665_v56  ;;  %668 = vmatprep.subr.bf16.mxu0 %v667_v57 }
  0x30   :  { %235 = vmatmul.mubr.f32.gmra.mrb[6].mxu0 %v1002_v62  ;;  %690 = vmatprep.subr.bf16.mxu1 %v667_v57 }
  0x31   :  { %360 = vmatmul.mubr.f32.gmra.mrb[6].mxu1 %v1002_v62  ;;  %240 = vmatprep.mubr.f32.mxu0 %v704_v3 }
  0x32   :  { %365 = vmatprep.mubr.f32.mxu1 %v704_v3  ;;  %670 = vmatpush1.bf16.msra.mxu0 %v669_v63 }
  0x33   :  { %698 = vmatpush1.bf16.msra.mxu1 %v669_v63  ;;  %672 = vmatprep.subr.bf16.mxu0 %v671_v0 }
  0x34   :  { %241 = vmatmul.mubr.f32.gmra.mrb[8].mxu0 %v1023_v6  ;;  %691 = vmatprep.subr.bf16.mxu1 %v671_v0 }
  0x35   :  { %366 = vmatmul.mubr.f32.gmra.mrb[8].mxu1 %v1023_v6  ;;  %246 = vmatprep.mubr.f32.mxu0 %v704_v3 }
  0x36   :  { %371 = vmatprep.mubr.f32.mxu1 %v704_v3  ;;  %674 = vmatpush1.bf16.msra.mxu0 %v673_v7 }
  0x37   :  { %699 = vmatpush1.bf16.msra.mxu1 %v673_v7  ;;  %676 = vmatprep.subr.bf16.mxu0 %v675_v8 }
  0x38   :  { %247 = vmatmul.mubr.f32.gmra.mrb[10].mxu0 %v19_v13  ;;  %692 = vmatprep.subr.bf16.mxu1 %v675_v8 }
  0x39   :  { %372 = vmatmul.mubr.f32.gmra.mrb[10].mxu1 %v19_v13  ;;  %252 = vmatprep.mubr.f32.mxu0 %v704_v3 }
  0x3a   :  { %377 = vmatprep.mubr.f32.mxu1 %v704_v3  ;;  %678 = vmatpush1.bf16.msra.mxu0 %v677_v14 }
  0x3b   :  { %700 = vmatpush1.bf16.msra.mxu1 %v677_v14  ;;  %680 = vmatprep.subr.bf16.mxu0 %v679_v15 }
  0x3c   :  { %253 = vmatmul.mubr.f32.gmra.mrb[12].mxu0 %v20_v20  ;;  %693 = vmatprep.subr.bf16.mxu1 %v679_v15 }
  0x3d   :  { %378 = vmatmul.mubr.f32.gmra.mrb[12].mxu1 %v20_v20  ;;  %258 = vmatprep.mubr.f32.mxu0 %v704_v3 }
  0x3e   :  { %383 = vmatprep.mubr.f32.mxu1 %v704_v3  ;;  %682 = vmatpush1.bf16.msra.mxu0 %v681_v21 }
  0x3f   :  { %701 = vmatpush1.bf16.msra.mxu1 %v681_v21  ;;  %684 = vmatprep.subr.bf16.mxu0 %v683_v22 }
  0x40   :  { %259 = vmatmul.mubr.f32.gmra.mrb[14].mxu0 %v21_v25  ;;  %694 = vmatprep.subr.bf16.mxu1 %v683_v22 }
  0x41   :  { %384 = vmatmul.mubr.f32.gmra.mrb[14].mxu1 %v21_v25  ;;  %264 = vmatprep.mubr.f32.mxu0 %v704_v3 }
  0x42   :  { %389 = vmatprep.mubr.f32.mxu1 %v704_v3  ;;  %686 = vmatpush1.bf16.msra.mxu0 %v685_v26 }
  0x43   :  { %702 = vmatpush1.bf16.msra.mxu1 %v685_v26 }
  0x44   :  { %265 = vmatmul.mubr.f32.gmra.mrb[16].mxu0 %v22_v27 }
  0x45   :  { %390 = vmatmul.mubr.f32.gmra.mrb[16].mxu1 %v22_v27  ;;  %270 = vmatprep.mubr.f32.mxu0 %v704_v3 }
  0x46   :  { %395 = vmatprep.mubr.f32.mxu1 %v704_v3 }
  0x48   :  { %271 = vmatmul.mubr.f32.gmra.mrb[18].mxu0 %v23_v28 }
  0x49   :  { %396 = vmatmul.mubr.f32.gmra.mrb[18].mxu1 %v23_v28  ;;  %466 = vmatprep.mubr.f32.mxu0 %v704_v3 }
  0x4a   :  { %496 = vmatprep.mubr.f32.mxu1 %v704_v3 }
  0x4c   :  { %467 = vmatmul.mubr.f32.vlgmr.msra.gmra.mrb[20].mxu0 %v940_v41 }
  0x4d   :  { %497 = vmatmul.mubr.f32.vlgmr.msra.gmra.mrb[20].mxu1 %v19_v13  ;;  %472 = vmatprep.mubr.f32.mxu0 %v704_v3 }
  0x4e   :  { %502 = vmatprep.mubr.f32.mxu1 %v704_v3 }
  0x50   :  { %473 = vmatmul.mubr.f32.gmra.mrb[22].mxu0 %v959_v48 }
  0x51   :  { %503 = vmatmul.mubr.f32.gmra.mrb[22].mxu1 %v20_v20  ;;  %478 = vmatprep.mubr.f32.mxu0 %v704_v3 }
  0x52   :  { %508 = vmatprep.mubr.f32.mxu1 %v704_v3 }
  0x54   :  { %479 = vmatmul.mubr.f32.gmra.mrb[24].mxu0 %v980_v55 }
  0x55   :  { %509 = vmatmul.mubr.f32.gmra.mrb[24].mxu1 %v21_v25  ;;  %484 = vmatprep.mubr.f32.mxu0 %v704_v3 }
  0x56   :  { %514 = vmatprep.mubr.f32.mxu1 %v704_v3 }
  0x58   :  { %485 = vmatmul.mubr.f32.gmra.mrb[26].mxu0 %v1002_v62 }
  0x59   :  { %515 = vmatmul.mubr.f32.gmra.mrb[26].mxu1 %v22_v27  ;;  %490 = vmatprep.mubr.f32.mxu0 %v704_v3 }
  0x5a   :  { %520 = vmatprep.mubr.f32.mxu1 %v704_v3  ;;  %v1110_v3 = vrot.slane %v1104_v32, %v124_v31 }
  0x5c   :  { %491 = vmatmul.mubr.f32.gmra.mrb[28].mxu0 %v1023_v6 }
  0x5d   :  { %521 = vmatmul.mubr.f32.gmra.mrb[28].mxu1 %v23_v28 }
  0xf7   :  { %v218_v39 = vpop.f32.mrb[0].mxu0 }
  0xf8   :  { %v219_v40 = vadd.f32 %v218_v39, %v1110_v3  ;;  %v343_v41 = vpop.f32.mrb[0].mxu1  ;;  %v220_v42 = vpop.f32.mrb[1].mxu0 }
  0xf9   :  { %v344_v43 = vadd.f32 %v343_v41, %v1113_v36  ;;  %v221_v44 = vadd.f32 %v220_v42, %v1116_v37  ;;  %v345_v45 = vpop.f32.mrb[1].mxu1 }
  0xfa   :  { %527 = vst [vmem:[%s1348_s3] sm:$0xff] %v219_v40  ;;  %v346_v46 = vadd.f32 %v345_v45, %v1119_v38 }
  0xfb   :  { %529 = vst [vmem:[%s1348_s3 + $0x10] sm:$0xff] %v344_v43  ;;  %528 = vst [vmem:[%s1348_s3 + $0x8] sm:$0xff] %v221_v44  ;;  %v224_v47 = vpop.f32.mrb[2].mxu0 }
  0xfc   :  { %530 = vst [vmem:[%s1348_s3 + $0x18] sm:$0xff] %v346_v46  ;;  %v225_v48 = vadd.f32 %v224_v47, %v1110_v3  ;;  %v349_v49 = vpop.f32.mrb[2].mxu1  ;;  %v226_v50 = vpop.f32.mrb[3].mxu0 }
  0xfd   :  { %v350_v51 = vadd.f32 %v349_v49, %v1113_v36  ;;  %v227_v52 = vadd.f32 %v226_v50, %v1116_v37  ;;  %v351_v53 = vpop.f32.mrb[3].mxu1  ;;  %v140_v49 = vsub.s32 4, %v1098_v30 }
  0xfe   :  { %533 = vst [vmem:[%s1348_s3 + $0x30] sm:$0xff] %v225_v48  ;;  %v352_v54 = vadd.f32 %v351_v53, %v1119_v38  ;;  %v144_v53 = vsub.s32 5, %v1098_v30 }
  0xff   :  { %535 = vst [vmem:[%s1348_s3 + $0x40] sm:$0xff] %v350_v51  ;;  %534 = vst [vmem:[%s1348_s3 + $0x38] sm:$0xff] %v227_v52  ;;  %v230_v55 = vpop.f32.mrb[4].mxu0 }
 0x100   :  { %536 = vst [vmem:[%s1348_s3 + $0x48] sm:$0xff] %v352_v54  ;;  %v231_v56 = vadd.f32 %v230_v55, %v1110_v3  ;;  %v355_v57 = vpop.f32.mrb[4].mxu1  ;;  %v232_v58 = vpop.f32.mrb[5].mxu0 }
 0x101   :  { %v356_v59 = vadd.f32 %v355_v57, %v1113_v36  ;;  %v233_v60 = vadd.f32 %v232_v58, %v1116_v37  ;;  %v357_v61 = vpop.f32.mrb[5].mxu1  ;;  %v141_v58 = vrot.slane %v1104_v32, %v140_v49 }
 0x102   :  { %539 = vst [vmem:[%s1348_s3 + $0x60] sm:$0xff] %v231_v56  ;;  %v358_v62 = vadd.f32 %v357_v61, %v1119_v38 }
 0x103   :  { %541 = vst [vmem:[%s1348_s3 + $0x70] sm:$0xff] %v356_v59  ;;  %540 = vst [vmem:[%s1348_s3 + $0x68] sm:$0xff] %v233_v60  ;;  %v236_v63 = vpop.f32.mrb[6].mxu0 }
 0x104   :  { %542 = vst [vmem:[%s1348_s3 + $0x78] sm:$0xff] %v358_v62  ;;  %v237_v0 = vadd.f32 %v236_v63, %v1110_v3  ;;  %v361_v1 = vpop.f32.mrb[6].mxu1  ;;  %v238_v2 = vpop.f32.mrb[7].mxu0  ;;  %v145_v62 = vrot.slane %v1104_v32, %v144_v53 }
 0x105   :  { %v362_v4 = vadd.f32 %v361_v1, %v1113_v36  ;;  %v239_v5 = vadd.f32 %v238_v2, %v1116_v37  ;;  %v363_v6 = vpop.f32.mrb[7].mxu1 }
 0x106   :  { %545 = vst [vmem:[%s1348_s3 + $0x90] sm:$0xff] %v237_v0  ;;  %v364_v7 = vadd.f32 %v363_v6, %v1119_v38 }
 0x107   :  { %547 = vst [vmem:[%s1348_s3 + $0xa0] sm:$0xff] %v362_v4  ;;  %546 = vst [vmem:[%s1348_s3 + $0x98] sm:$0xff] %v239_v5  ;;  %v242_v8 = vpop.f32.mrb[8].mxu0 }
 0x108   :  { %548 = vst [vmem:[%s1348_s3 + $0xa8] sm:$0xff] %v364_v7  ;;  %v243_v9 = vadd.f32 %v242_v8, %v1110_v3  ;;  %v367_v10 = vpop.f32.mrb[8].mxu1  ;;  %v244_v11 = vpop.f32.mrb[9].mxu0 }
 0x109   :  { %v368_v12 = vadd.f32 %v367_v10, %v1113_v36  ;;  %v245_v13 = vadd.f32 %v244_v11, %v1116_v37  ;;  %v369_v14 = vpop.f32.mrb[9].mxu1 }
 0x10a   :  { %551 = vst [vmem:[%s1348_s3 + $0xc0] sm:$0xff] %v243_v9  ;;  %v370_v15 = vadd.f32 %v369_v14, %v1119_v38 }
 0x10b   :  { %553 = vst [vmem:[%s1348_s3 + $0xd0] sm:$0xff] %v368_v12  ;;  %552 = vst [vmem:[%s1348_s3 + $0xc8] sm:$0xff] %v245_v13  ;;  %v248_v16 = vpop.f32.mrb[10].mxu0 }
 0x10c   :  { %554 = vst [vmem:[%s1348_s3 + $0xd8] sm:$0xff] %v370_v15  ;;  %v249_v17 = vadd.f32 %v248_v16, %v1110_v3  ;;  %v373_v18 = vpop.f32.mrb[10].mxu1  ;;  %v250_v19 = vpop.f32.mrb[11].mxu0 }
 0x10d   :  { %v374_v20 = vadd.f32 %v373_v18, %v1113_v36  ;;  %v251_v21 = vadd.f32 %v250_v19, %v1116_v37  ;;  %v375_v22 = vpop.f32.mrb[11].mxu1 }
 0x10e   :  { %557 = vst [vmem:[%s1348_s3 + $0xf0] sm:$0xff] %v249_v17  ;;  %v376_v23 = vadd.f32 %v375_v22, %v1119_v38 }
 0x10f   :  { %559 = vst [vmem:[%s1348_s3 + $0x100] sm:$0xff] %v374_v20  ;;  %558 = vst [vmem:[%s1348_s3 + $0xf8] sm:$0xff] %v251_v21  ;;  %v254_v24 = vpop.f32.mrb[12].mxu0 }
 0x110   :  { %560 = vst [vmem:[%s1348_s3 + $0x108] sm:$0xff] %v376_v23  ;;  %v255_v25 = vadd.f32 %v254_v24, %v1110_v3  ;;  %v379_v26 = vpop.f32.mrb[12].mxu1  ;;  %v256_v27 = vpop.f32.mrb[13].mxu0 }
 0x111   :  { %v380_v28 = vadd.f32 %v379_v26, %v1113_v36  ;;  %v257_v29 = vadd.f32 %v256_v27, %v1116_v37  ;;  %v381_v31 = vpop.f32.mrb[13].mxu1 }
 0x112   :  { %563 = vst [vmem:[%s1348_s3 + $0x120] sm:$0xff] %v255_v25  ;;  %v382_v33 = vadd.f32 %v381_v31, %v1119_v38 }
 0x113   :  { %565 = vst [vmem:[%s1348_s3 + $0x130] sm:$0xff] %v380_v28  ;;  %564 = vst [vmem:[%s1348_s3 + $0x128] sm:$0xff] %v257_v29  ;;  %v260_v34 = vpop.f32.mrb[14].mxu0 }
 0x114   :  { %566 = vst [vmem:[%s1348_s3 + $0x138] sm:$0xff] %v382_v33  ;;  %v261_v35 = vadd.f32 %v260_v34, %v1110_v3  ;;  %v385_v39 = vpop.f32.mrb[14].mxu1  ;;  %v262_v40 = vpop.f32.mrb[15].mxu0 }
 0x115   :  { %v386_v41 = vadd.f32 %v385_v39, %v1113_v36  ;;  %v263_v42 = vadd.f32 %v262_v40, %v1116_v37  ;;  %v387_v43 = vpop.f32.mrb[15].mxu1 }
 0x116   :  { %569 = vst [vmem:[%s1348_s3 + $0x150] sm:$0xff] %v261_v35  ;;  %v388_v44 = vadd.f32 %v387_v43, %v1119_v38 }
 0x117   :  { %571 = vst [vmem:[%s1348_s3 + $0x160] sm:$0xff] %v386_v41  ;;  %570 = vst [vmem:[%s1348_s3 + $0x158] sm:$0xff] %v263_v42  ;;  %v266_v45 = vpop.f32.mrb[16].mxu0 }
 0x118   :  { %572 = vst [vmem:[%s1348_s3 + $0x168] sm:$0xff] %v388_v44  ;;  %v267_v46 = vadd.f32 %v266_v45, %v1110_v3  ;;  %v391_v47 = vpop.f32.mrb[16].mxu1  ;;  %v268_v48 = vpop.f32.mrb[17].mxu0 }
 0x119   :  { %v392_v50 = vadd.f32 %v391_v47, %v1113_v36  ;;  %v269_v51 = vadd.f32 %v268_v48, %v1116_v37  ;;  %v393_v52 = vpop.f32.mrb[17].mxu1 }
 0x11a   :  { %575 = vst [vmem:[%s1348_s3 + $0x180] sm:$0xff] %v267_v46  ;;  %v394_v54 = vadd.f32 %v393_v52, %v1119_v38 }
 0x11b   :  { %577 = vst [vmem:[%s1348_s3 + $0x190] sm:$0xff] %v392_v50  ;;  %576 = vst [vmem:[%s1348_s3 + $0x188] sm:$0xff] %v269_v51  ;;  %v272_v55 = vpop.f32.mrb[18].mxu0 }
 0x11c   :  { %578 = vst [vmem:[%s1348_s3 + $0x198] sm:$0xff] %v394_v54  ;;  %v273_v30 = vadd.f32 %v272_v55, %v1110_v3  ;;  %v397_v56 = vpop.f32.mrb[18].mxu1  ;;  %v274_v57 = vpop.f32.mrb[19].mxu0 }
 0x11d   :  { %v398_v59 = vadd.f32 %v397_v56, %v1113_v36  ;;  %v275_v60 = vadd.f32 %v274_v57, %v1116_v37  ;;  %v399_v61 = vpop.f32.mrb[19].mxu1 }
 0x11e   :  { %581 = vst [vmem:[%s1348_s3 + $0x1b0] sm:$0xff] %v273_v30  ;;  %v400_v63 = vadd.f32 %v399_v61, %v1119_v38 }
 0x11f   :  { %583 = vst [vmem:[%s1348_s3 + $0x1c0] sm:$0xff] %v398_v59  ;;  %582 = vst [vmem:[%s1348_s3 + $0x1b8] sm:$0xff] %v275_v60  ;;  %v468_v3 = vpop.f32.mrb[20].mxu0 }
 0x120   :  { %584 = vst [vmem:[%s1348_s3 + $0x1c8] sm:$0xff] %v400_v63  ;;  %v469_v32 = vadd.f32 %v468_v3, %v141_v58  ;;  %v498_v36 = vpop.f32.mrb[20].mxu1  ;;  %v470_v37 = vpop.f32.mrb[21].mxu0 }
 0x121   :  { %v499_v0 = vadd.f32 %v498_v36, %v141_v58  ;;  %v471_v1 = vadd.f32 %v470_v37, %v145_v62  ;;  %v500_v2 = vpop.f32.mrb[21].mxu1 }
 0x122   :  { %531 = vst [vmem:[%s1348_s3 + $0x20] sm:$0xff] %v469_v32  ;;  %v501_v38 = vadd.f32 %v500_v2, %v145_v62 }
 0x123   :  { %561 = vst [vmem:[%s1348_s3 + $0x110] sm:$0xff] %v499_v0  ;;  %532 = vst [vmem:[%s1348_s3 + $0x28] sm:$0xff] %v471_v1  ;;  %v474_v4 = vpop.f32.mrb[22].mxu0 }
 0x124   :  { %562 = vst [vmem:[%s1348_s3 + $0x118] sm:$0xff] %v501_v38  ;;  %v475_v5 = vadd.f32 %v474_v4, %v141_v58  ;;  %v504_v6 = vpop.f32.mrb[22].mxu1  ;;  %v476_v7 = vpop.f32.mrb[23].mxu0 }
 0x125   :  { %v505_v8 = vadd.f32 %v504_v6, %v141_v58  ;;  %v477_v9 = vadd.f32 %v476_v7, %v145_v62  ;;  %v506_v10 = vpop.f32.mrb[23].mxu1 }
 0x126   :  { %537 = vst [vmem:[%s1348_s3 + $0x50] sm:$0xff] %v475_v5  ;;  %v507_v11 = vadd.f32 %v506_v10, %v145_v62 }
 0x127   :  { %567 = vst [vmem:[%s1348_s3 + $0x140] sm:$0xff] %v505_v8  ;;  %538 = vst [vmem:[%s1348_s3 + $0x58] sm:$0xff] %v477_v9  ;;  %v480_v12 = vpop.f32.mrb[24].mxu0 }
 0x128   :  { %568 = vst [vmem:[%s1348_s3 + $0x148] sm:$0xff] %v507_v11  ;;  %v481_v13 = vadd.f32 %v480_v12, %v141_v58  ;;  %v510_v14 = vpop.f32.mrb[24].mxu1  ;;  %v482_v15 = vpop.f32.mrb[25].mxu0 }
 0x129   :  { %v511_v16 = vadd.f32 %v510_v14, %v141_v58  ;;  %v483_v17 = vadd.f32 %v482_v15, %v145_v62  ;;  %v512_v18 = vpop.f32.mrb[25].mxu1 }
 0x12a   :  { %543 = vst [vmem:[%s1348_s3 + $0x80] sm:$0xff] %v481_v13  ;;  %v513_v19 = vadd.f32 %v512_v18, %v145_v62 }
 0x12b   :  { %573 = vst [vmem:[%s1348_s3 + $0x170] sm:$0xff] %v511_v16  ;;  %544 = vst [vmem:[%s1348_s3 + $0x88] sm:$0xff] %v483_v17  ;;  %v486_v20 = vpop.f32.mrb[26].mxu0 }
 0x12c   :  { %574 = vst [vmem:[%s1348_s3 + $0x178] sm:$0xff] %v513_v19  ;;  %v487_v21 = vadd.f32 %v486_v20, %v141_v58  ;;  %v516_v22 = vpop.f32.mrb[26].mxu1  ;;  %v488_v23 = vpop.f32.mrb[27].mxu0 }
 0x12d   :  { %v517_v24 = vadd.f32 %v516_v22, %v141_v58  ;;  %v489_v25 = vadd.f32 %v488_v23, %v145_v62  ;;  %v518_v26 = vpop.f32.mrb[27].mxu1 }
 0x12e   :  { %549 = vst [vmem:[%s1348_s3 + $0xb0] sm:$0xff] %v487_v21  ;;  %v519_v27 = vadd.f32 %v518_v26, %v145_v62 }
 0x12f   :  { %579 = vst [vmem:[%s1348_s3 + $0x1a0] sm:$0xff] %v517_v24  ;;  %550 = vst [vmem:[%s1348_s3 + $0xb8] sm:$0xff] %v489_v25  ;;  %v492_v28 = vpop.f32.mrb[28].mxu0 }
 0x130   :  { %580 = vst [vmem:[%s1348_s3 + $0x1a8] sm:$0xff] %v519_v27  ;;  %v493_v29 = vadd.f32 %v492_v28, %v141_v58  ;;  %v522_v31 = vpop.f32.mrb[28].mxu1  ;;  %v494_v33 = vpop.f32.mrb[29].mxu0 }
 0x131   :  { %v523_v34 = vadd.f32 %v522_v31, %v141_v58  ;;  %v495_v35 = vadd.f32 %v494_v33, %v145_v62  ;;  %v524_v39 = vpop.f32.mrb[29].mxu1 }
 0x132   :  { %555 = vst [vmem:[%s1348_s3 + $0xe0] sm:$0xff] %v493_v29  ;;  %v525_v40 = vadd.f32 %v524_v39, %v145_v62 }
 0x133   :  { %585 = vst [vmem:[%s1348_s3 + $0x1d0] sm:$0xff] %v523_v34  ;;  %556 = vst [vmem:[%s1348_s3 + $0xe8] sm:$0xff] %v495_v35 }
 0x134   :  { %586 = vst [vmem:[%s1348_s3 + $0x1d8] sm:$0xff] %v525_v40 }

// kernel: deepspeech_forward.10
= control target key start
LH: loop header
LB: loop body
LE: loop exit
PB: predicated region body
PF: predicated region fallthrough
CT: control target
= control target key end

     0   :  { %v834_v0 = vmov 0.0   ;;  %s853_s9 = smov 0   ;;  %s1262_s0 = inlined_call_operand.vmem [shape: f32[10,8,768], index: 0, kind: input, shape index: {}]   ;;  %s1263_s1 = inlined_call_operand.vmem [shape: f32[2,128,384], index: 1, kind: input, shape index: {}]   ;;  %s1264_s2 = inlined_call_operand.vmem [shape: f32[10,8,128], index: 2, kind: output, shape index: {}]  }
   0x1   :  { %11 = vst [vmem:[#allocation2] sm:$0xff] %v834_v0  ;;  %12 = vst [vmem:[#allocation3] sm:$0xff] %v834_v0 }
   0x2 LB: > { %v35_v1 = vld [vmem:[%s1263_s1 + $0x8] sm:$0xff]  ;;  %v38_v2 = vld [vmem:[%s1263_s1 + $0x20] sm:$0xff]  ;;  %v37_v5 = vld [vmem:[%s1263_s1 + $0x18] sm:$0xff]  ;;  %v835_v8 = vmov 0.0|0.0   ;;  %v836_v9 = vmov 0.0   ;;  %vm837_vm0 = vmmov 0   ;;  %s832_s9 = sphi %s853_s9, %s18_s9  }
   0x3   : > { %v34_v3 = vld [vmem:[%s1263_s1] sm:$0xff]  ;;  %v682_v4 = vpack.c.bf16 %v38_v2, %v35_v1  ;;  %v41_v6 = vld [vmem:[%s1263_s1 + $0x38] sm:$0xff]  ;;  %v44_v7 = vld [vmem:[%s1263_s1 + $0x50] sm:$0xff]  ;;  %714 = vmatprep.subr.bf16.mxu1 %v835_v8  ;;  %146 = vmatprep.mubr.f32.mxu0 %v836_v9  ;;  %s576_s13 = smul.u32 48, %s832_s9  ;;  %s19_s17 = ssub.s32 9, %s832_s9 }
   0x4   : > { %v684_v10 = vpack.c.bf16 %v37_v5, %v34_v3  ;;  %v686_v11 = vpack.c.bf16 %v44_v7, %v41_v6  ;;  %v40_v12 = vld [vmem:[%s1263_s1 + $0x30] sm:$0xff]  ;;  %v43_v13 = vld [vmem:[%s1263_s1 + $0x48] sm:$0xff]  ;;  %644 = vmatprep.mubr.msk.f32.mxu1 %vm837_vm0, %v836_v9  ;;  %v50_v15 = vld [vmem:[%s1263_s1 + $0x80] sm:$0xff]  ;;  %s577_s18 = smul.u32 48, %s19_s17  ;;  %s574_s22 = sshll.u32 %s832_s9, 3 }
   0x5   : > { %v47_v14 = vld [vmem:[%s1263_s1 + $0x68] sm:$0xff]  ;;  %683 = vmatprep.subr.bf16.mxu0 %v682_v4  ;;  %v688_v16 = vpack.c.bf16 %v43_v13, %v40_v12  ;;  %v46_v18 = vld [vmem:[%s1263_s1 + $0x60] sm:$0xff]  ;;  %v49_v19 = vld [vmem:[%s1263_s1 + $0x78] sm:$0xff]  ;;  %s22_s16 = scalar_lea.vmem %s1262_s0, %s576_s13  ;;  %s458_s25 = scalar_lea.vmem %s1264_s2, %s574_s22 }
   0x6   : > { %685 = vmatpush1.bf16.msra.mxu0 %v684_v10  ;;  %v690_v17 = vpack.c.bf16 %v50_v15, %v47_v14  ;;  %v53_v20 = vld [vmem:[%s1263_s1 + $0x98] sm:$0xff]  ;;  %v56_v21 = vld [vmem:[%s1263_s1 + $0xb0] sm:$0xff]  ;;  %v692_v22 = vpack.c.bf16 %v49_v19, %v46_v18  ;;  %v55_v25 = vld [vmem:[%s1263_s1 + $0xa8] sm:$0xff]  ;;  %s1186_s21 = scalar_lea.vmem %s1262_s0, %s577_s18  ;;  %s575_s26 = sshll.u32 %s19_s17, 3 }
   0x7   : > { %687 = vmatprep.subr.bf16.mxu0 %v686_v11  ;;  %v694_v23 = vpack.c.bf16 %v56_v21, %v53_v20  ;;  %v52_v24 = vld [vmem:[%s1263_s1 + $0x90] sm:$0xff]  ;;  %v59_v26 = vld [vmem:[%s1263_s1 + $0xc8] sm:$0xff]  ;;  %v62_v27 = vld [vmem:[%s1263_s1 + $0xe0] sm:$0xff]  ;;  %s461_s27 = scalar_lea.vmem [#allocation4], %s575_s26  ;;  %s18_s9 = sadd.s32 1, %s832_s9  }
   0x8   : > { %v36_v28 = vld [vmem:[%s1263_s1 + $0x10] sm:$0xff]  ;;  %v39_v29 = vld [vmem:[%s1263_s1 + $0x28] sm:$0xff]  ;;  %v42_v31 = vld [vmem:[%s1263_s1 + $0x40] sm:$0xff]  ;;  %v696_v32 = vpack.c.bf16 %v55_v25, %v52_v24  ;;  %v698_v34 = vpack.c.bf16 %v62_v27, %v59_v26  ;;  %p15_p0 = scmp.ge.s32.totalorder %s18_s9, 10  }
   0x9   : > { %v715_v30 = vpack.c.bf16 %v39_v29, %v36_v28  ;;  %v45_v33 = vld [vmem:[%s1263_s1 + $0x58] sm:$0xff]  ;;  %v58_v35 = vld [vmem:[%s1263_s1 + $0xc0] sm:$0xff]  ;;  %v68_v39 = vld [vmem:[%s1263_s1 + $0x110] sm:$0xff] }
   0xa   : > { %689 = vmatpush1.bf16.msra.mxu0 %v688_v16  ;;  %v61_v36 = vld [vmem:[%s1263_s1 + $0xd8] sm:$0xff]  ;;  %v718_v38 = vpack.c.bf16 %v45_v33, %v42_v31  ;;  %v48_v40 = vld [vmem:[%s1263_s1 + $0x70] sm:$0xff]  ;;  %v51_v41 = vld [vmem:[%s1263_s1 + $0x88] sm:$0xff] }
   0xb   : > { %691 = vmatprep.subr.bf16.mxu0 %v690_v17  ;;  %v65_v37 = vld [vmem:[%s1263_s1 + $0xf8] sm:$0xff]  ;;  %716 = vmatpush3.bf16.msra.mxu1 %v715_v30  ;;  %v700_v42 = vpack.c.bf16 %v61_v36, %v58_v35  ;;  %v64_v44 = vld [vmem:[%s1263_s1 + $0xf0] sm:$0xff]  ;;  %v67_v45 = vld [vmem:[%s1263_s1 + $0x108] sm:$0xff]  ;;  %v721_v47 = vpack.c.bf16 %v51_v41, %v48_v40 }
   0xc   : > { %717 = vmatprep.subr.bf16.mxu1 %v835_v8  ;;  %v702_v43 = vpack.c.bf16 %v68_v39, %v65_v37  ;;  %v71_v46 = vld [vmem:[%s1263_s1 + $0x128] sm:$0xff]  ;;  %v74_v48 = vld [vmem:[%s1263_s1 + $0x140] sm:$0xff]  ;;  %v57_v50 = vld [vmem:[%s1263_s1 + $0xb8] sm:$0xff]  ;;  %v704_v51 = vpack.c.bf16 %v67_v45, %v64_v44 }
   0xd   : > { %v54_v49 = vld [vmem:[%s1263_s1 + $0xa0] sm:$0xff]  ;;  %v706_v52 = vpack.c.bf16 %v74_v48, %v71_v46  ;;  %v73_v54 = vld [vmem:[%s1263_s1 + $0x138] sm:$0xff]  ;;  %v80_v57 = vld [vmem:[%s1263_s1 + $0x170] sm:$0xff] }
   0xe   : > { %693 = vmatpush1.bf16.msra.mxu0 %v692_v22  ;;  %v70_v53 = vld [vmem:[%s1263_s1 + $0x120] sm:$0xff]  ;;  %v77_v55 = vld [vmem:[%s1263_s1 + $0x158] sm:$0xff]  ;;  %v724_v56 = vpack.c.bf16 %v57_v50, %v54_v49  ;;  %v60_v58 = vld [vmem:[%s1263_s1 + $0xd0] sm:$0xff] }
   0xf   : > { %695 = vmatprep.subr.bf16.mxu0 %v694_v23  ;;  %719 = vmatpush3.bf16.msra.mxu1 %v718_v38  ;;  %v63_v59 = vld [vmem:[%s1263_s1 + $0xe8] sm:$0xff]  ;;  %v708_v60 = vpack.c.bf16 %v73_v54, %v70_v53  ;;  %v710_v61 = vpack.c.bf16 %v80_v57, %v77_v55  ;;  %v76_v62 = vld [vmem:[%s1263_s1 + $0x150] sm:$0xff]  ;;  %v526_v2 = vld [vmem:[%s1263_s1 + $0x1a0] sm:$0xff] }
  0x10   : > { %720 = vmatprep.subr.bf16.mxu1 %v835_v8  ;;  %v79_v63 = vld [vmem:[%s1263_s1 + $0x168] sm:$0xff]  ;;  %v727_v1 = vpack.c.bf16 %v63_v59, %v60_v58  ;;  %v66_v3 = vld [vmem:[%s1263_s1 + $0x100] sm:$0xff]  ;;  %v69_v4 = vld [vmem:[%s1263_s1 + $0x118] sm:$0xff] }
  0x11   : > { %v523_v0 = vld [vmem:[%s1263_s1 + $0x188] sm:$0xff]  ;;  %v712_v5 = vpack.c.bf16 %v79_v63, %v76_v62  ;;  %v522_v7 = vld [vmem:[%s1263_s1 + $0x180] sm:$0xff]  ;;  %v525_v10 = vld [vmem:[%s1263_s1 + $0x198] sm:$0xff]  ;;  %v730_v12 = vpack.c.bf16 %v69_v4, %v66_v3 }
  0x12   : > { %697 = vmatpush1.bf16.msra.mxu0 %v696_v32  ;;  %v738_v6 = vpack.c.bf16 %v526_v2, %v523_v0  ;;  %v529_v11 = vld [vmem:[%s1263_s1 + $0x1b8] sm:$0xff]  ;;  %v532_v13 = vld [vmem:[%s1263_s1 + $0x1d0] sm:$0xff]  ;;  %v75_v15 = vld [vmem:[%s1263_s1 + $0x148] sm:$0xff]  ;;  %v740_v17 = vpack.c.bf16 %v525_v10, %v522_v7 }
  0x13   : > { %699 = vmatprep.subr.bf16.mxu0 %v698_v34  ;;  %722 = vmatpush3.bf16.msra.mxu1 %v721_v47  ;;  %v72_v14 = vld [vmem:[%s1263_s1 + $0x130] sm:$0xff]  ;;  %v1023_v16 = vld [vmem:[#allocation2] sm:$0xff]  ;;  %v742_v18 = vpack.c.bf16 %v532_v13, %v529_v11  ;;  %v531_v20 = vld [vmem:[%s1263_s1 + $0x1c8] sm:$0xff] }
  0x14   : > { %723 = vmatprep.subr.bf16.mxu1 %v835_v8  ;;  %v528_v19 = vld [vmem:[%s1263_s1 + $0x1b0] sm:$0xff]  ;;  %v535_v21 = vld [vmem:[%s1263_s1 + $0x1e8] sm:$0xff]  ;;  %v733_v22 = vpack.c.bf16 %v75_v15, %v72_v14  ;;  %v538_v23 = vld [vmem:[%s1263_s1 + $0x200] sm:$0xff] }
  0x15   : > { %v78_v24 = vld [vmem:[%s1263_s1 + $0x160] sm:$0xff]  ;;  %v81_v25 = vld [vmem:[%s1263_s1 + $0x178] sm:$0xff]  ;;  %v744_v26 = vpack.c.bf16 %v531_v20, %v528_v19  ;;  %v746_v27 = vpack.c.bf16 %v538_v23, %v535_v21  ;;  %v544_v32 = vld [vmem:[%s1263_s1 + $0x230] sm:$0xff] }
  0x16   : > { %701 = vmatpush1.bf16.msra.mxu0 %v700_v42  ;;  %v534_v28 = vld [vmem:[%s1263_s1 + $0x1e0] sm:$0xff]  ;;  %v537_v29 = vld [vmem:[%s1263_s1 + $0x1f8] sm:$0xff]  ;;  %v736_v31 = vpack.c.bf16 %v81_v25, %v78_v24  ;;  %v524_v33 = vld [vmem:[%s1263_s1 + $0x190] sm:$0xff] }
  0x17   : > { %703 = vmatprep.subr.bf16.mxu0 %v702_v43  ;;  %725 = vmatpush3.bf16.msra.mxu1 %v724_v56  ;;  %v541_v30 = vld [vmem:[%s1263_s1 + $0x218] sm:$0xff]  ;;  %v527_v34 = vld [vmem:[%s1263_s1 + $0x1a8] sm:$0xff]  ;;  %v748_v35 = vpack.c.bf16 %v537_v29, %v534_v28  ;;  %v540_v37 = vld [vmem:[%s1263_s1 + $0x210] sm:$0xff] }
  0x18   : > { %726 = vmatprep.subr.bf16.mxu1 %v835_v8  ;;  %v750_v36 = vpack.c.bf16 %v544_v32, %v541_v30  ;;  %v543_v38 = vld [vmem:[%s1263_s1 + $0x228] sm:$0xff]  ;;  %v771_v40 = vpack.c.bf16 %v527_v34, %v524_v33  ;;  %v550_v41 = vld [vmem:[%s1263_s1 + $0x260] sm:$0xff]  ;;  %v533_v43 = vld [vmem:[%s1263_s1 + $0x1d8] sm:$0xff] }
  0x19   : > { %v547_v39 = vld [vmem:[%s1263_s1 + $0x248] sm:$0xff]  ;;  %v530_v42 = vld [vmem:[%s1263_s1 + $0x1c0] sm:$0xff]  ;;  %v752_v44 = vpack.c.bf16 %v543_v38, %v540_v37  ;;  %v549_v47 = vld [vmem:[%s1263_s1 + $0x258] sm:$0xff] }
  0x1a   : > { %705 = vmatpush1.bf16.msra.mxu0 %v704_v51  ;;  %v754_v45 = vpack.c.bf16 %v550_v41, %v547_v39  ;;  %v546_v46 = vld [vmem:[%s1263_s1 + $0x240] sm:$0xff]  ;;  %v553_v48 = vld [vmem:[%s1263_s1 + $0x278] sm:$0xff]  ;;  %v774_v49 = vpack.c.bf16 %v533_v43, %v530_v42  ;;  %v556_v50 = vld [vmem:[%s1263_s1 + $0x290] sm:$0xff] }
  0x1b   : > { %707 = vmatprep.subr.bf16.mxu0 %v706_v52  ;;  %728 = vmatpush3.bf16.msra.mxu1 %v727_v1  ;;  %v536_v51 = vld [vmem:[%s1263_s1 + $0x1f0] sm:$0xff]  ;;  %v539_v52 = vld [vmem:[%s1263_s1 + $0x208] sm:$0xff]  ;;  %v756_v53 = vpack.c.bf16 %v549_v47, %v546_v46  ;;  %v758_v54 = vpack.c.bf16 %v556_v50, %v553_v48  ;;  %v542_v59 = vld [vmem:[%s1263_s1 + $0x220] sm:$0xff] }
  0x1c   : > { %729 = vmatprep.subr.bf16.mxu1 %v835_v8  ;;  %v552_v55 = vld [vmem:[%s1263_s1 + $0x270] sm:$0xff]  ;;  %v555_v56 = vld [vmem:[%s1263_s1 + $0x288] sm:$0xff]  ;;  %v777_v58 = vpack.c.bf16 %v539_v52, %v536_v51  ;;  %v558_v63 = vld [vmem:[%s1263_s1 + $0x2a0] sm:$0xff] }
  0x1d   : > { %v559_v57 = vld [vmem:[%s1263_s1 + $0x2a8] sm:$0xff]  ;;  %v561_v0 = vld [vmem:[%s1263_s1 + $0x2b8] sm:$0xff]  ;;  %v568_v3 = vld [vmem:[%s1263_s1 + $0x2f0] sm:$0xff] }
  0x1e   : > { %709 = vmatpush1.bf16.msra.mxu0 %v708_v60  ;;  %v545_v60 = vld [vmem:[%s1263_s1 + $0x238] sm:$0xff]  ;;  %v548_v4 = vld [vmem:[%s1263_s1 + $0x250] sm:$0xff]  ;;  %v567_v11 = vld [vmem:[%s1263_s1 + $0x2e8] sm:$0xff] }
  0x1f   : > { %711 = vmatprep.subr.bf16.mxu0 %v710_v61  ;;  %731 = vmatpush3.bf16.msra.mxu1 %v730_v12  ;;  %v760_v61 = vpack.c.bf16 %v555_v56, %v552_v55  ;;  %v565_v1 = vld [vmem:[%s1263_s1 + $0x2d8] sm:$0xff]  ;;  %v780_v2 = vpack.c.bf16 %v545_v60, %v542_v59  ;;  %v564_v10 = vld [vmem:[%s1263_s1 + $0x2d0] sm:$0xff]  ;;  %v554_v13 = vld [vmem:[%s1263_s1 + $0x280] sm:$0xff] }
  0x20   : > { %732 = vmatprep.subr.bf16.mxu1 %v835_v8  ;;  %v766_v7 = vpack.c.bf16 %v568_v3, %v565_v1  ;;  %v557_v14 = vld [vmem:[%s1263_s1 + $0x298] sm:$0xff]  ;;  %v768_v15 = vpack.c.bf16 %v567_v11, %v564_v10  ;;  %v563_v19 = vld [vmem:[%s1263_s1 + $0x2c8] sm:$0xff]  ;;  %v23_v25 = vld [vmem:[%s22_s16] sm:$0xff] }
  0x21   : > { %v1164_v20 = vld [vmem:[#allocation3] sm:$0xff]  ;;  %v569_v23 = vld [vmem:[%s1263_s1 + $0x2f8] sm:$0xff]  ;;  %v25_v39 = vld [vmem:[%s22_s16 + $0x10] sm:$0xff] }
  0x22   : > { %713 = vmatpush1.bf16.msra.mxu0 %v712_v5  ;;  %v551_v5 = vld [vmem:[%s1263_s1 + $0x268] sm:$0xff]  ;;  %v29_v41 = vld [vmem:[%s1186_s21 + $0x18] sm:$0xff] }
  0x23   : > { %739 = vmatprep.subr.bf16.mxu0 %v738_v6  ;;  %734 = vmatpush3.bf16.msra.mxu1 %v733_v22  ;;  %v764_v6 = vpack.c.bf16 %v561_v0, %v558_v63  ;;  %v783_v12 = vpack.c.bf16 %v551_v5, %v548_v4  ;;  %v566_v22 = vld [vmem:[%s1263_s1 + $0x2e0] sm:$0xff]  ;;  %v24_v28 = vld [vmem:[%s22_s16 + $0x8] sm:$0xff] }
  0x24   : > { %735 = vmatprep.subr.bf16.mxu1 %v835_v8  ;;  %v792_v24 = vpack.c.bf16 %v569_v23, %v566_v22 }
  0x25   : > { %147 = vmatmul.mubr.f32.vlgmr.msra.gmra.mrb[0].mxu0 %v1023_v16 }
  0x26   : > { %741 = vmatpush1.bf16.msra.mxu0 %v740_v17  ;;  %336 = vmatprep.mubr.f32.mxu0 %v836_v9  ;;  %v786_v17 = vpack.c.bf16 %v557_v14, %v554_v13 }
  0x27   : > { %743 = vmatprep.subr.bf16.mxu0 %v742_v18  ;;  %737 = vmatpush3.bf16.msra.mxu1 %v736_v31  ;;  %v560_v18 = vld [vmem:[%s1263_s1 + $0x2b0] sm:$0xff] }
  0x28   : > { %770 = vmatprep.subr.bf16.mxu1 %v835_v8  ;;  %v789_v21 = vpack.c.bf16 %v563_v19, %v560_v18 }
  0x2a   : > { %745 = vmatpush1.bf16.msra.mxu0 %v744_v26  ;;  %645 = vmatmul.mubr.f32.vlgmr.msra.gmra.mrb[0].mxu1 %v1023_v16 }
  0x2b   : > { %747 = vmatprep.subr.bf16.mxu0 %v746_v27  ;;  %772 = vmatpush3.bf16.msra.mxu1 %v771_v40 }
  0x2c   : > { %773 = vmatprep.subr.bf16.mxu1 %v835_v8  ;;  %679 = vmatprep.mubr.msk.f32.mxu1 %vm837_vm0, %v836_v9  ;;  %v562_v9 = vld [vmem:[%s1263_s1 + $0x2c0] sm:$0xff] }
  0x2d   : > { %v762_v62 = vpack.c.bf16 %v562_v9, %v559_v57 }
  0x2e   : > { %749 = vmatpush1.bf16.msra.mxu0 %v748_v35 }
  0x2f   : > { %751 = vmatprep.subr.bf16.mxu0 %v750_v36  ;;  %775 = vmatpush3.bf16.msra.mxu1 %v774_v49 }
  0x30   : > { %776 = vmatprep.subr.bf16.mxu1 %v835_v8 }
  0x32   : > { %753 = vmatpush1.bf16.msra.mxu0 %v752_v44 }
  0x33   : > { %755 = vmatprep.subr.bf16.mxu0 %v754_v45  ;;  %778 = vmatpush3.bf16.msra.mxu1 %v777_v58  ;;  %v30_v45 = vld [vmem:[%s1186_s21 + $0x20] sm:$0xff] }
  0x34   : > { %779 = vmatprep.subr.bf16.mxu1 %v835_v8 }
  0x36   : > { %757 = vmatpush1.bf16.msra.mxu0 %v756_v53 }
  0x37   : > { %759 = vmatprep.subr.bf16.mxu0 %v758_v54  ;;  %781 = vmatpush3.bf16.msra.mxu1 %v780_v2 }
  0x38   : > { %782 = vmatprep.subr.bf16.mxu1 %v835_v8 }
  0x3a   : > { %761 = vmatpush1.bf16.msra.mxu0 %v760_v61 }
  0x3b   : > { %763 = vmatprep.subr.bf16.mxu0 %v762_v62  ;;  %784 = vmatpush3.bf16.msra.mxu1 %v783_v12  ;;  %v31_v62 = vld [vmem:[%s1186_s21 + $0x28] sm:$0xff] }
  0x3c   : > { %785 = vmatprep.subr.bf16.mxu1 %v835_v8 }
  0x3e   : > { %765 = vmatpush1.bf16.msra.mxu0 %v764_v6 }
  0x3f   : > { %767 = vmatprep.subr.bf16.mxu0 %v766_v7  ;;  %787 = vmatpush3.bf16.msra.mxu1 %v786_v17 }
  0x40   : > { %788 = vmatprep.subr.bf16.mxu1 %v835_v8 }
  0x42   : > { %769 = vmatpush1.bf16.msra.mxu0 %v768_v15 }
  0x43   : > { %790 = vmatpush3.bf16.msra.mxu1 %v789_v21 }
  0x44   : > { %791 = vmatprep.subr.bf16.mxu1 %v835_v8 }
  0x45   : > { %337 = vmatmul.mubr.f32.vlgmr.msra.gmra.mrb[2].mxu0 %v1164_v20 }
  0x47   : > { %793 = vmatpush3.bf16.msra.mxu1 %v792_v24 }
  0x4a   : > { %680 = vmatmul.mubr.f32.vlgmr.msra.gmra.mrb[2].mxu1 %v1164_v20 }
  0xf8   : > { %v148_v26 = vpop.f32.mrb[0].mxu0 }
  0xf9   : > { %v413_v27 = vadd.f32 %v148_v26, %v23_v25  ;;  %v150_v29 = vpop.f32.mrb[1].mxu0 }
  0xfa   : > { %v420_v31 = vadd.f32 %v150_v29, %v24_v28 }
  0xfb   : > { %v570_v30 = vmul.f32 -1.442695, %v413_v27 }
  0xfc   : > { %v571_v32 = vmul.f32 -1.442695, %v420_v31 }
  0xfd   : > { %806 = vpow2.f32 %v570_v30  ;;  %v219_v8 = vpop.f32.mrb[0].mxu1 }
  0xfe   : > { %v646_v33 = vpop.f32.mrb[1].mxu1  ;;  %808 = vpow2.f32 %v571_v32 }
 0x107   : > { %v807_v34 = vpop.eup %806 }
 0x108   : > { %v417_v35 = vadd.f32 1.0, %v807_v34  ;;  %v809_v36 = vpop.eup %808 }
 0x109   : > { %v424_v37 = vadd.f32 1.0, %v809_v36 }
 0x10a   : > { %810 = vrcp.f32 %v417_v35 }
 0x10b   : > { %812 = vrcp.f32 %v424_v37 }
 0x114   : > { %v811_v38 = vpop.eup %810 }
 0x115   : > { %v427_v40 = vmul.f32 %v811_v38, %v219_v8  ;;  %v813_v49 = vpop.eup %812 }
 0x116   : > { %v430_v52 = vsub.f32 1.0, %v813_v49  ;;  %v432_v55 = vmul.f32 %v813_v49, %v1023_v16 }
 0x117   : > { %v428_v42 = vadd.f32 %v427_v40, %v25_v39 }
 0x118   : > { %v338_v43 = vpop.f32.mrb[2].mxu0 }
 0x119   : > { %814 = vtanh.f32 %v428_v42  ;;  %v434_v44 = vadd.f32 %v338_v43, %v29_v41  ;;  %v340_v46 = vpop.f32.mrb[3].mxu0 }
 0x11a   : > { %v441_v48 = vadd.f32 %v340_v46, %v30_v45 }
 0x11b   : > { %v572_v47 = vmul.f32 -1.442695, %v434_v44 }
 0x11c   : > { %v573_v50 = vmul.f32 -1.442695, %v441_v48 }
 0x11d   : > { %816 = vpow2.f32 %v572_v47  ;;  %v409_v51 = vpop.f32.mrb[2].mxu1 }
 0x11e   : > { %v681_v53 = vpop.f32.mrb[3].mxu1  ;;  %818 = vpow2.f32 %v573_v50 }
 0x123   : > { %v815_v54 = vpop.eup %814 }
 0x124   : > { %v431_v56 = vmul.f32 %v815_v54, %v430_v52 }
 0x126   : > { %v433_v57 = vadd.f32 %v432_v55, %v431_v56 }
 0x127   : > { %v817_v58 = vpop.eup %816 }
 0x128   : > { %455 = vst [vmem:[#allocation2] sm:$0xff] %v433_v57  ;;  %459 = vst [vmem:[%s458_s25] sm:$0xff] %v433_v57  ;;  %v438_v9 = vadd.f32 1.0, %v817_v58  ;;  %v819_v59 = vpop.eup %818 }
 0x129   : > { %v445_v60 = vadd.f32 1.0, %v819_v59 }
 0x12a   : > { %820 = vrcp.f32 %v438_v9 }
 0x12b   : > { %822 = vrcp.f32 %v445_v60 }
 0x12f   :  { %v463_v6 = vld [vmem:[%s1264_s2] sm:$0xff] (%p15_p0)  ;;  %v464_v10 = vld [vmem:[%s1264_s2 + $0x8] sm:$0xff] (%p15_p0)  ;;  %v465_v13 = vld [vmem:[%s1264_s2 + $0x10] sm:$0xff] (%p15_p0) }
 0x130   :  { %v466_v18 = vld [vmem:[%s1264_s2 + $0x18] sm:$0xff] (%p15_p0)  ;;  %v468_v23 = vld [vmem:[%s1264_s2 + $0x28] sm:$0xff] (%p15_p0)  ;;  %v469_v27 = vld [vmem:[%s1264_s2 + $0x30] sm:$0xff] (%p15_p0) }
 0x131   :  { %v470_v29 = vld [vmem:[%s1264_s2 + $0x38] sm:$0xff] (%p15_p0)  ;;  %v471_v32 = vld [vmem:[%s1264_s2 + $0x40] sm:$0xff] (%p15_p0)  ;;  %v472_v35 = vld [vmem:[%s1264_s2 + $0x48] sm:$0xff] (%p15_p0) }
 0x134   : > { %v821_v61 = vpop.eup %820 }
 0x135   : > { %v448_v63 = vmul.f32 %v821_v61, %v409_v51  ;;  %v823_v0 = vpop.eup %822 }
 0x136   : > { %v451_v1 = vsub.f32 1.0, %v823_v0  ;;  %v453_v3 = vmul.f32 %v823_v0, %v1164_v20  ;;  %v467_v20 = vld [vmem:[%s1264_s2 + $0x20] sm:$0xff] (%p15_p0) }
 0x137   : > { %v449_v16 = vadd.f32 %v448_v63, %v31_v62 }
 0x139   : > { %824 = vtanh.f32 %v449_v16 }
 0x142   :  { %17 = sbr.rel (!%p15_p0) target bundleno = 2 (0x2), region = 40 }
 0x143   : > { %v825_v2 = vpop.eup %824 }
 0x144   : > { %v452_v4 = vmul.f32 %v825_v2, %v451_v1 }
 0x146   : > { %v454_v5 = vadd.f32 %v453_v3, %v452_v4 }
 0x148   : > { %456 = vst [vmem:[#allocation3] sm:$0xff] %v454_v5  ;;  %462 = vst [vmem:[%s461_s27] sm:$0xff] %v454_v5 }
 0x14f   :  { %v473_v7 = vld [vmem:[#allocation4] sm:$0xff]  ;;  %v474_v12 = vld [vmem:[#allocation4 + $0x8] sm:$0xff]  ;;  %v475_v14 = vld [vmem:[#allocation4 + $0x10] sm:$0xff] }
 0x150   :  { %v483_v11 = vadd.f32 %v473_v7, %v463_v6  ;;  %v484_v15 = vadd.f32 %v474_v12, %v464_v10  ;;  %v485_v17 = vadd.f32 %v475_v14, %v465_v13  ;;  %v476_v19 = vld [vmem:[#allocation4 + $0x18] sm:$0xff]  ;;  %v477_v22 = vld [vmem:[#allocation4 + $0x20] sm:$0xff]  ;;  %v478_v24 = vld [vmem:[#allocation4 + $0x28] sm:$0xff] }
 0x151   :  { %v486_v21 = vadd.f32 %v476_v19, %v466_v18  ;;  %v487_v25 = vadd.f32 %v477_v22, %v467_v20  ;;  %v488_v26 = vadd.f32 %v478_v24, %v468_v23  ;;  %v479_v28 = vld [vmem:[#allocation4 + $0x30] sm:$0xff]  ;;  %v480_v31 = vld [vmem:[#allocation4 + $0x38] sm:$0xff]  ;;  %v481_v8 = vld [vmem:[#allocation4 + $0x40] sm:$0xff] }
 0x152   :  { %493 = vst [vmem:[%s1264_s2] sm:$0xff] %v483_v11  ;;  %494 = vst [vmem:[%s1264_s2 + $0x8] sm:$0xff] %v484_v15  ;;  %v489_v30 = vadd.f32 %v479_v28, %v469_v27  ;;  %v490_v33 = vadd.f32 %v480_v31, %v470_v29  ;;  %v491_v34 = vadd.f32 %v481_v8, %v471_v32  ;;  %v482_v36 = vld [vmem:[#allocation4 + $0x48] sm:$0xff] }
 0x153   :  { %495 = vst [vmem:[%s1264_s2 + $0x10] sm:$0xff] %v485_v17  ;;  %496 = vst [vmem:[%s1264_s2 + $0x18] sm:$0xff] %v486_v21  ;;  %v492_v37 = vadd.f32 %v482_v36, %v472_v35 }
 0x154   :  { %497 = vst [vmem:[%s1264_s2 + $0x20] sm:$0xff] %v487_v25  ;;  %498 = vst [vmem:[%s1264_s2 + $0x28] sm:$0xff] %v488_v26 }
 0x155   :  { %499 = vst [vmem:[%s1264_s2 + $0x30] sm:$0xff] %v489_v30  ;;  %500 = vst [vmem:[%s1264_s2 + $0x38] sm:$0xff] %v490_v33 }
 0x156   :  { %501 = vst [vmem:[%s1264_s2 + $0x40] sm:$0xff] %v491_v34  ;;  %502 = vst [vmem:[%s1264_s2 + $0x48] sm:$0xff] %v492_v37 }

// kernel: deepspeech_forward.13
= control target key start
LH: loop header
LB: loop body
LE: loop exit
PB: predicated region body
PF: predicated region fallthrough
CT: control target
= control target key end

     0   :  { %v162_v34 = vlaneseq  ;;  %s582_s1 = inlined_call_operand.vmem [shape: f32[128,128], index: 1, kind: input, shape index: {}]   ;;  %s583_s0 = inlined_call_operand.vmem [shape: f32[80,128], index: 0, kind: input, shape index: {}]   ;;  %s584_s2 = inlined_call_operand.vmem [shape: f32[1,128], index: 2, kind: input, shape index: {}]   ;;  %s585_s3 = inlined_call_operand.vmem [shape: f32[80,128], index: 3, kind: output, shape index: {}]  }
   0x1   :  { %v24_v0 = vld [vmem:[%s582_s1] sm:$0xff]  ;;  %v25_v1 = vld [vmem:[%s582_s1 + $0x8] sm:$0xff]  ;;  %v26_v2 = vld [vmem:[%s582_s1 + $0x10] sm:$0xff] }
   0x2   :  { %v353_v3 = vpack.c.bf16 %v25_v1, %v24_v0  ;;  %v27_v4 = vld [vmem:[%s582_s1 + $0x18] sm:$0xff]  ;;  %v28_v6 = vld [vmem:[%s582_s1 + $0x20] sm:$0xff]  ;;  %v29_v7 = vld [vmem:[%s582_s1 + $0x28] sm:$0xff]  ;;  %v163_v35 = vand.u32 127, %v162_v34 }
   0x3   :  { %v357_v5 = vpack.c.bf16 %v27_v4, %v26_v2  ;;  %v361_v8 = vpack.c.bf16 %v29_v7, %v28_v6  ;;  %v14_v9 = vld [vmem:[%s583_s0] sm:$0xff]  ;;  %v20_v10 = vld [vmem:[%s583_s0 + $0x30] sm:$0xff]  ;;  %v31_v12 = vld [vmem:[%s582_s1 + $0x38] sm:$0xff] }
   0x4   :  { %354 = vmatprep.subr.bf16.mxu0 %v353_v3  ;;  %385 = vmatprep.subr.bf16.mxu1 %v353_v3  ;;  %v30_v11 = vld [vmem:[%s582_s1 + $0x30] sm:$0xff]  ;;  %v32_v14 = vld [vmem:[%s582_s1 + $0x40] sm:$0xff]  ;;  %v33_v15 = vld [vmem:[%s582_s1 + $0x48] sm:$0xff]  ;;  %vm164_vm0 = vcmp.lt.s32.totalorder %v163_v35, 29 }
   0x5   :  { %356 = vmatpush3.bf16.msra.mxu0 %v353_v3  ;;  %393 = vmatpush3.bf16.msra.mxu1 %v353_v3  ;;  %v365_v13 = vpack.c.bf16 %v31_v12, %v30_v11  ;;  %v369_v16 = vpack.c.bf16 %v33_v15, %v32_v14  ;;  %v34_v17 = vld [vmem:[%s582_s1 + $0x50] sm:$0xff]  ;;  %v35_v18 = vld [vmem:[%s582_s1 + $0x58] sm:$0xff]  ;;  %v36_v20 = vld [vmem:[%s582_s1 + $0x60] sm:$0xff] }
   0x6   :  { %358 = vmatprep.subr.bf16.mxu0 %v357_v5  ;;  %386 = vmatprep.subr.bf16.mxu1 %v357_v5  ;;  %v373_v19 = vpack.c.bf16 %v35_v18, %v34_v17  ;;  %v37_v21 = vld [vmem:[%s582_s1 + $0x68] sm:$0xff]  ;;  %v38_v23 = vld [vmem:[%s582_s1 + $0x70] sm:$0xff]  ;;  %v39_v24 = vld [vmem:[%s582_s1 + $0x78] sm:$0xff] }
   0x7   :  { %338 = vmatprep.mubr.f32.mxu0 %v14_v9  ;;  %347 = vmatprep.mubr.f32.mxu1 %v20_v10  ;;  %v377_v22 = vpack.c.bf16 %v37_v21, %v36_v20  ;;  %v381_v25 = vpack.c.bf16 %v39_v24, %v38_v23  ;;  %v15_v26 = vld [vmem:[%s583_s0 + $0x8] sm:$0xff]  ;;  %v21_v27 = vld [vmem:[%s583_s0 + $0x38] sm:$0xff]  ;;  %v16_v28 = vld [vmem:[%s583_s0 + $0x10] sm:$0xff] }
   0x8   :  { %v22_v29 = vld [vmem:[%s583_s0 + $0x40] sm:$0xff]  ;;  %v17_v30 = vld [vmem:[%s583_s0 + $0x18] sm:$0xff]  ;;  %v23_v31 = vld [vmem:[%s583_s0 + $0x48] sm:$0xff] }
   0x9   :  { %360 = vmatpush3.bf16.msra.mxu0 %v357_v5  ;;  %394 = vmatpush3.bf16.msra.mxu1 %v357_v5  ;;  %v18_v32 = vld [vmem:[%s583_s0 + $0x20] sm:$0xff]  ;;  %v19_v33 = vld [vmem:[%s583_s0 + $0x28] sm:$0xff] }
   0xa   :  { %362 = vmatprep.subr.bf16.mxu0 %v361_v8  ;;  %387 = vmatprep.subr.bf16.mxu1 %v361_v8  ;;  %v279_v36 = vld [vmem:[%s584_s2] ss:$0 sm:$0xff] }
   0xd   :  { %364 = vmatpush3.bf16.msra.mxu0 %v361_v8  ;;  %395 = vmatpush3.bf16.msra.mxu1 %v361_v8 }
   0xe   :  { %366 = vmatprep.subr.bf16.mxu0 %v365_v13  ;;  %388 = vmatprep.subr.bf16.mxu1 %v365_v13 }
  0x11   :  { %368 = vmatpush3.bf16.msra.mxu0 %v365_v13  ;;  %396 = vmatpush3.bf16.msra.mxu1 %v365_v13 }
  0x12   :  { %370 = vmatprep.subr.bf16.mxu0 %v369_v16  ;;  %389 = vmatprep.subr.bf16.mxu1 %v369_v16 }
  0x15   :  { %372 = vmatpush3.bf16.msra.mxu0 %v369_v16  ;;  %397 = vmatpush3.bf16.msra.mxu1 %v369_v16 }
  0x16   :  { %374 = vmatprep.subr.bf16.mxu0 %v373_v19  ;;  %390 = vmatprep.subr.bf16.mxu1 %v373_v19 }
  0x19   :  { %376 = vmatpush3.bf16.msra.mxu0 %v373_v19  ;;  %398 = vmatpush3.bf16.msra.mxu1 %v373_v19 }
  0x1a   :  { %378 = vmatprep.subr.bf16.mxu0 %v377_v22  ;;  %391 = vmatprep.subr.bf16.mxu1 %v377_v22 }
  0x1d   :  { %380 = vmatpush3.bf16.msra.mxu0 %v377_v22  ;;  %399 = vmatpush3.bf16.msra.mxu1 %v377_v22 }
  0x1e   :  { %382 = vmatprep.subr.bf16.mxu0 %v381_v25  ;;  %392 = vmatprep.subr.bf16.mxu1 %v381_v25 }
  0x21   :  { %384 = vmatpush3.bf16.msra.mxu0 %v381_v25  ;;  %400 = vmatpush3.bf16.msra.mxu1 %v381_v25 }
  0x24   :  { %339 = vmatmul.mubr.f32.vlgmr.msra.gmra.mrb[0].mxu0 %v15_v26  ;;  %348 = vmatmul.mubr.f32.vlgmr.msra.gmra.mrb[0].mxu1 %v21_v27 }
  0x25   :  { %341 = vmatprep.mubr.f32.mxu0 %v16_v28  ;;  %350 = vmatprep.mubr.f32.mxu1 %v22_v29 }
  0x28   :  { %342 = vmatmul.mubr.f32.gmra.mrb[2].mxu0 %v17_v30  ;;  %351 = vmatmul.mubr.f32.gmra.mrb[2].mxu1 %v23_v31 }
  0x29   :  { %344 = vmatprep.mubr.f32.mxu0 %v18_v32 }
  0x2c   :  { %345 = vmatmul.mubr.f32.gmra.mrb[4].mxu0 %v19_v33 }
  0xf7   :  { %v340_v37 = vpop.f32.mrb[0].mxu0  ;;  %v349_v38 = vpop.f32.mrb[0].mxu1 }
  0xf8   :  { %v119_v39 = vadd.f32 %v340_v37, %v279_v36  ;;  %v149_v40 = vadd.f32 %v349_v38, %v279_v36  ;;  %v113_v41 = vpop.f32.mrb[1].mxu0  ;;  %v143_v42 = vpop.f32.mrb[1].mxu1 }
  0xf9   :  { %v114_v43 = vadd.f32 %v279_v36, %v113_v41  ;;  %v144_v52 = vadd.f32 %v279_v36, %v143_v42 }
  0xfa   :  { %v172_v44 = vsel %vm164_vm0, %v149_v40, -inf  ;;  %v166_v45 = vsel %vm164_vm0, %v119_v39, -inf }
  0xfb   :  { %189 = vmax.xlane.f32.xlu1 %v172_v44  ;;  %177 = vmax.xlane.f32.xlu0 %v166_v45  ;;  %v343_v46 = vpop.f32.mrb[2].mxu0  ;;  %v352_v47 = vpop.f32.mrb[2].mxu1  ;;  %v165_v54 = vsel %vm164_vm0, %v114_v43, -inf  ;;  %v171_v60 = vsel %vm164_vm0, %v144_v52, -inf }
  0xfc   :  { %v129_v48 = vadd.f32 %v343_v46, %v279_v36  ;;  %v123_v49 = vpop.f32.mrb[3].mxu0  ;;  %v153_v50 = vpop.f32.mrb[3].mxu1  ;;  %v159_v61 = vadd.f32 %v352_v47, %v279_v36 }
  0xfd   :  { %v124_v51 = vadd.f32 %v279_v36, %v123_v49  ;;  %v154_v62 = vadd.f32 %v279_v36, %v153_v50 }
  0xfe   :  { %v168_v53 = vsel %vm164_vm0, %v129_v48, -inf  ;;  %v174_v1 = vsel %vm164_vm0, %v159_v61, -inf }
  0xff   :  { %181 = vmax.xlane.f32.xlu1 %v168_v53  ;;  %175 = vmax.xlane.f32.xlu0 %v165_v54  ;;  %v346_v55 = vpop.f32.mrb[4].mxu0  ;;  %v167_v58 = vsel %vm164_vm0, %v124_v51, -inf  ;;  %v173_v2 = vsel %vm164_vm0, %v154_v62, -inf }
 0x100   :  { %v139_v56 = vadd.f32 %v346_v55, %v279_v36  ;;  %v133_v57 = vpop.f32.mrb[5].mxu0 }
 0x101   :  { %v134_v59 = vadd.f32 %v279_v36, %v133_v57 }
 0x102   :  { %v170_v63 = vsel %vm164_vm0, %v139_v56, -inf }
 0x103   :  { %179 = vmax.xlane.f32.xlu1 %v167_v58  ;;  %187 = vmax.xlane.f32.xlu0 %v171_v60  ;;  %v169_v0 = vsel %vm164_vm0, %v134_v59, -inf }
 0x107   :  { %185 = vmax.xlane.f32.xlu1 %v170_v63  ;;  %183 = vmax.xlane.f32.xlu0 %v169_v0 }
 0x10b   :  { %193 = vmax.xlane.f32.xlu1 %v174_v1  ;;  %191 = vmax.xlane.f32.xlu0 %v173_v2 }
 0x188   :  { %v190_v3 = vpop.xlane.xlu1 %189  ;;  %v178_v4 = vpop.xlane.xlu0 %177 }
 0x189   :  { %v202_v5 = vsub.f32 %v172_v44, %v190_v3  ;;  %v196_v6 = vsub.f32 %v166_v45, %v178_v4 }
 0x18b   :  { %v207_v7 = vmul.f32 1.442695, %v196_v6  ;;  %v219_v10 = vmul.f32 1.442695, %v202_v5 }
 0x18c   :  { %v182_v8 = vpop.xlane.xlu1 %181  ;;  %v176_v9 = vpop.xlane.xlu0 %175 }
 0x18d   :  { %v198_v11 = vsub.f32 %v168_v53, %v182_v8  ;;  %v195_v12 = vsub.f32 %v165_v54, %v176_v9  ;;  %401 = vpow2.f32 %v207_v7 }
 0x18e   :  { %403 = vpow2.f32 %v219_v10 }
 0x18f   :  { %v205_v13 = vmul.f32 1.442695, %v195_v12  ;;  %v211_v16 = vmul.f32 1.442695, %v198_v11 }
 0x190   :  { %v180_v14 = vpop.xlane.xlu1 %179  ;;  %v188_v15 = vpop.xlane.xlu0 %187 }
 0x191   :  { %v201_v17 = vsub.f32 %v171_v60, %v188_v15  ;;  %405 = vpow2.f32 %v205_v13  ;;  %v197_v18 = vsub.f32 %v167_v58, %v180_v14 }
 0x192   :  { %407 = vpow2.f32 %v211_v16 }
 0x193   :  { %v217_v19 = vmul.f32 1.442695, %v201_v17  ;;  %v209_v23 = vmul.f32 1.442695, %v197_v18 }
 0x194   :  { %v186_v20 = vpop.xlane.xlu1 %185  ;;  %v184_v21 = vpop.xlane.xlu0 %183 }
 0x195   :  { %v200_v22 = vsub.f32 %v170_v63, %v186_v20  ;;  %409 = vpow2.f32 %v217_v19  ;;  %v199_v24 = vsub.f32 %v169_v0, %v184_v21 }
 0x197   :  { %v215_v25 = vmul.f32 1.442695, %v200_v22  ;;  %v402_v26 = vpop.eup %401  ;;  %v213_v30 = vmul.f32 1.442695, %v199_v24 }
 0x198   :  { %v194_v27 = vpop.xlane.xlu1 %193  ;;  %v192_v28 = vpop.xlane.xlu0 %191  ;;  %227 = vadd.xlane.f32.xlu1 %v402_v26 }
 0x199   :  { %411 = vpow2.f32 %v215_v25  ;;  %v204_v29 = vsub.f32 %v174_v1, %v194_v27  ;;  %v203_v31 = vsub.f32 %v173_v2, %v192_v28  ;;  %v404_v32 = vpop.eup %403 }
 0x19a   :  { %413 = vpow2.f32 %v209_v23 }
 0x19b   :  { %v223_v33 = vmul.f32 1.442695, %v204_v29  ;;  %v406_v34 = vpop.eup %405  ;;  %v221_v35 = vmul.f32 1.442695, %v203_v31 }
 0x19c   :  { %239 = vadd.xlane.f32.xlu1 %v404_v32  ;;  %225 = vadd.xlane.f32.xlu0 %v406_v34  ;;  %v408_v36 = vpop.eup %407 }
 0x19d   :  { %415 = vpow2.f32 %v223_v33 }
 0x19e   :  { %417 = vpow2.f32 %v213_v30 }
 0x19f   :  { %v410_v37 = vpop.eup %409  ;;  %419 = vpow2.f32 %v221_v35 }
 0x1a0   :  { %231 = vadd.xlane.f32.xlu1 %v408_v36  ;;  %237 = vadd.xlane.f32.xlu0 %v410_v37 }
 0x1a3   :  { %v412_v38 = vpop.eup %411 }
 0x1a4   :  { %v414_v39 = vpop.eup %413  ;;  %235 = vadd.xlane.f32.xlu1 %v412_v38 }
 0x1a5   :  { %229 = vadd.xlane.f32.xlu0 %v414_v39 }
 0x1a7   :  { %v416_v40 = vpop.eup %415 }
 0x1a8   :  { %v418_v41 = vpop.eup %417  ;;  %243 = vadd.xlane.f32.xlu1 %v416_v40 }
 0x1a9   :  { %233 = vadd.xlane.f32.xlu0 %v418_v41  ;;  %v420_v42 = vpop.eup %419 }
 0x1ad   :  { %241 = vadd.xlane.f32.xlu0 %v420_v42 }
 0x225   :  { %v228_v43 = vpop.xlane.xlu1 %227 }
 0x226   :  { %421 = vrcp.f32 %v228_v43 }
 0x229   :  { %v240_v44 = vpop.xlane.xlu1 %239  ;;  %v226_v45 = vpop.xlane.xlu0 %225 }
 0x22a   :  { %423 = vrcp.f32 %v240_v44 }
 0x22b   :  { %425 = vrcp.f32 %v226_v45 }
 0x22d   :  { %v232_v46 = vpop.xlane.xlu1 %231  ;;  %v238_v47 = vpop.xlane.xlu0 %237 }
 0x22e   :  { %427 = vrcp.f32 %v232_v46 }
 0x22f   :  { %429 = vrcp.f32 %v238_v47 }
 0x230   :  { %v422_v48 = vpop.eup %421 }
 0x231   :  { %v256_v49 = vmul.f32 %v422_v48, %v402_v26  ;;  %v236_v50 = vpop.xlane.xlu1 %235 }
 0x232   :  { %v230_v51 = vpop.xlane.xlu0 %229  ;;  %431 = vrcp.f32 %v236_v50 }
 0x233   :  { %266 = vst [vmem:[%s585_s3 + $0x8] sm:$0xff] %v256_v49  ;;  %433 = vrcp.f32 %v230_v51 }
 0x234   :  { %v424_v52 = vpop.eup %423 }
 0x235   :  { %v426_v53 = vpop.eup %425  ;;  %v262_v54 = vmul.f32 %v424_v52, %v404_v32  ;;  %v244_v55 = vpop.xlane.xlu1 %243 }
 0x236   :  { %v234_v56 = vpop.xlane.xlu0 %233  ;;  %v255_v57 = vmul.f32 %v426_v53, %v406_v34  ;;  %435 = vrcp.f32 %v244_v55 }
 0x237   :  { %272 = vst [vmem:[%s585_s3 + $0x38] sm:$0xff] %v262_v54  ;;  %437 = vrcp.f32 %v234_v56 }
 0x238   :  { %v428_v58 = vpop.eup %427  ;;  %265 = vst [vmem:[%s585_s3] sm:$0xff] %v255_v57 }
 0x239   :  { %v430_v59 = vpop.eup %429  ;;  %v258_v60 = vmul.f32 %v428_v58, %v408_v36 }
 0x23a   :  { %v242_v61 = vpop.xlane.xlu0 %241  ;;  %v261_v62 = vmul.f32 %v430_v59, %v410_v37 }
 0x23b   :  { %439 = vrcp.f32 %v242_v61  ;;  %268 = vst [vmem:[%s585_s3 + $0x18] sm:$0xff] %v258_v60 }
 0x23c   :  { %v432_v63 = vpop.eup %431  ;;  %271 = vst [vmem:[%s585_s3 + $0x30] sm:$0xff] %v261_v62 }
 0x23d   :  { %v434_v0 = vpop.eup %433  ;;  %v260_v1 = vmul.f32 %v432_v63, %v412_v38 }
 0x23e   :  { %v257_v2 = vmul.f32 %v434_v0, %v414_v39 }
 0x23f   :  { %270 = vst [vmem:[%s585_s3 + $0x28] sm:$0xff] %v260_v1 }
 0x240   :  { %v436_v3 = vpop.eup %435  ;;  %267 = vst [vmem:[%s585_s3 + $0x10] sm:$0xff] %v257_v2 }
 0x241   :  { %v438_v4 = vpop.eup %437  ;;  %v264_v5 = vmul.f32 %v436_v3, %v416_v40 }
 0x242   :  { %v259_v6 = vmul.f32 %v438_v4, %v418_v41 }
 0x243   :  { %274 = vst [vmem:[%s585_s3 + $0x48] sm:$0xff] %v264_v5 }
 0x244   :  { %269 = vst [vmem:[%s585_s3 + $0x20] sm:$0xff] %v259_v6 }
 0x245   :  { %v440_v7 = vpop.eup %439 }
 0x246   :  { %v263_v8 = vmul.f32 %v440_v7, %v420_v42 }
 0x248   :  { %273 = vst [vmem:[%s585_s3 + $0x40] sm:$0xff] %v263_v8 }

</bundles_post_ra>
